<compile_context>
chip_gen: v6e
topology: v6e:2x2x1
jax: 0.10.0
libtpu: 0.0.40
codegen_flags: <defaults>
</compile_context>

<pallas_src>
import functools

import jax
import jax.numpy as jnp
from jax.experimental import pallas as pl
from jax.experimental.pallas import tpu as pltpu

LANE = 128
NEG_BIG = -1e30  # finite "-inf": exp underflows to exactly 0, no inf arithmetic


def _round_up(x, m):
    return ((x + m - 1) // m) * m


def _num_tensorcores():
    """Best-effort TensorCore count per device (2 on v7x, 1 on v5e/v6e)."""
    try:
        d = jax.devices()[0]
        n = getattr(d, "num_cores", None)
        if n:
            return int(n)
        kind = str(getattr(d, "device_kind", "")).lower()
        return 2 if "v7" in kind else 1
    except Exception:  # pragma: no cover - perf heuristic only
        return 1


def actor_kernel(x_ref, w1_ref, b1_ref, w2_ref, b2_ref, o_ref):
    # In-kernel bf16 cast of the streamed f32 activations; f32 accumulation.
    x = x_ref[...].astype(jnp.bfloat16)
    h = jnp.dot(x, w1_ref[...], preferred_element_type=jnp.float32)
    h = jnp.maximum(h + b1_ref[...], 0.0)            # b1 is (1, hidden)

    logits = jnp.dot(h.astype(jnp.bfloat16), w2_ref[...],
                     preferred_element_type=jnp.float32)
    # b2 carries the lane-padding mask: padded columns are -1e30 (and the
    # corresponding w2 columns are 0), so no explicit iota/where is needed.
    logits = logits + b2_ref[...]

    # Numerically stable softmax along the lane axis (exact reciprocal).
    m = jnp.max(logits, axis=-1, keepdims=True)
    e = jnp.exp(logits - m)
    denom = jnp.sum(e, axis=-1, keepdims=True)
    o_ref[...] = (e / denom).astype(o_ref.dtype)


def prepare_actor_params(w1, b1, w2, b2):
    """One-time parameter prep (hoisted off the hot path): cast weights to
    bf16, lane-pad w2/b2 to a multiple of 128, bake the pad mask into b2."""
    state_dim, hidden = w1.shape
    action_dim = w2.shape[1]
    a_pad = _round_up(max(action_dim, LANE), LANE)

    w1_b = w1.astype(jnp.bfloat16)
    b1_2d = b1.reshape(1, hidden).astype(jnp.float32)
    w2_p = jnp.zeros((hidden, a_pad), jnp.bfloat16).at[:, :action_dim].set(
        w2.astype(jnp.bfloat16))
    b2_2d = jnp.full((1, a_pad), NEG_BIG, jnp.float32).at[:, :action_dim].set(
        b2.astype(jnp.float32))
    return w1_b, b1_2d, w2_p, b2_2d


@functools.partial(
    jax.jit,
    static_argnames=("action_dim", "block_batch", "num_cores",
                     "vmem_limit_bytes"))
def actor_forward(x, w1_b, b1_2d, w2_p, b2_2d, *, action_dim,
                  block_batch=4096, num_cores=1,
                  vmem_limit_bytes=32 * 1024 * 1024):
    """x: [B, state_dim] f32; prepared params from prepare_actor_params.
    Returns softmax probabilities [B, action_dim] in f32."""
    B, state_dim = x.shape
    hidden = w1_b.shape[1]
    a_pad = w2_p.shape[1]

    # Grid sizing: one tile per TensorCore minimum (keeps both v7x cores busy),
    # a single grid step on 1-TC chips when the batch fits one tile, and
    # block_batch-capped tiles for large batches.
    b8 = _round_up(B, 8)
    tiles = max(num_cores, (b8 + block_batch - 1) // block_batch)
    tiles = _round_up(tiles, num_cores)
    tb = _round_up((B + tiles - 1) // tiles, 8)
    b_pad = tb * tiles

    # Only materialize a padded copy of x when the batch actually needs it.
    x_in = x if b_pad == B else (
        jnp.zeros((b_pad, state_dim), x.dtype).at[:B].set(x))

    out = pl.pallas_call(
        actor_kernel,
        out_shape=jax.ShapeDtypeStruct((b_pad, a_pad), jnp.float32),
        grid_spec=pltpu.PrefetchScalarGridSpec(
            num_scalar_prefetch=0,
            grid=(tiles,),
            in_specs=[
                # x streams over the batch grid axis.
                pl.BlockSpec((tb, state_dim), lambda i: (i, 0)),
                # Weights / biases: constant index_map -> VMEM-resident,
                # DMA'd once.
                pl.BlockSpec((state_dim, hidden), lambda i: (0, 0)),
                pl.BlockSpec((1, hidden), lambda i: (0, 0)),
                pl.BlockSpec((hidden, a_pad), lambda i: (0, 0)),
                pl.BlockSpec((1, a_pad), lambda i: (0, 0)),
            ],
            out_specs=pl.BlockSpec((tb, a_pad), lambda i: (i, 0)),
        ),
        compiler_params=pltpu.CompilerParams(
            dimension_semantics=("parallel",),   # sharded across TCs on v7x
            vmem_limit_bytes=vmem_limit_bytes,
        ),
    )(x_in, w1_b, b1_2d, w2_p, b2_2d)

    # Inside jit this slice fuses with the surrounding program instead of
    # being a standalone copy kernel.
    return out[:B, :action_dim]


def init_actor_params(key, state_dim, action_dim, hidden_dim=128):
    """PyTorch nn.Linear-style init: U(-1/sqrt(fan_in), 1/sqrt(fan_in)).
    Weights stored transposed as [in, out] so both matmuls are lane-dense."""
    k1, k2, k3, k4 = jax.random.split(key, 4)
    bound1 = 1.0 / jnp.sqrt(state_dim)
    bound2 = 1.0 / jnp.sqrt(hidden_dim)
    w1 = jax.random.uniform(k1, (state_dim, hidden_dim), jnp.float32, -bound1, bound1)
    b1 = jax.random.uniform(k2, (hidden_dim,), jnp.float32, -bound1, bound1)
    w2 = jax.random.uniform(k3, (hidden_dim, action_dim), jnp.float32, -bound2, bound2)
    b2 = jax.random.uniform(k4, (action_dim,), jnp.float32, -bound2, bound2)
    return w1, b1, w2, b2


def reference_forward(x, w1, b1, w2, b2):
    # Same bf16-input / f32-accumulate numerics as the kernel path.
    h = jnp.dot(x.astype(jnp.bfloat16), w1.astype(jnp.bfloat16),
                preferred_element_type=jnp.float32) + b1
    h = jnp.maximum(h, 0.0)
    logits = jnp.dot(h.astype(jnp.bfloat16), w2.astype(jnp.bfloat16),
                     preferred_element_type=jnp.float32) + b2
    return jax.nn.softmax(logits, axis=-1)


if __name__ == "__main__":
    key = jax.random.PRNGKey(0)
    k_x, k_p = jax.random.split(key)

    # Module defaults: hidden_dim=128; small RL-style state/action dims.
    # Batch of 1024 "environments" exercises the batch-tiled grid.
    batch = 1024
    state_dim = 16
    action_dim = 8
    hidden_dim = 128

    x = jax.random.normal(k_x, (batch, state_dim), dtype=jnp.float32)
    w1, b1, w2, b2 = init_actor_params(k_p, state_dim, action_dim, hidden_dim)

    # One-time parameter prep, hoisted off the hot forward path.
    w1_b, b1_2d, w2_p, b2_2d = prepare_actor_params(w1, b1, w2, b2)
    num_cores = _num_tensorcores()

    out = actor_forward(x, w1_b, b1_2d, w2_p, b2_2d,
                        action_dim=action_dim, num_cores=num_cores)
    out = jax.block_until_ready(out)

    ref = reference_forward(x, w1, b1, w2, b2)
    assert out.shape == (batch, action_dim)
    # bf16 matmul inputs -> ~1e-3-level error budget vs the f32 module.
    assert jnp.allclose(out, ref, atol=2e-3, rtol=2e-3), (
        float(jnp.max(jnp.abs(out - ref))))
    # Rows sum to 1 (softmax, exact reciprocal).
    assert jnp.allclose(jnp.sum(out, axis=-1), jnp.ones((batch,)), atol=1e-4)

    print("KERNEL_OK")
</pallas_src>

<mosaic_0001>
module attributes {stable_mosaic.version = 11 : i64} {
  func.func @actor_kernel(%arg0: i32, %arg1: memref<1024x16xf32, #tpu.memory_space<vmem>>, %arg2: memref<16x128xbf16, #tpu.memory_space<vmem>>, %arg3: memref<1x128xf32, #tpu.memory_space<vmem>>, %arg4: memref<128x128xbf16, #tpu.memory_space<vmem>>, %arg5: memref<1x128xf32, #tpu.memory_space<vmem>>, %arg6: memref<1024x128xf32, #tpu.memory_space<vmem>>) attributes {dimension_semantics = [#tpu.dimension_semantics<parallel>], iteration_bounds = array<i64: 1>, scalar_prefetch = 0 : i64, scratch_operands = 0 : i64, tpu.core_type = #tpu.core_type<tc>, window_params = [{transform_indices = @transform_0, window_bounds = array<i64: 1024, 16>}, {pipeline_mode = #tpu.pipeline_mode<synchronous>, transform_indices = @transform_1, window_bounds = array<i64: 16, 128>}, {pipeline_mode = #tpu.pipeline_mode<synchronous>, transform_indices = @transform_2, window_bounds = array<i64: 1, 128>}, {pipeline_mode = #tpu.pipeline_mode<synchronous>, transform_indices = @transform_3, window_bounds = array<i64: 128, 128>}, {pipeline_mode = #tpu.pipeline_mode<synchronous>, transform_indices = @transform_4, window_bounds = array<i64: 1, 128>}, {transform_indices = @transform_5, window_bounds = array<i64: 1024, 128>}]} {
    %c0 = arith.constant 0 : index
    %c0_0 = arith.constant 0 : index
    %0 = vector.load %arg1[%c0, %c0_0] : memref<1024x16xf32, #tpu.memory_space<vmem>>, vector<1024x16xf32>
    %1 = arith.truncf %0 : vector<1024x16xf32> to vector<1024x16xbf16>
    %c0_1 = arith.constant 0 : index
    %c0_2 = arith.constant 0 : index
    %2 = vector.load %arg2[%c0_1, %c0_2] : memref<16x128xbf16, #tpu.memory_space<vmem>>, vector<16x128xbf16>
    %cst = arith.constant dense<0.000000e+00> : vector<1024x128xf32>
    %3 = tpu.matmul %1, %2, %cst {dimension_numbers = #tpu.dot_dimension_numbers<[1], [0], [0], [1], [0, 0, 1, 1], [], []>} : vector<1024x16xbf16>, vector<16x128xbf16>, vector<1024x128xf32> -> vector<1024x128xf32>
    %c0_3 = arith.constant 0 : index
    %c0_4 = arith.constant 0 : index
    %4 = vector.load %arg3[%c0_3, %c0_4] : memref<1x128xf32, #tpu.memory_space<vmem>>, vector<1x128xf32>
    %5 = vector.broadcast %4 : vector<1x128xf32> to vector<1024x128xf32>
    %6 = arith.addf %3, %5 : vector<1024x128xf32>
    %cst_5 = arith.constant 0.000000e+00 : f32
    %7 = vector.broadcast %cst_5 : f32 to vector<1024x128xf32>
    %8 = arith.maximumf %6, %7 : vector<1024x128xf32>
    %9 = arith.truncf %8 : vector<1024x128xf32> to vector<1024x128xbf16>
    %c0_6 = arith.constant 0 : index
    %c0_7 = arith.constant 0 : index
    %10 = vector.load %arg4[%c0_6, %c0_7] : memref<128x128xbf16, #tpu.memory_space<vmem>>, vector<128x128xbf16>
    %cst_8 = arith.constant dense<0.000000e+00> : vector<1024x128xf32>
    %11 = tpu.matmul %9, %10, %cst_8 {dimension_numbers = #tpu.dot_dimension_numbers<[1], [0], [0], [1], [0, 0, 1, 1], [], []>} : vector<1024x128xbf16>, vector<128x128xbf16>, vector<1024x128xf32> -> vector<1024x128xf32>
    %c0_9 = arith.constant 0 : index
    %c0_10 = arith.constant 0 : index
    %12 = vector.load %arg5[%c0_9, %c0_10] : memref<1x128xf32, #tpu.memory_space<vmem>>, vector<1x128xf32>
    %13 = vector.broadcast %12 : vector<1x128xf32> to vector<1024x128xf32>
    %14 = arith.addf %11, %13 : vector<1024x128xf32>
    %cst_11 = arith.constant dense<0xFF800000> : vector<1024xf32>
    %15 = vector.multi_reduction <maximumf>, %14, %cst_11 [1] : vector<1024x128xf32> to vector<1024xf32>
    %16 = vector.shape_cast %15 : vector<1024xf32> to vector<1024x1xf32>
    %17 = vector.broadcast %16 : vector<1024x1xf32> to vector<1024x128xf32>
    %18 = arith.subf %14, %17 : vector<1024x128xf32>
    %19 = math.exp %18 : vector<1024x128xf32>
    %cst_12 = arith.constant dense<0.000000e+00> : vector<1024xf32>
    %20 = vector.multi_reduction <add>, %19, %cst_12 [1] : vector<1024x128xf32> to vector<1024xf32>
    %21 = vector.shape_cast %20 : vector<1024xf32> to vector<1024x1xf32>
    %22 = vector.broadcast %21 : vector<1024x1xf32> to vector<1024x128xf32>
    %23 = arith.divf %19, %22 : vector<1024x128xf32>
    %c0_13 = arith.constant 0 : index
    %c0_14 = arith.constant 0 : index
    %24 = vector.load %arg6[%c0_13, %c0_14] : memref<1024x128xf32, #tpu.memory_space<vmem>>, vector<1024x128xf32>
    tpu.vector_store %arg6[%c0_13, %c0_14], %23 {strides = array<i32>} : memref<1024x128xf32, #tpu.memory_space<vmem>>, vector<1024x128xf32>,
    return
  }
  func.func @transform_0(%arg0: i32) -> (i32, i32) {
    %c0_i32 = arith.constant 0 : i32
    %c0_i32_0 = arith.constant 0 : i32
    return %arg0, %c0_i32 : i32, i32
  }
  func.func @transform_1(%arg0: i32) -> (i32, i32) {
    %c0_i32 = arith.constant 0 : i32
    %c0_i32_0 = arith.constant 0 : i32
    %c0_i32_1 = arith.constant 0 : i32
    return %c0_i32, %c0_i32_0 : i32, i32
  }
  func.func @transform_2(%arg0: i32) -> (i32, i32) {
    %c0_i32 = arith.constant 0 : i32
    %c0_i32_0 = arith.constant 0 : i32
    %c0_i32_1 = arith.constant 0 : i32
    return %c0_i32, %c0_i32_0 : i32, i32
  }
  func.func @transform_3(%arg0: i32) -> (i32, i32) {
    %c0_i32 = arith.constant 0 : i32
    %c0_i32_0 = arith.constant 0 : i32
    %c0_i32_1 = arith.constant 0 : i32
    return %c0_i32, %c0_i32_0 : i32, i32
  }
  func.func @transform_4(%arg0: i32) -> (i32, i32) {
    %c0_i32 = arith.constant 0 : i32
    %c0_i32_0 = arith.constant 0 : i32
    %c0_i32_1 = arith.constant 0 : i32
    return %c0_i32, %c0_i32_0 : i32, i32
  }
  func.func @transform_5(%arg0: i32) -> (i32, i32) {
    %c0_i32 = arith.constant 0 : i32
    %c0_i32_0 = arith.constant 0 : i32
    return %arg0, %c0_i32 : i32, i32
  }
}

</mosaic_0001>

<bundles_post_ra>
// kernel: actor_forward.1
= control target key start
LH: loop header
LB: loop body
LE: loop exit
PB: predicated region body
PF: predicated region fallthrough
CT: control target
= control target key end

     0   :  { %vm228_vm0 = vcmask 130048   ;;  %s6620_s1 = inlined_call_operand.vmem [shape: bf16[16,128], index: 1, kind: input, shape index: {}]   ;;  %s6621_s0 = inlined_call_operand.vmem [shape: f32[1024,16], index: 0, kind: input, shape index: {}]   ;;  %s6622_s3 = inlined_call_operand.vmem [shape: bf16[128,128], index: 3, kind: input, shape index: {}]   ;;  %s6623_s2 = inlined_call_operand.vmem [shape: f32[1,128], index: 2, kind: input, shape index: {}]   ;;  %s6624_s4 = inlined_call_operand.vmem [shape: f32[1,128], index: 4, kind: input, shape index: {}]   ;;  %s6625_s5 = inlined_call_operand.vmem [shape: f32[1024,128], index: 5, kind: output, shape index: {}]  }
   0x1   :  { %v3560_v0 = vld [vmem:[%s6620_s1] sm:$0xff]   ;;  %v22_v2 = vld [vmem:[%s6621_s0 + $0x8] sm:$0xff]  ;;  %v23_v3 = vld [vmem:[%s6621_s0 + $0x10] sm:$0xff] }
   0x2   :  { %v21_v1 = vld [vmem:[%s6621_s0] sm:$0xff]  ;;  %3270 = vmatprep.subr.bf16.mxu0 %v3560_v0  ;;  %v24_v5 = vld [vmem:[%s6621_s0 + $0x18] sm:$0xff]  ;;  %v26_v9 = vld [vmem:[%s6621_s0 + $0x28] sm:$0xff] }
   0x3   :  { %v149_v4 = vpack.c.bf16 %v22_v2, %v21_v1  ;;  %3271 = vmatpush3.bf16.msra.mxu0 %v3560_v0  ;;  %v150_v6 = vpack.c.bf16 %v24_v5, %v23_v3  ;;  %v3561_v7 = vld [vmem:[%s6622_s3 + $0x38] sm:$0xff]   ;;  %v25_v8 = vld [vmem:[%s6621_s0 + $0x20] sm:$0xff]  ;;  %v27_v11 = vld [vmem:[%s6621_s0 + $0x30] sm:$0xff] }
   0x4   :  { %v151_v10 = vpack.c.bf16 %v26_v9, %v25_v8  ;;  %3400 = vmatprep.subr.bf16.mxu0 %v3561_v7  ;;  %3544 = vmatprep.subr.bf16.mxu1 %v3561_v7  ;;  %v28_v12 = vld [vmem:[%s6621_s0 + $0x38] sm:$0xff]  ;;  %v29_v13 = vld [vmem:[%s6621_s0 + $0x40] sm:$0xff]  ;;  %v30_v14 = vld [vmem:[%s6621_s0 + $0x48] sm:$0xff] }
   0x5   :  { %3272 = vmatprep.mubr.msk.bf16.mxu0 %vm228_vm0, %v149_v4  ;;  %3552 = vmatpush3.bf16.msra.mxu1 %v3561_v7  ;;  %v3562_v15 = vld [vmem:[%s6622_s3 + $0x30] sm:$0xff]   ;;  %v152_v16 = vpack.c.bf16 %v28_v12, %v27_v11  ;;  %v153_v17 = vpack.c.bf16 %v30_v14, %v29_v13  ;;  %v32_v19 = vld [vmem:[%s6621_s0 + $0x58] sm:$0xff]  ;;  %v3563_v20 = vld [vmem:[%s6622_s3 + $0x28] sm:$0xff]  }
   0x6   :  { %3273 = vmatmul.mubr.msk.bf16.vlgmr.msra.gmra.mxu0 %vm228_vm0, %v150_v6  ;;  %3545 = vmatprep.subr.bf16.mxu1 %v3562_v15  ;;  %v31_v18 = vld [vmem:[%s6621_s0 + $0x50] sm:$0xff]  ;;  %v33_v21 = vld [vmem:[%s6621_s0 + $0x60] sm:$0xff]  ;;  %v34_v22 = vld [vmem:[%s6621_s0 + $0x68] sm:$0xff] }
   0x7   :  { %3401 = vmatpush3.bf16.msra.mxu0 %v3561_v7  ;;  %3276 = vmatprep.mubr.msk.bf16.mxu0 %vm228_vm0, %v151_v10  ;;  %v154_v23 = vpack.c.bf16 %v32_v19, %v31_v18  ;;  %v155_v24 = vpack.c.bf16 %v34_v22, %v33_v21  ;;  %v3564_v25 = vld [vmem:[%s6622_s3 + $0x20] sm:$0xff]   ;;  %v35_v26 = vld [vmem:[%s6621_s0 + $0x70] sm:$0xff]  ;;  %v36_v27 = vld [vmem:[%s6621_s0 + $0x78] sm:$0xff] }
   0x8   :  { %3402 = vmatprep.subr.bf16.mxu0 %v3562_v15  ;;  %v37_v28 = vld [vmem:[%s6621_s0 + $0x80] sm:$0xff]  ;;  %v38_v29 = vld [vmem:[%s6621_s0 + $0x88] sm:$0xff]  ;;  %v156_v30 = vpack.c.bf16 %v36_v27, %v35_v26  ;;  %v3565_v32 = vld [vmem:[%s6622_s3 + $0x18] sm:$0xff]  }
   0x9   :  { %3553 = vmatpush3.bf16.msra.mxu1 %v3562_v15  ;;  %v157_v31 = vpack.c.bf16 %v38_v29, %v37_v28  ;;  %v39_v33 = vld [vmem:[%s6621_s0 + $0x90] sm:$0xff]  ;;  %v40_v34 = vld [vmem:[%s6621_s0 + $0x98] sm:$0xff]  ;;  %v41_v35 = vld [vmem:[%s6621_s0 + $0xa0] sm:$0xff] }
   0xa   :  { %3546 = vmatprep.subr.bf16.mxu1 %v3563_v20  ;;  %v42_v36 = vld [vmem:[%s6621_s0 + $0xa8] sm:$0xff]  ;;  %v158_v37 = vpack.c.bf16 %v40_v34, %v39_v33  ;;  %v3566_v39 = vld [vmem:[%s6622_s3 + $0x10] sm:$0xff]   ;;  %v44_v41 = vld [vmem:[%s6621_s0 + $0xb8] sm:$0xff] }
   0xb   :  { %3403 = vmatpush3.bf16.msra.mxu0 %v3562_v15  ;;  %v159_v38 = vpack.c.bf16 %v42_v36, %v41_v35  ;;  %v43_v40 = vld [vmem:[%s6621_s0 + $0xb0] sm:$0xff]  ;;  %v45_v42 = vld [vmem:[%s6621_s0 + $0xc0] sm:$0xff]  ;;  %v46_v43 = vld [vmem:[%s6621_s0 + $0xc8] sm:$0xff] }
   0xc   :  { %3404 = vmatprep.subr.bf16.mxu0 %v3563_v20  ;;  %v160_v44 = vpack.c.bf16 %v44_v41, %v43_v40  ;;  %v161_v45 = vpack.c.bf16 %v46_v43, %v45_v42  ;;  %v47_v46 = vld [vmem:[%s6621_s0 + $0xd0] sm:$0xff]  ;;  %v48_v47 = vld [vmem:[%s6621_s0 + $0xd8] sm:$0xff]  ;;  %v49_v48 = vld [vmem:[%s6621_s0 + $0xe0] sm:$0xff] }
   0xd   :  { %3554 = vmatpush3.bf16.msra.mxu1 %v3563_v20  ;;  %v50_v49 = vld [vmem:[%s6621_s0 + $0xe8] sm:$0xff]  ;;  %v162_v50 = vpack.c.bf16 %v48_v47, %v47_v46  ;;  %v51_v52 = vld [vmem:[%s6621_s0 + $0xf0] sm:$0xff]  ;;  %v52_v53 = vld [vmem:[%s6621_s0 + $0xf8] sm:$0xff] }
   0xe   :  { %3277 = vmatmul.mubr.msk.bf16.gmra.mxu0 %vm228_vm0, %v152_v16  ;;  %3547 = vmatprep.subr.bf16.mxu1 %v3564_v25  ;;  %v163_v51 = vpack.c.bf16 %v50_v49, %v49_v48  ;;  %v53_v54 = vld [vmem:[%s6621_s0 + $0x100] sm:$0xff]  ;;  %v54_v55 = vld [vmem:[%s6621_s0 + $0x108] sm:$0xff]  ;;  %v164_v56 = vpack.c.bf16 %v52_v53, %v51_v52  ;;  %v55_v58 = vld [vmem:[%s6621_s0 + $0x110] sm:$0xff] }
   0xf   :  { %3280 = vmatprep.mubr.msk.bf16.mxu0 %vm228_vm0, %v153_v17  ;;  %3405 = vmatpush3.bf16.msra.mxu0 %v3563_v20  ;;  %v165_v57 = vpack.c.bf16 %v54_v55, %v53_v54  ;;  %v56_v59 = vld [vmem:[%s6621_s0 + $0x118] sm:$0xff]  ;;  %v57_v60 = vld [vmem:[%s6621_s0 + $0x120] sm:$0xff]  ;;  %v58_v61 = vld [vmem:[%s6621_s0 + $0x128] sm:$0xff] }
  0x10   :  { %3406 = vmatprep.subr.bf16.mxu0 %v3564_v25  ;;  %v166_v62 = vpack.c.bf16 %v56_v59, %v55_v58  ;;  %v167_v63 = vpack.c.bf16 %v58_v61, %v57_v60  ;;  %v59_v0 = vld [vmem:[%s6621_s0 + $0x130] sm:$0xff]  ;;  %v60_v1 = vld [vmem:[%s6621_s0 + $0x138] sm:$0xff]  ;;  %v61_v2 = vld [vmem:[%s6621_s0 + $0x140] sm:$0xff] }
  0x11   :  { %3555 = vmatpush3.bf16.msra.mxu1 %v3564_v25  ;;  %v62_v3 = vld [vmem:[%s6621_s0 + $0x148] sm:$0xff]  ;;  %v168_v5 = vpack.c.bf16 %v60_v1, %v59_v0  ;;  %v63_v7 = vld [vmem:[%s6621_s0 + $0x150] sm:$0xff]  ;;  %v64_v8 = vld [vmem:[%s6621_s0 + $0x158] sm:$0xff] }
  0x12   :  { %3548 = vmatprep.subr.bf16.mxu1 %v3565_v32  ;;  %v3567_v4 = vld [vmem:[%s6622_s3 + $0x8] sm:$0xff]   ;;  %v169_v6 = vpack.c.bf16 %v62_v3, %v61_v2  ;;  %v65_v9 = vld [vmem:[%s6621_s0 + $0x160] sm:$0xff]  ;;  %v170_v11 = vpack.c.bf16 %v64_v8, %v63_v7  ;;  %v67_v14 = vld [vmem:[%s6621_s0 + $0x170] sm:$0xff] }
  0x13   :  { %3407 = vmatpush3.bf16.msra.mxu0 %v3564_v25  ;;  %v66_v10 = vld [vmem:[%s6621_s0 + $0x168] sm:$0xff]  ;;  %v3568_v13 = vld [vmem:[%s6622_s3] sm:$0xff]   ;;  %v68_v15 = vld [vmem:[%s6621_s0 + $0x178] sm:$0xff] }
  0x14   :  { %3408 = vmatprep.subr.bf16.mxu0 %v3565_v32  ;;  %v171_v12 = vpack.c.bf16 %v66_v10, %v65_v9  ;;  %v69_v16 = vld [vmem:[%s6621_s0 + $0x180] sm:$0xff]  ;;  %v70_v17 = vld [vmem:[%s6621_s0 + $0x188] sm:$0xff]  ;;  %v172_v18 = vpack.c.bf16 %v68_v15, %v67_v14  ;;  %v71_v20 = vld [vmem:[%s6621_s0 + $0x190] sm:$0xff] }
  0x15   :  { %3556 = vmatpush3.bf16.msra.mxu1 %v3565_v32  ;;  %v173_v19 = vpack.c.bf16 %v70_v17, %v69_v16  ;;  %v72_v21 = vld [vmem:[%s6621_s0 + $0x198] sm:$0xff]  ;;  %v73_v22 = vld [vmem:[%s6621_s0 + $0x1a0] sm:$0xff]  ;;  %v75_v26 = vld [vmem:[%s6621_s0 + $0x1b0] sm:$0xff] }
  0x16   :  { %3281 = vmatmul.mubr.msk.bf16.gmra.mxu0 %vm228_vm0, %v154_v23  ;;  %3549 = vmatprep.subr.bf16.mxu1 %v3566_v39  ;;  %v74_v23 = vld [vmem:[%s6621_s0 + $0x1a8] sm:$0xff]  ;;  %v76_v27 = vld [vmem:[%s6621_s0 + $0x1b8] sm:$0xff]  ;;  %v77_v28 = vld [vmem:[%s6621_s0 + $0x1c0] sm:$0xff] }
  0x17   :  { %3284 = vmatprep.mubr.msk.bf16.mxu0 %vm228_vm0, %v155_v24  ;;  %3409 = vmatpush3.bf16.msra.mxu0 %v3565_v32  ;;  %v174_v24 = vpack.c.bf16 %v72_v21, %v71_v20  ;;  %v175_v25 = vpack.c.bf16 %v74_v23, %v73_v22  ;;  %v78_v29 = vld [vmem:[%s6621_s0 + $0x1c8] sm:$0xff]  ;;  %v79_v32 = vld [vmem:[%s6621_s0 + $0x1d0] sm:$0xff]  ;;  %v80_v33 = vld [vmem:[%s6621_s0 + $0x1d8] sm:$0xff] }
  0x18   :  { %3410 = vmatprep.subr.bf16.mxu0 %v3566_v39  ;;  %v81_v34 = vld [vmem:[%s6621_s0 + $0x1e0] sm:$0xff]  ;;  %v82_v35 = vld [vmem:[%s6621_s0 + $0x1e8] sm:$0xff]  ;;  %v178_v36 = vpack.c.bf16 %v80_v33, %v79_v32  ;;  %v107_v10 = vld [vmem:[%s6621_s0 + $0x2b0] sm:$0xff] }
  0x19   :  { %3557 = vmatpush3.bf16.msra.mxu1 %v3566_v39  ;;  %v85_v40 = vld [vmem:[%s6621_s0 + $0x200] sm:$0xff]  ;;  %v86_v41 = vld [vmem:[%s6621_s0 + $0x208] sm:$0xff]  ;;  %v111_v16 = vld [vmem:[%s6621_s0 + $0x2d0] sm:$0xff] }
  0x1a   :  { %3550 = vmatprep.subr.bf16.mxu1 %v3567_v4  ;;  %v181_v43 = vpack.c.bf16 %v86_v41, %v85_v40  ;;  %v89_v46 = vld [vmem:[%s6621_s0 + $0x220] sm:$0xff]  ;;  %v90_v47 = vld [vmem:[%s6621_s0 + $0x228] sm:$0xff]  ;;  %v112_v17 = vld [vmem:[%s6621_s0 + $0x2d8] sm:$0xff] }
  0x1b   :  { %3411 = vmatpush3.bf16.msra.mxu0 %v3566_v39  ;;  %v84_v39 = vld [vmem:[%s6621_s0 + $0x1f8] sm:$0xff]  ;;  %v183_v49 = vpack.c.bf16 %v90_v47, %v89_v46  ;;  %v93_v52 = vld [vmem:[%s6621_s0 + $0x240] sm:$0xff]  ;;  %v94_v53 = vld [vmem:[%s6621_s0 + $0x248] sm:$0xff]  ;;  %v194_v20 = vpack.c.bf16 %v112_v17, %v111_v16 }
  0x1c   :  { %3412 = vmatprep.subr.bf16.mxu0 %v3567_v4  ;;  %v185_v55 = vpack.c.bf16 %v94_v53, %v93_v52  ;;  %v97_v58 = vld [vmem:[%s6621_s0 + $0x260] sm:$0xff]  ;;  %v98_v59 = vld [vmem:[%s6621_s0 + $0x268] sm:$0xff]  ;;  %v115_v22 = vld [vmem:[%s6621_s0 + $0x2f0] sm:$0xff] }
  0x1d   :  { %3558 = vmatpush3.bf16.msra.mxu1 %v3567_v4  ;;  %v187_v61 = vpack.c.bf16 %v98_v59, %v97_v58  ;;  %v101_v0 = vld [vmem:[%s6621_s0 + $0x280] sm:$0xff]  ;;  %v102_v1 = vld [vmem:[%s6621_s0 + $0x288] sm:$0xff]  ;;  %v116_v23 = vld [vmem:[%s6621_s0 + $0x2f8] sm:$0xff] }
  0x1e   :  { %3285 = vmatmul.mubr.msk.bf16.gmra.mxu0 %vm228_vm0, %v156_v30  ;;  %3551 = vmatprep.subr.bf16.mxu1 %v3568_v13  ;;  %v176_v30 = vpack.c.bf16 %v76_v27, %v75_v26  ;;  %v189_v3 = vpack.c.bf16 %v102_v1, %v101_v0  ;;  %v106_v7 = vld [vmem:[%s6621_s0 + $0x2a8] sm:$0xff]  ;;  %v196_v26 = vpack.c.bf16 %v116_v23, %v115_v22  ;;  %v128_v46 = vld [vmem:[%s6621_s0 + $0x358] sm:$0xff]  ;;  %v137_v23 = vld [vmem:[%s6621_s0 + $0x3a0] sm:$0xff] }
  0x1f   :  { %3288 = vmatprep.mubr.msk.bf16.mxu0 %vm228_vm0, %v157_v31  ;;  %3413 = vmatpush3.bf16.msra.mxu0 %v3567_v4  ;;  %v177_v31 = vpack.c.bf16 %v78_v29, %v77_v28  ;;  %v103_v4 = vld [vmem:[%s6621_s0 + $0x290] sm:$0xff]  ;;  %v120_v29 = vld [vmem:[%s6621_s0 + $0x318] sm:$0xff] }
  0x20   :  { %3414 = vmatprep.subr.bf16.mxu0 %v3568_v13  ;;  %v119_v28 = vld [vmem:[%s6621_s0 + $0x310] sm:$0xff]  ;;  %v132_v0 = vld [vmem:[%s6621_s0 + $0x378] sm:$0xff] }
  0x21   :  { %3559 = vmatpush3.bf16.msra.mxu1 %v3568_v13  ;;  %v198_v32 = vpack.c.bf16 %v120_v29, %v119_v28 }
  0x23   :  { %3415 = vmatpush3.bf16.msra.mxu0 %v3568_v13  ;;  %v110_v13 = vld [vmem:[%s6621_s0 + $0x2c8] sm:$0xff] }
  0x26   :  { %3289 = vmatmul.mubr.msk.bf16.gmra.mxu0 %vm228_vm0, %v158_v37  ;;  %v179_v37 = vpack.c.bf16 %v82_v35, %v81_v34  ;;  %v123_v35 = vld [vmem:[%s6621_s0 + $0x330] sm:$0xff] }
  0x27   :  { %3292 = vmatprep.mubr.msk.bf16.mxu0 %vm228_vm0, %v159_v38  ;;  %v83_v38 = vld [vmem:[%s6621_s0 + $0x1f0] sm:$0xff] }
  0x28   :  { %v180_v42 = vpack.c.bf16 %v84_v39, %v83_v38  ;;  %v125_v38 = vld [vmem:[%s6621_s0 + $0x340] sm:$0xff]  ;;  %v126_v39 = vld [vmem:[%s6621_s0 + $0x348] sm:$0xff] }
  0x2e   :  { %3293 = vmatmul.mubr.msk.bf16.gmra.mxu0 %vm228_vm0, %v160_v44  ;;  %v87_v44 = vld [vmem:[%s6621_s0 + $0x210] sm:$0xff] }
  0x2f   :  { %3296 = vmatprep.mubr.msk.bf16.mxu0 %vm228_vm0, %v161_v45  ;;  %v88_v45 = vld [vmem:[%s6621_s0 + $0x218] sm:$0xff] }
  0x30   :  { %v182_v48 = vpack.c.bf16 %v88_v45, %v87_v44  ;;  %v127_v45 = vld [vmem:[%s6621_s0 + $0x350] sm:$0xff] }
  0x31   :  { %v202_v52 = vpack.c.bf16 %v128_v46, %v127_v45 }
  0x36   :  { %3297 = vmatmul.mubr.msk.bf16.gmra.mxu0 %vm228_vm0, %v162_v50  ;;  %v91_v50 = vld [vmem:[%s6621_s0 + $0x230] sm:$0xff] }
  0x37   :  { %3300 = vmatprep.mubr.msk.bf16.mxu0 %vm228_vm0, %v163_v51  ;;  %v92_v51 = vld [vmem:[%s6621_s0 + $0x238] sm:$0xff] }
  0x38   :  { %v184_v54 = vpack.c.bf16 %v92_v51, %v91_v50  ;;  %v4534_v50 = vld [vmem:[%s6623_s2] ss:$0 sm:$0xff] }
  0x3e   :  { %3301 = vmatmul.mubr.msk.bf16.gmra.mxu0 %vm228_vm0, %v164_v56  ;;  %v95_v56 = vld [vmem:[%s6621_s0 + $0x250] sm:$0xff] }
  0x3f   :  { %3304 = vmatprep.mubr.msk.bf16.mxu0 %vm228_vm0, %v165_v57  ;;  %v96_v57 = vld [vmem:[%s6621_s0 + $0x258] sm:$0xff] }
  0x40   :  { %v186_v60 = vpack.c.bf16 %v96_v57, %v95_v56 }
  0x46   :  { %3305 = vmatmul.mubr.msk.bf16.gmra.mxu0 %vm228_vm0, %v166_v62  ;;  %v99_v62 = vld [vmem:[%s6621_s0 + $0x270] sm:$0xff] }
  0x47   :  { %3308 = vmatprep.mubr.msk.bf16.mxu0 %vm228_vm0, %v167_v63  ;;  %v100_v63 = vld [vmem:[%s6621_s0 + $0x278] sm:$0xff] }
  0x48   :  { %v188_v2 = vpack.c.bf16 %v100_v63, %v99_v62  ;;  %v131_v63 = vld [vmem:[%s6621_s0 + $0x370] sm:$0xff] }
  0x4e   :  { %3309 = vmatmul.mubr.msk.bf16.gmra.mxu0 %vm228_vm0, %v168_v5  ;;  %v104_v5 = vld [vmem:[%s6621_s0 + $0x298] sm:$0xff] }
  0x4f   :  { %3312 = vmatprep.mubr.msk.bf16.mxu0 %vm228_vm0, %v169_v6  ;;  %v105_v6 = vld [vmem:[%s6621_s0 + $0x2a0] sm:$0xff]  ;;  %v190_v8 = vpack.c.bf16 %v104_v5, %v103_v4  ;;  %v134_v4 = vld [vmem:[%s6621_s0 + $0x388] sm:$0xff] }
  0x50   :  { %v191_v9 = vpack.c.bf16 %v106_v7, %v105_v6 }
  0x56   :  { %3313 = vmatmul.mubr.msk.bf16.gmra.mxu0 %vm228_vm0, %v170_v11  ;;  %v108_v11 = vld [vmem:[%s6621_s0 + $0x2b8] sm:$0xff] }
  0x57   :  { %3316 = vmatprep.mubr.msk.bf16.mxu0 %vm228_vm0, %v171_v12  ;;  %v109_v12 = vld [vmem:[%s6621_s0 + $0x2c0] sm:$0xff]  ;;  %v192_v14 = vpack.c.bf16 %v108_v11, %v107_v10 }
  0x58   :  { %v193_v15 = vpack.c.bf16 %v110_v13, %v109_v12 }
  0x5e   :  { %3317 = vmatmul.mubr.msk.bf16.gmra.mxu0 %vm228_vm0, %v172_v18  ;;  %v113_v18 = vld [vmem:[%s6621_s0 + $0x2e0] sm:$0xff] }
  0x5f   :  { %3320 = vmatprep.mubr.msk.bf16.mxu0 %vm228_vm0, %v173_v19  ;;  %v114_v19 = vld [vmem:[%s6621_s0 + $0x2e8] sm:$0xff] }
  0x60   :  { %v195_v21 = vpack.c.bf16 %v114_v19, %v113_v18  ;;  %v135_v19 = vld [vmem:[%s6621_s0 + $0x390] sm:$0xff] }
  0x66   :  { %3321 = vmatmul.mubr.msk.bf16.gmra.mxu0 %vm228_vm0, %v174_v24  ;;  %v117_v24 = vld [vmem:[%s6621_s0 + $0x300] sm:$0xff] }
  0x67   :  { %3324 = vmatprep.mubr.msk.bf16.mxu0 %vm228_vm0, %v175_v25  ;;  %v118_v25 = vld [vmem:[%s6621_s0 + $0x308] sm:$0xff] }
  0x68   :  { %v197_v27 = vpack.c.bf16 %v118_v25, %v117_v24  ;;  %v138_v24 = vld [vmem:[%s6621_s0 + $0x3a8] sm:$0xff] }
  0x6e   :  { %3325 = vmatmul.mubr.msk.bf16.gmra.mxu0 %vm228_vm0, %v176_v30  ;;  %v121_v30 = vld [vmem:[%s6621_s0 + $0x320] sm:$0xff] }
  0x6f   :  { %3328 = vmatprep.mubr.msk.bf16.mxu0 %vm228_vm0, %v177_v31  ;;  %v122_v31 = vld [vmem:[%s6621_s0 + $0x328] sm:$0xff] }
  0x70   :  { %v199_v33 = vpack.c.bf16 %v122_v31, %v121_v30  ;;  %v207_v31 = vpack.c.bf16 %v138_v24, %v137_v23 }
  0x76   :  { %3329 = vmatmul.mubr.msk.bf16.gmra.mxu0 %vm228_vm0, %v178_v36  ;;  %v124_v36 = vld [vmem:[%s6621_s0 + $0x338] sm:$0xff] }
  0x77   :  { %3332 = vmatprep.mubr.msk.bf16.mxu0 %vm228_vm0, %v179_v37  ;;  %v200_v41 = vpack.c.bf16 %v124_v36, %v123_v35 }
  0x7e   :  { %3333 = vmatmul.mubr.msk.bf16.gmra.mxu0 %vm228_vm0, %v180_v42  ;;  %v201_v42 = vpack.c.bf16 %v126_v39, %v125_v38 }
  0x7f   :  { %3336 = vmatprep.mubr.msk.bf16.mxu0 %vm228_vm0, %v181_v43 }
  0x86   :  { %3337 = vmatmul.mubr.msk.bf16.gmra.mxu0 %vm228_vm0, %v182_v48  ;;  %v129_v48 = vld [vmem:[%s6621_s0 + $0x360] sm:$0xff] }
  0x87   :  { %3340 = vmatprep.mubr.msk.bf16.mxu0 %vm228_vm0, %v183_v49  ;;  %v130_v49 = vld [vmem:[%s6621_s0 + $0x368] sm:$0xff] }
  0x8e   :  { %3341 = vmatmul.mubr.msk.bf16.gmra.mxu0 %vm228_vm0, %v184_v54 }
  0x8f   :  { %3344 = vmatprep.mubr.msk.bf16.mxu0 %vm228_vm0, %v185_v55  ;;  %v203_v55 = vpack.c.bf16 %v130_v49, %v129_v48  ;;  %v142_v48 = vld [vmem:[%s6621_s0 + $0x3c8] sm:$0xff] }
  0x96   :  { %3345 = vmatmul.mubr.msk.bf16.gmra.mxu0 %vm228_vm0, %v186_v60 }
  0x97   :  { %3348 = vmatprep.mubr.msk.bf16.mxu0 %vm228_vm0, %v187_v61 }
  0x9e   :  { %3349 = vmatmul.mubr.msk.bf16.gmra.mxu0 %vm228_vm0, %v188_v2 }
  0x9f   :  { %3352 = vmatprep.mubr.msk.bf16.mxu0 %vm228_vm0, %v189_v3  ;;  %v133_v3 = vld [vmem:[%s6621_s0 + $0x380] sm:$0xff] }
  0xa0   :  { %v205_v11 = vpack.c.bf16 %v134_v4, %v133_v3  ;;  %v145_v4 = vld [vmem:[%s6621_s0 + $0x3e0] sm:$0xff] }
  0xa6   :  { %3353 = vmatmul.mubr.msk.bf16.gmra.mxu0 %vm228_vm0, %v190_v8  ;;  %v204_v8 = vpack.c.bf16 %v132_v0, %v131_v63  ;;  %v143_v0 = vld [vmem:[%s6621_s0 + $0x3d0] sm:$0xff] }
  0xa7   :  { %3356 = vmatprep.mubr.msk.bf16.mxu0 %vm228_vm0, %v191_v9 }
  0xae   :  { %3357 = vmatmul.mubr.msk.bf16.gmra.mxu0 %vm228_vm0, %v192_v14 }
  0xaf   :  { %3360 = vmatprep.mubr.msk.bf16.mxu0 %vm228_vm0, %v193_v15 }
  0xb6   :  { %3361 = vmatmul.mubr.msk.bf16.gmra.mxu0 %vm228_vm0, %v194_v20  ;;  %v136_v20 = vld [vmem:[%s6621_s0 + $0x398] sm:$0xff] }
  0xb7   :  { %3364 = vmatprep.mubr.msk.bf16.mxu0 %vm228_vm0, %v195_v21  ;;  %v206_v28 = vpack.c.bf16 %v136_v20, %v135_v19 }
  0xbe   :  { %3365 = vmatmul.mubr.msk.bf16.gmra.mxu0 %vm228_vm0, %v196_v26 }
  0xbf   :  { %3368 = vmatprep.mubr.msk.bf16.mxu0 %vm228_vm0, %v197_v27 }
  0xc6   :  { %v4495_v34 = vpop.f32.mrf.mxu0  ;;  %3369 = vmatmul.mubr.msk.bf16.gmra.mxu0 %vm228_vm0, %v198_v32 }
  0xc7   :  { %3372 = vmatprep.mubr.msk.bf16.mxu0 %vm228_vm0, %v199_v33 }
  0xc8   :  { %v4505_v37 = vpop.f32.mrf.mxu0 }
  0xc9   :  { %v456_v19 = vadd.f32 %v4534_v50, %v4505_v37 }
  0xca   :  { %v4513_v40 = vpop.f32.mrf.mxu0 }
  0xcb   :  { %v966_v37 = vmax.f32 %v456_v19, 0.0 }
  0xcc   :  { %v4515_v43 = vpop.f32.mrf.mxu0 }
  0xce   :  { %v3278_v44 = vpop.f32.mrf.mxu0  ;;  %3373 = vmatmul.mubr.msk.bf16.gmra.mxu0 %vm228_vm0, %v200_v41 }
  0xcf   :  { %3376 = vmatprep.mubr.msk.bf16.mxu0 %vm228_vm0, %v201_v42  ;;  %v480_v56 = vadd.f32 %v3278_v44, %v4534_v50  ;;  %v139_v42 = vld [vmem:[%s6621_s0 + $0x3b0] sm:$0xff]  ;;  %v140_v44 = vld [vmem:[%s6621_s0 + $0x3b8] sm:$0xff] }
  0xd0   :  { %v471_v47 = vpop.f32.mrf.mxu0 }
  0xd1   :  { %v472_v53 = vadd.f32 %v4534_v50, %v471_v47  ;;  %v972_v1 = vmax.f32 %v480_v56, 0.0  ;;  %v141_v47 = vld [vmem:[%s6621_s0 + $0x3c0] sm:$0xff] }
  0xd2   :  { %v3279_v51 = vpop.f32.mrf.mxu0  ;;  %v209_v56 = vpack.c.bf16 %v142_v48, %v141_v47 }
  0xd3   :  { %v483_v54 = vadd.f32 %v3279_v51, %v4534_v50  ;;  %v970_v61 = vmax.f32 %v472_v53, 0.0  ;;  %v208_v53 = vpack.c.bf16 %v140_v44, %v139_v42 }
  0xd4   :  { %v474_v57 = vpop.f32.mrf.mxu0 }
  0xd5   :  { %v475_v58 = vadd.f32 %v4534_v50, %v474_v57  ;;  %v973_v59 = vmax.f32 %v483_v54, 0.0 }
  0xd6   :  { %v3282_v60 = vpop.f32.mrf.mxu0  ;;  %3377 = vmatmul.mubr.msk.bf16.gmra.mxu0 %vm228_vm0, %v202_v52 }
  0xd7   :  { %v971_v62 = vmax.f32 %v475_v58, 0.0  ;;  %3380 = vmatprep.mubr.msk.bf16.mxu0 %vm228_vm0, %v203_v55  ;;  %v1097_v6 = vpack.c.bf16 %v973_v59, %v972_v1  ;;  %v496_v12 = vadd.f32 %v3282_v60, %v4534_v50  ;;  %v144_v1 = vld [vmem:[%s6621_s0 + $0x3d8] sm:$0xff] }
  0xd8   :  { %v487_v2 = vpop.f32.mrf.mxu0 }
  0xd9   :  { %v1096_v5 = vpack.c.bf16 %v971_v62, %v970_v61  ;;  %v488_v9 = vadd.f32 %v4534_v50, %v487_v2  ;;  %v976_v21 = vmax.f32 %v496_v12, 0.0 }
  0xda   :  { %v3283_v7 = vpop.f32.mrf.mxu0 }
  0xdb   :  { %v499_v10 = vadd.f32 %v3283_v7, %v4534_v50  ;;  %3420 = vmatprep.mubr.bf16.mxu1 %v1096_v5  ;;  %v974_v17 = vmax.f32 %v488_v9, 0.0  ;;  %v146_v5 = vld [vmem:[%s6621_s0 + $0x3e8] sm:$0xff]  ;;  %v210_v9 = vpack.c.bf16 %v144_v1, %v143_v0 }
  0xdc   :  { %v490_v13 = vpop.f32.mrf.mxu0  ;;  %3421 = vmatmul.mubr.bf16.vlgmr.msra.gmra.mxu1 %v1097_v6  ;;  %v211_v12 = vpack.c.bf16 %v146_v5, %v145_v4 }
  0xdd   :  { %v491_v14 = vadd.f32 %v4534_v50, %v490_v13  ;;  %v977_v15 = vmax.f32 %v499_v10, 0.0 }
  0xde   :  { %v3286_v16 = vpop.f32.mrf.mxu0  ;;  %3381 = vmatmul.mubr.msk.bf16.gmra.mxu0 %vm228_vm0, %v204_v8 }
  0xdf   :  { %v975_v18 = vmax.f32 %v491_v14, 0.0  ;;  %3384 = vmatprep.mubr.msk.bf16.mxu0 %vm228_vm0, %v205_v11  ;;  %v1099_v26 = vpack.c.bf16 %v977_v15, %v976_v21  ;;  %v512_v32 = vadd.f32 %v3286_v16, %v4534_v50  ;;  %v459_v15 = vadd.f32 %v4534_v50, %v4515_v43  ;;  %v148_v43 = vld [vmem:[%s6621_s0 + $0x3f8] sm:$0xff] }
  0xe0   :  { %v503_v22 = vpop.f32.mrf.mxu0 }
  0xe1   :  { %v1098_v25 = vpack.c.bf16 %v975_v18, %v974_v17  ;;  %v504_v29 = vadd.f32 %v4534_v50, %v503_v22  ;;  %v980_v45 = vmax.f32 %v512_v32, 0.0  ;;  %v147_v22 = vld [vmem:[%s6621_s0 + $0x3f0] sm:$0xff]  ;;  %v467_v32 = vadd.f32 %v4513_v40, %v4534_v50 }
  0xe2   :  { %v3287_v27 = vpop.f32.mrf.mxu0 }
  0xe3   :  { %v515_v30 = vadd.f32 %v3287_v27, %v4534_v50  ;;  %3424 = vmatprep.mubr.bf16.mxu1 %v1098_v25  ;;  %v978_v39 = vmax.f32 %v504_v29, 0.0  ;;  %v967_v25 = vmax.f32 %v459_v15, 0.0  ;;  %v212_v29 = vpack.c.bf16 %v148_v43, %v147_v22 }
  0xe4   :  { %v506_v33 = vpop.f32.mrf.mxu0  ;;  %3425 = vmatmul.mubr.bf16.gmra.mxu1 %v1099_v26 }
  0xe5   :  { %v507_v35 = vadd.f32 %v4534_v50, %v506_v33  ;;  %v981_v36 = vmax.f32 %v515_v30, 0.0 }
  0xe6   :  { %v3290_v38 = vpop.f32.mrf.mxu0  ;;  %3385 = vmatmul.mubr.msk.bf16.gmra.mxu0 %vm228_vm0, %v206_v28 }
  0xe7   :  { %v979_v41 = vmax.f32 %v507_v35, 0.0  ;;  %3388 = vmatprep.mubr.msk.bf16.mxu0 %vm228_vm0, %v207_v31  ;;  %v1101_v51 = vpack.c.bf16 %v981_v36, %v980_v45  ;;  %v528_v57 = vadd.f32 %v3290_v38, %v4534_v50  ;;  %v1094_v38 = vpack.c.bf16 %v967_v25, %v966_v37 }
  0xe8   :  { %v519_v46 = vpop.f32.mrf.mxu0 }
  0xe9   :  { %v1100_v49 = vpack.c.bf16 %v979_v41, %v978_v39  ;;  %v520_v54 = vadd.f32 %v4534_v50, %v519_v46  ;;  %v984_v2 = vmax.f32 %v528_v57, 0.0  ;;  %v464_v39 = vadd.f32 %v4495_v34, %v4534_v50 }
  0xea   :  { %v3291_v52 = vpop.f32.mrf.mxu0  ;;  %v969_v46 = vmax.f32 %v467_v32, 0.0 }
  0xeb   :  { %v531_v55 = vadd.f32 %v3291_v52, %v4534_v50  ;;  %3428 = vmatprep.mubr.bf16.mxu1 %v1100_v49  ;;  %v982_v62 = vmax.f32 %v520_v54, 0.0  ;;  %v968_v49 = vmax.f32 %v464_v39, 0.0 }
  0xec   :  { %v522_v58 = vpop.f32.mrf.mxu0  ;;  %3429 = vmatmul.mubr.bf16.gmra.mxu1 %v1101_v51 }
  0xed   :  { %v523_v59 = vadd.f32 %v4534_v50, %v522_v58  ;;  %v985_v60 = vmax.f32 %v531_v55, 0.0  ;;  %v1095_v34 = vpack.c.bf16 %v969_v46, %v968_v49 }
  0xee   :  { %v3294_v61 = vpop.f32.mrf.mxu0  ;;  %3389 = vmatmul.mubr.msk.bf16.gmra.mxu0 %vm228_vm0, %v208_v53 }
  0xef   :  { %v983_v63 = vmax.f32 %v523_v59, 0.0  ;;  %3392 = vmatprep.mubr.msk.bf16.mxu0 %vm228_vm0, %v209_v56  ;;  %v1103_v7 = vpack.c.bf16 %v985_v60, %v984_v2  ;;  %v544_v13 = vadd.f32 %v3294_v61, %v4534_v50 }
  0xf0   :  { %v535_v3 = vpop.f32.mrf.mxu0 }
  0xf1   :  { %v1102_v6 = vpack.c.bf16 %v983_v63, %v982_v62  ;;  %v536_v10 = vadd.f32 %v4534_v50, %v535_v3  ;;  %v988_v23 = vmax.f32 %v544_v13, 0.0 }
  0xf2   :  { %v3295_v8 = vpop.f32.mrf.mxu0 }
  0xf3   :  { %v547_v11 = vadd.f32 %v3295_v8, %v4534_v50  ;;  %3432 = vmatprep.mubr.bf16.mxu1 %v1102_v6  ;;  %v986_v20 = vmax.f32 %v536_v10, 0.0 }
  0xf4   :  { %v538_v14 = vpop.f32.mrf.mxu0  ;;  %3433 = vmatmul.mubr.bf16.gmra.mxu1 %v1103_v7 }
  0xf5   :  { %v539_v16 = vadd.f32 %v4534_v50, %v538_v14  ;;  %v989_v17 = vmax.f32 %v547_v11, 0.0 }
  0xf6   :  { %v3298_v18 = vpop.f32.mrf.mxu0  ;;  %3393 = vmatmul.mubr.msk.bf16.gmra.mxu0 %vm228_vm0, %v210_v9 }
  0xf7   :  { %v987_v21 = vmax.f32 %v539_v16, 0.0  ;;  %3396 = vmatprep.mubr.msk.bf16.mxu0 %vm228_vm0, %v211_v12  ;;  %v1105_v27 = vpack.c.bf16 %v989_v17, %v988_v23  ;;  %v560_v33 = vadd.f32 %v3298_v18, %v4534_v50 }
  0xf8   :  { %v551_v24 = vpop.f32.mrf.mxu0 }
  0xf9   :  { %v1104_v26 = vpack.c.bf16 %v987_v21, %v986_v20  ;;  %v552_v30 = vadd.f32 %v4534_v50, %v551_v24  ;;  %v992_v47 = vmax.f32 %v560_v33, 0.0 }
  0xfa   :  { %v3299_v28 = vpop.f32.mrf.mxu0 }
  0xfb   :  { %v563_v31 = vadd.f32 %v3299_v28, %v4534_v50  ;;  %3436 = vmatprep.mubr.bf16.mxu1 %v1104_v26  ;;  %v990_v44 = vmax.f32 %v552_v30, 0.0 }
  0xfc   :  { %v554_v35 = vpop.f32.mrf.mxu0  ;;  %3437 = vmatmul.mubr.bf16.gmra.mxu1 %v1105_v27 }
  0xfd   :  { %v555_v36 = vadd.f32 %v4534_v50, %v554_v35  ;;  %v993_v41 = vmax.f32 %v563_v31, 0.0 }
  0xfe   :  { %v3302_v42 = vpop.f32.mrf.mxu0  ;;  %3397 = vmatmul.mubr.msk.bf16.gmra.mxu0 %vm228_vm0, %v212_v29 }
  0xff   :  { %v991_v45 = vmax.f32 %v555_v36, 0.0  ;;  %3416 = vmatprep.mubr.bf16.mxu0 %v1094_v38  ;;  %v1107_v51 = vpack.c.bf16 %v993_v41, %v992_v47  ;;  %v576_v55 = vadd.f32 %v3302_v42, %v4534_v50 }
 0x100   :  { %v567_v40 = vpop.f32.mrf.mxu0 }
 0x101   :  { %v1106_v48 = vpack.c.bf16 %v991_v45, %v990_v44  ;;  %v568_v53 = vadd.f32 %v4534_v50, %v567_v40  ;;  %v996_v62 = vmax.f32 %v576_v55, 0.0 }
 0x102   :  { %v3303_v52 = vpop.f32.mrf.mxu0 }
 0x103   :  { %v579_v54 = vadd.f32 %v3303_v52, %v4534_v50  ;;  %3440 = vmatprep.mubr.bf16.mxu1 %v1106_v48  ;;  %v994_v60 = vmax.f32 %v568_v53, 0.0 }
 0x104   :  { %v570_v56 = vpop.f32.mrf.mxu0  ;;  %3441 = vmatmul.mubr.bf16.gmra.mxu1 %v1107_v51 }
 0x105   :  { %v571_v57 = vadd.f32 %v4534_v50, %v570_v56  ;;  %v997_v58 = vmax.f32 %v579_v54, 0.0 }
 0x106   :  { %v3306_v59 = vpop.f32.mrf.mxu0  ;;  %3417 = vmatmul.mubr.bf16.vlgmr.msra.gmra.mxu0 %v1095_v34 }
 0x107   :  { %v995_v61 = vmax.f32 %v571_v57, 0.0  ;;  %v1109_v1 = vpack.c.bf16 %v997_v58, %v996_v62  ;;  %v592_v5 = vadd.f32 %v3306_v59, %v4534_v50 }
 0x108   :  { %v583_v63 = vpop.f32.mrf.mxu0 }
 0x109   :  { %v1108_v0 = vpack.c.bf16 %v995_v61, %v994_v60  ;;  %v584_v3 = vadd.f32 %v4534_v50, %v583_v63  ;;  %v1000_v12 = vmax.f32 %v592_v5, 0.0 }
 0x10a   :  { %v3307_v2 = vpop.f32.mrf.mxu0 }
 0x10b   :  { %v595_v4 = vadd.f32 %v3307_v2, %v4534_v50  ;;  %3444 = vmatprep.mubr.bf16.mxu1 %v1108_v0  ;;  %v998_v10 = vmax.f32 %v584_v3, 0.0 }
 0x10c   :  { %v586_v6 = vpop.f32.mrf.mxu0  ;;  %3445 = vmatmul.mubr.bf16.gmra.mxu1 %v1109_v1 }
 0x10d   :  { %v587_v7 = vadd.f32 %v4534_v50, %v586_v6  ;;  %v1001_v8 = vmax.f32 %v595_v4, 0.0 }
 0x10e   :  { %v3310_v9 = vpop.f32.mrf.mxu0 }
 0x10f   :  { %v999_v11 = vmax.f32 %v587_v7, 0.0  ;;  %v1111_v15 = vpack.c.bf16 %v1001_v8, %v1000_v12  ;;  %v608_v19 = vadd.f32 %v3310_v9, %v4534_v50 }
 0x110   :  { %v599_v13 = vpop.f32.mrf.mxu0 }
 0x111   :  { %v1110_v14 = vpack.c.bf16 %v999_v11, %v998_v10  ;;  %v600_v17 = vadd.f32 %v4534_v50, %v599_v13  ;;  %v1004_v25 = vmax.f32 %v608_v19, 0.0 }
 0x112   :  { %v3311_v16 = vpop.f32.mrf.mxu0 }
 0x113   :  { %v611_v18 = vadd.f32 %v3311_v16, %v4534_v50  ;;  %3448 = vmatprep.mubr.bf16.mxu1 %v1110_v14  ;;  %v1002_v23 = vmax.f32 %v600_v17, 0.0 }
 0x114   :  { %v602_v20 = vpop.f32.mrf.mxu0  ;;  %3449 = vmatmul.mubr.bf16.gmra.mxu1 %v1111_v15 }
 0x115   :  { %v603_v21 = vadd.f32 %v4534_v50, %v602_v20  ;;  %v1005_v22 = vmax.f32 %v611_v18, 0.0 }
 0x116   :  { %v3314_v43 = vpop.f32.mrf.mxu0 }
 0x117   :  { %v1003_v24 = vmax.f32 %v603_v21, 0.0  ;;  %v1113_v28 = vpack.c.bf16 %v1005_v22, %v1004_v25  ;;  %v624_v31 = vadd.f32 %v3314_v43, %v4534_v50 }
 0x118   :  { %v615_v26 = vpop.f32.mrf.mxu0 }
 0x119   :  { %v1112_v27 = vpack.c.bf16 %v1003_v24, %v1002_v23  ;;  %v616_v37 = vadd.f32 %v4534_v50, %v615_v26  ;;  %v1008_v41 = vmax.f32 %v624_v31, 0.0 }
 0x11a   :  { %v3315_v29 = vpop.f32.mrf.mxu0 }
 0x11b   :  { %v627_v30 = vadd.f32 %v3315_v29, %v4534_v50  ;;  %3452 = vmatprep.mubr.bf16.mxu1 %v1112_v27  ;;  %v1006_v38 = vmax.f32 %v616_v37, 0.0 }
 0x11c   :  { %v618_v32 = vpop.f32.mrf.mxu0  ;;  %3453 = vmatmul.mubr.bf16.gmra.mxu1 %v1113_v28 }
 0x11d   :  { %v619_v33 = vadd.f32 %v4534_v50, %v618_v32  ;;  %v1009_v35 = vmax.f32 %v627_v30, 0.0 }
 0x11e   :  { %v3318_v36 = vpop.f32.mrf.mxu0 }
 0x11f   :  { %v1007_v39 = vmax.f32 %v619_v33, 0.0  ;;  %v1115_v45 = vpack.c.bf16 %v1009_v35, %v1008_v41  ;;  %v640_v48 = vadd.f32 %v3318_v36, %v4534_v50 }
 0x120   :  { %v631_v42 = vpop.f32.mrf.mxu0 }
 0x121   :  { %v1114_v44 = vpack.c.bf16 %v1007_v39, %v1006_v38  ;;  %v632_v47 = vadd.f32 %v4534_v50, %v631_v42  ;;  %v1012_v55 = vmax.f32 %v640_v48, 0.0 }
 0x122   :  { %v3319_v46 = vpop.f32.mrf.mxu0 }
 0x123   :  { %v643_v40 = vadd.f32 %v3319_v46, %v4534_v50  ;;  %3456 = vmatprep.mubr.bf16.mxu1 %v1114_v44  ;;  %v1010_v54 = vmax.f32 %v632_v47, 0.0 }
 0x124   :  { %v634_v49 = vpop.f32.mrf.mxu0  ;;  %3457 = vmatmul.mubr.bf16.gmra.mxu1 %v1115_v45 }
 0x125   :  { %v635_v51 = vadd.f32 %v4534_v50, %v634_v49  ;;  %v1013_v52 = vmax.f32 %v643_v40, 0.0 }
 0x126   :  { %v3322_v53 = vpop.f32.mrf.mxu0 }
 0x127   :  { %v1011_v34 = vmax.f32 %v635_v51, 0.0  ;;  %v1117_v58 = vpack.c.bf16 %v1013_v52, %v1012_v55  ;;  %v656_v62 = vadd.f32 %v3322_v53, %v4534_v50 }
 0x128   :  { %v647_v56 = vpop.f32.mrf.mxu0 }
 0x129   :  { %v1116_v57 = vpack.c.bf16 %v1011_v34, %v1010_v54  ;;  %v648_v60 = vadd.f32 %v4534_v50, %v647_v56  ;;  %v1016_v5 = vmax.f32 %v656_v62, 0.0 }
 0x12a   :  { %v3323_v59 = vpop.f32.mrf.mxu0 }
 0x12b   :  { %v659_v61 = vadd.f32 %v3323_v59, %v4534_v50  ;;  %3460 = vmatprep.mubr.bf16.mxu1 %v1116_v57  ;;  %v1014_v3 = vmax.f32 %v648_v60, 0.0 }
 0x12c   :  { %v650_v63 = vpop.f32.mrf.mxu0  ;;  %3461 = vmatmul.mubr.bf16.gmra.mxu1 %v1117_v58 }
 0x12d   :  { %v651_v0 = vadd.f32 %v4534_v50, %v650_v63  ;;  %v1017_v1 = vmax.f32 %v659_v61, 0.0 }
 0x12e   :  { %v3326_v2 = vpop.f32.mrf.mxu0 }
 0x12f   :  { %v1015_v4 = vmax.f32 %v651_v0, 0.0  ;;  %v1119_v8 = vpack.c.bf16 %v1017_v1, %v1016_v5  ;;  %v672_v12 = vadd.f32 %v3326_v2, %v4534_v50 }
 0x130   :  { %v663_v6 = vpop.f32.mrf.mxu0 }
 0x131   :  { %v1118_v7 = vpack.c.bf16 %v1015_v4, %v1014_v3  ;;  %v664_v10 = vadd.f32 %v4534_v50, %v663_v6  ;;  %v1020_v19 = vmax.f32 %v672_v12, 0.0 }
 0x132   :  { %v3327_v9 = vpop.f32.mrf.mxu0 }
 0x133   :  { %v675_v11 = vadd.f32 %v3327_v9, %v4534_v50  ;;  %3464 = vmatprep.mubr.bf16.mxu1 %v1118_v7  ;;  %v1018_v17 = vmax.f32 %v664_v10, 0.0 }
 0x134   :  { %v666_v13 = vpop.f32.mrf.mxu0  ;;  %3465 = vmatmul.mubr.bf16.gmra.mxu1 %v1119_v8 }
 0x135   :  { %v667_v14 = vadd.f32 %v4534_v50, %v666_v13  ;;  %v1021_v15 = vmax.f32 %v675_v11, 0.0 }
 0x136   :  { %v3330_v16 = vpop.f32.mrf.mxu0 }
 0x137   :  { %v1019_v18 = vmax.f32 %v667_v14, 0.0  ;;  %v1121_v22 = vpack.c.bf16 %v1021_v15, %v1020_v19  ;;  %v688_v25 = vadd.f32 %v3330_v16, %v4534_v50 }
 0x138   :  { %v679_v20 = vpop.f32.mrf.mxu0 }
 0x139   :  { %v1120_v21 = vpack.c.bf16 %v1019_v18, %v1018_v17  ;;  %v680_v23 = vadd.f32 %v4534_v50, %v679_v20  ;;  %v1024_v31 = vmax.f32 %v688_v25, 0.0 }
 0x13a   :  { %v3331_v43 = vpop.f32.mrf.mxu0 }
 0x13b   :  { %v691_v24 = vadd.f32 %v3331_v43, %v4534_v50  ;;  %3468 = vmatprep.mubr.bf16.mxu1 %v1120_v21  ;;  %v1022_v37 = vmax.f32 %v680_v23, 0.0 }
 0x13c   :  { %v682_v26 = vpop.f32.mrf.mxu0  ;;  %3469 = vmatmul.mubr.bf16.gmra.mxu1 %v1121_v22 }
 0x13d   :  { %v683_v27 = vadd.f32 %v4534_v50, %v682_v26  ;;  %v1025_v28 = vmax.f32 %v691_v24, 0.0 }
 0x13e   :  { %v3334_v29 = vpop.f32.mrf.mxu0 }
 0x13f   :  { %v1023_v30 = vmax.f32 %v683_v27, 0.0  ;;  %v1123_v35 = vpack.c.bf16 %v1025_v28, %v1024_v31  ;;  %v704_v41 = vadd.f32 %v3334_v29, %v4534_v50 }
 0x140   :  { %v695_v32 = vpop.f32.mrf.mxu0 }
 0x141   :  { %v1122_v33 = vpack.c.bf16 %v1023_v30, %v1022_v37  ;;  %v696_v38 = vadd.f32 %v4534_v50, %v695_v32  ;;  %v1028_v48 = vmax.f32 %v704_v41, 0.0 }
 0x142   :  { %v3335_v36 = vpop.f32.mrf.mxu0 }
 0x143   :  { %v707_v39 = vadd.f32 %v3335_v36, %v4534_v50  ;;  %3472 = vmatprep.mubr.bf16.mxu1 %v1122_v33  ;;  %v1026_v47 = vmax.f32 %v696_v38, 0.0 }
 0x144   :  { %v698_v42 = vpop.f32.mrf.mxu0  ;;  %3473 = vmatmul.mubr.bf16.gmra.mxu1 %v1123_v35 }
 0x145   :  { %v699_v44 = vadd.f32 %v4534_v50, %v698_v42  ;;  %v1029_v45 = vmax.f32 %v707_v39, 0.0 }
 0x146   :  { %v3338_v46 = vpop.f32.mrf.mxu0 }
 0x147   :  { %v1027_v40 = vmax.f32 %v699_v44, 0.0  ;;  %v1125_v52 = vpack.c.bf16 %v1029_v45, %v1028_v48  ;;  %v720_v55 = vadd.f32 %v3338_v46, %v4534_v50 }
 0x148   :  { %v711_v49 = vpop.f32.mrf.mxu0 }
 0x149   :  { %v1124_v51 = vpack.c.bf16 %v1027_v40, %v1026_v47  ;;  %v712_v54 = vadd.f32 %v4534_v50, %v711_v49  ;;  %v1032_v62 = vmax.f32 %v720_v55, 0.0 }
 0x14a   :  { %v3339_v53 = vpop.f32.mrf.mxu0 }
 0x14b   :  { %v723_v34 = vadd.f32 %v3339_v53, %v4534_v50  ;;  %3476 = vmatprep.mubr.bf16.mxu1 %v1124_v51  ;;  %v1030_v60 = vmax.f32 %v712_v54, 0.0 }
 0x14c   :  { %v714_v56 = vpop.f32.mrf.mxu0  ;;  %3477 = vmatmul.mubr.bf16.gmra.mxu1 %v1125_v52 }
 0x14d   :  { %v715_v57 = vadd.f32 %v4534_v50, %v714_v56  ;;  %v1033_v58 = vmax.f32 %v723_v34, 0.0 }
 0x14e   :  { %v3342_v59 = vpop.f32.mrf.mxu0 }
 0x14f   :  { %v1031_v61 = vmax.f32 %v715_v57, 0.0  ;;  %v1127_v1 = vpack.c.bf16 %v1033_v58, %v1032_v62  ;;  %v736_v5 = vadd.f32 %v3342_v59, %v4534_v50 }
 0x150   :  { %v727_v63 = vpop.f32.mrf.mxu0 }
 0x151   :  { %v1126_v0 = vpack.c.bf16 %v1031_v61, %v1030_v60  ;;  %v728_v3 = vadd.f32 %v4534_v50, %v727_v63  ;;  %v1036_v12 = vmax.f32 %v736_v5, 0.0 }
 0x152   :  { %v3343_v2 = vpop.f32.mrf.mxu0 }
 0x153   :  { %v739_v4 = vadd.f32 %v3343_v2, %v4534_v50  ;;  %3480 = vmatprep.mubr.bf16.mxu1 %v1126_v0  ;;  %v1034_v10 = vmax.f32 %v728_v3, 0.0 }
 0x154   :  { %v730_v6 = vpop.f32.mrf.mxu0  ;;  %3481 = vmatmul.mubr.bf16.gmra.mxu1 %v1127_v1 }
 0x155   :  { %v731_v7 = vadd.f32 %v4534_v50, %v730_v6  ;;  %v1037_v8 = vmax.f32 %v739_v4, 0.0 }
 0x156   :  { %v3346_v9 = vpop.f32.mrf.mxu0 }
 0x157   :  { %v1035_v11 = vmax.f32 %v731_v7, 0.0  ;;  %v1129_v15 = vpack.c.bf16 %v1037_v8, %v1036_v12  ;;  %v752_v19 = vadd.f32 %v3346_v9, %v4534_v50 }
 0x158   :  { %v743_v13 = vpop.f32.mrf.mxu0 }
 0x159   :  { %v1128_v14 = vpack.c.bf16 %v1035_v11, %v1034_v10  ;;  %v744_v17 = vadd.f32 %v4534_v50, %v743_v13  ;;  %v1040_v25 = vmax.f32 %v752_v19, 0.0 }
 0x15a   :  { %v3347_v16 = vpop.f32.mrf.mxu0 }
 0x15b   :  { %v755_v18 = vadd.f32 %v3347_v16, %v4534_v50  ;;  %3484 = vmatprep.mubr.bf16.mxu1 %v1128_v14  ;;  %v1038_v23 = vmax.f32 %v744_v17, 0.0 }
 0x15c   :  { %v746_v20 = vpop.f32.mrf.mxu0  ;;  %3485 = vmatmul.mubr.bf16.gmra.mxu1 %v1129_v15 }
 0x15d   :  { %v747_v21 = vadd.f32 %v4534_v50, %v746_v20  ;;  %v1041_v22 = vmax.f32 %v755_v18, 0.0 }
 0x15e   :  { %v3350_v43 = vpop.f32.mrf.mxu0 }
 0x15f   :  { %v1039_v24 = vmax.f32 %v747_v21, 0.0  ;;  %v1131_v28 = vpack.c.bf16 %v1041_v22, %v1040_v25  ;;  %v768_v31 = vadd.f32 %v3350_v43, %v4534_v50 }
 0x160   :  { %v759_v26 = vpop.f32.mrf.mxu0 }
 0x161   :  { %v1130_v27 = vpack.c.bf16 %v1039_v24, %v1038_v23  ;;  %v760_v37 = vadd.f32 %v4534_v50, %v759_v26  ;;  %v1044_v41 = vmax.f32 %v768_v31, 0.0 }
 0x162   :  { %v3351_v29 = vpop.f32.mrf.mxu0 }
 0x163   :  { %v771_v30 = vadd.f32 %v3351_v29, %v4534_v50  ;;  %3488 = vmatprep.mubr.bf16.mxu1 %v1130_v27  ;;  %v1042_v38 = vmax.f32 %v760_v37, 0.0 }
 0x164   :  { %v762_v32 = vpop.f32.mrf.mxu0  ;;  %3489 = vmatmul.mubr.bf16.gmra.mxu1 %v1131_v28 }
 0x165   :  { %v763_v33 = vadd.f32 %v4534_v50, %v762_v32  ;;  %v1045_v35 = vmax.f32 %v771_v30, 0.0 }
 0x166   :  { %v3354_v36 = vpop.f32.mrf.mxu0 }
 0x167   :  { %v1043_v39 = vmax.f32 %v763_v33, 0.0  ;;  %v1133_v45 = vpack.c.bf16 %v1045_v35, %v1044_v41  ;;  %v784_v48 = vadd.f32 %v3354_v36, %v4534_v50 }
 0x168   :  { %v775_v42 = vpop.f32.mrf.mxu0 }
 0x169   :  { %v1132_v44 = vpack.c.bf16 %v1043_v39, %v1042_v38  ;;  %v776_v47 = vadd.f32 %v4534_v50, %v775_v42  ;;  %v1048_v55 = vmax.f32 %v784_v48, 0.0 }
 0x16a   :  { %v3355_v46 = vpop.f32.mrf.mxu0 }
 0x16b   :  { %v787_v40 = vadd.f32 %v3355_v46, %v4534_v50  ;;  %3492 = vmatprep.mubr.bf16.mxu1 %v1132_v44  ;;  %v1046_v54 = vmax.f32 %v776_v47, 0.0 }
 0x16c   :  { %v778_v49 = vpop.f32.mrf.mxu0  ;;  %3493 = vmatmul.mubr.bf16.gmra.mxu1 %v1133_v45 }
 0x16d   :  { %v779_v51 = vadd.f32 %v4534_v50, %v778_v49  ;;  %v1049_v52 = vmax.f32 %v787_v40, 0.0 }
 0x16e   :  { %v3358_v53 = vpop.f32.mrf.mxu0 }
 0x16f   :  { %v1047_v34 = vmax.f32 %v779_v51, 0.0  ;;  %v1135_v58 = vpack.c.bf16 %v1049_v52, %v1048_v55  ;;  %v800_v62 = vadd.f32 %v3358_v53, %v4534_v50 }
 0x170   :  { %v791_v56 = vpop.f32.mrf.mxu0 }
 0x171   :  { %v1134_v57 = vpack.c.bf16 %v1047_v34, %v1046_v54  ;;  %v792_v60 = vadd.f32 %v4534_v50, %v791_v56  ;;  %v1052_v5 = vmax.f32 %v800_v62, 0.0 }
 0x172   :  { %v3359_v59 = vpop.f32.mrf.mxu0 }
 0x173   :  { %v803_v61 = vadd.f32 %v3359_v59, %v4534_v50  ;;  %3496 = vmatprep.mubr.bf16.mxu1 %v1134_v57  ;;  %v1050_v3 = vmax.f32 %v792_v60, 0.0 }
 0x174   :  { %v794_v63 = vpop.f32.mrf.mxu0  ;;  %3497 = vmatmul.mubr.bf16.gmra.mxu1 %v1135_v58 }
 0x175   :  { %v795_v0 = vadd.f32 %v4534_v50, %v794_v63  ;;  %v1053_v1 = vmax.f32 %v803_v61, 0.0 }
 0x176   :  { %v3362_v2 = vpop.f32.mrf.mxu0 }
 0x177   :  { %v1051_v4 = vmax.f32 %v795_v0, 0.0  ;;  %v1137_v8 = vpack.c.bf16 %v1053_v1, %v1052_v5  ;;  %v816_v12 = vadd.f32 %v3362_v2, %v4534_v50 }
 0x178   :  { %v807_v6 = vpop.f32.mrf.mxu0 }
 0x179   :  { %v1136_v7 = vpack.c.bf16 %v1051_v4, %v1050_v3  ;;  %v808_v10 = vadd.f32 %v4534_v50, %v807_v6  ;;  %v1056_v19 = vmax.f32 %v816_v12, 0.0  ;;  %v4712_v3 = vld [vmem:[%s6624_s4] ss:$0 sm:$0xff] }
 0x17a   :  { %v3363_v9 = vpop.f32.mrf.mxu0 }
 0x17b   :  { %v819_v11 = vadd.f32 %v3363_v9, %v4534_v50  ;;  %3500 = vmatprep.mubr.bf16.mxu1 %v1136_v7  ;;  %v1054_v17 = vmax.f32 %v808_v10, 0.0 }
 0x17c   :  { %v810_v13 = vpop.f32.mrf.mxu0  ;;  %3501 = vmatmul.mubr.bf16.gmra.mxu1 %v1137_v8 }
 0x17d   :  { %v811_v14 = vadd.f32 %v4534_v50, %v810_v13  ;;  %v1057_v15 = vmax.f32 %v819_v11, 0.0 }
 0x17e   :  { %v3366_v16 = vpop.f32.mrf.mxu0 }
 0x17f   :  { %v1055_v18 = vmax.f32 %v811_v14, 0.0  ;;  %v1139_v22 = vpack.c.bf16 %v1057_v15, %v1056_v19  ;;  %v832_v25 = vadd.f32 %v3366_v16, %v4534_v50 }
 0x180   :  { %v823_v20 = vpop.f32.mrf.mxu0 }
 0x181   :  { %v1138_v21 = vpack.c.bf16 %v1055_v18, %v1054_v17  ;;  %v824_v23 = vadd.f32 %v4534_v50, %v823_v20  ;;  %v1060_v31 = vmax.f32 %v832_v25, 0.0 }
 0x182   :  { %v3367_v43 = vpop.f32.mrf.mxu0 }
 0x183   :  { %v835_v24 = vadd.f32 %v3367_v43, %v4534_v50  ;;  %3504 = vmatprep.mubr.bf16.mxu1 %v1138_v21  ;;  %v1058_v37 = vmax.f32 %v824_v23, 0.0 }
 0x184   :  { %v826_v26 = vpop.f32.mrf.mxu0  ;;  %3505 = vmatmul.mubr.bf16.gmra.mxu1 %v1139_v22 }
 0x185   :  { %v827_v27 = vadd.f32 %v4534_v50, %v826_v26  ;;  %v1061_v28 = vmax.f32 %v835_v24, 0.0 }
 0x186   :  { %v3370_v29 = vpop.f32.mrf.mxu0 }
 0x187   :  { %v1059_v30 = vmax.f32 %v827_v27, 0.0  ;;  %v1141_v35 = vpack.c.bf16 %v1061_v28, %v1060_v31  ;;  %v848_v41 = vadd.f32 %v3370_v29, %v4534_v50 }
 0x188   :  { %v839_v32 = vpop.f32.mrf.mxu0 }
 0x189   :  { %v1140_v33 = vpack.c.bf16 %v1059_v30, %v1058_v37  ;;  %v840_v38 = vadd.f32 %v4534_v50, %v839_v32  ;;  %v1064_v48 = vmax.f32 %v848_v41, 0.0 }
 0x18a   :  { %v3371_v36 = vpop.f32.mrf.mxu0 }
 0x18b   :  { %v851_v39 = vadd.f32 %v3371_v36, %v4534_v50  ;;  %3508 = vmatprep.mubr.bf16.mxu1 %v1140_v33  ;;  %v1062_v47 = vmax.f32 %v840_v38, 0.0 }
 0x18c   :  { %v842_v42 = vpop.f32.mrf.mxu0  ;;  %3509 = vmatmul.mubr.bf16.gmra.mxu1 %v1141_v35 }
 0x18d   :  { %v843_v44 = vadd.f32 %v4534_v50, %v842_v42  ;;  %v1065_v45 = vmax.f32 %v851_v39, 0.0 }
 0x18e   :  { %v3374_v46 = vpop.f32.mrf.mxu0 }
 0x18f   :  { %v1063_v40 = vmax.f32 %v843_v44, 0.0  ;;  %v1143_v52 = vpack.c.bf16 %v1065_v45, %v1064_v48  ;;  %v864_v55 = vadd.f32 %v3374_v46, %v4534_v50 }
 0x190   :  { %v855_v49 = vpop.f32.mrf.mxu0 }
 0x191   :  { %v1142_v51 = vpack.c.bf16 %v1063_v40, %v1062_v47  ;;  %v856_v54 = vadd.f32 %v4534_v50, %v855_v49  ;;  %v1068_v62 = vmax.f32 %v864_v55, 0.0 }
 0x192   :  { %v3375_v53 = vpop.f32.mrf.mxu0 }
 0x193   :  { %v867_v34 = vadd.f32 %v3375_v53, %v4534_v50  ;;  %3512 = vmatprep.mubr.bf16.mxu1 %v1142_v51  ;;  %v1066_v60 = vmax.f32 %v856_v54, 0.0  ;;  %v4756_v54 = vld [vmem:[%s6623_s2] ss:$0 sm:$0xff] }
 0x194   :  { %v858_v56 = vpop.f32.mrf.mxu0  ;;  %3513 = vmatmul.mubr.bf16.gmra.mxu1 %v1143_v52 }
 0x195   :  { %v859_v57 = vadd.f32 %v4534_v50, %v858_v56  ;;  %v1069_v58 = vmax.f32 %v867_v34, 0.0 }
 0x196   :  { %v3378_v59 = vpop.f32.mrf.mxu0 }
 0x197   :  { %v1067_v61 = vmax.f32 %v859_v57, 0.0  ;;  %v1145_v1 = vpack.c.bf16 %v1069_v58, %v1068_v62  ;;  %v880_v6 = vadd.f32 %v3378_v59, %v4534_v50 }
 0x198   :  { %v871_v63 = vpop.f32.mrf.mxu0 }
 0x199   :  { %v1144_v0 = vpack.c.bf16 %v1067_v61, %v1066_v60  ;;  %v872_v4 = vadd.f32 %v4534_v50, %v871_v63  ;;  %v1072_v16 = vmax.f32 %v880_v6, 0.0 }
 0x19a   :  { %v3379_v2 = vpop.f32.mrf.mxu0 }
 0x19b   :  { %v883_v5 = vadd.f32 %v3379_v2, %v4534_v50  ;;  %3516 = vmatprep.mubr.bf16.mxu1 %v1144_v0  ;;  %v1070_v14 = vmax.f32 %v872_v4, 0.0 }
 0x19c   :  { %v874_v7 = vpop.f32.mrf.mxu0  ;;  %v3422_v8 = vpop.f32.mrf.mxu1  ;;  %3517 = vmatmul.mubr.bf16.gmra.mxu1 %v1145_v1 }
 0x19d   :  { %v875_v9 = vadd.f32 %v4534_v50, %v874_v7  ;;  %v4719_v10 = vadd.f32 %v3422_v8, %v4712_v3  ;;  %v1073_v11 = vmax.f32 %v883_v5, 0.0 }
 0x19e   :  { %v3382_v12 = vpop.f32.mrf.mxu0  ;;  %v1279_v13 = vpop.f32.mrf.mxu1 }
 0x19f   :  { %v1071_v15 = vmax.f32 %v875_v9, 0.0  ;;  %1786 = vmax.xlane.f32.xlu0 %v4719_v10  ;;  %v1147_v21 = vpack.c.bf16 %v1073_v11, %v1072_v16  ;;  %v4726_v22 = vadd.f32 %v4712_v3, %v1279_v13  ;;  %v896_v26 = vadd.f32 %v3382_v12, %v4534_v50 }
 0x1a0   :  { %v887_v17 = vpop.f32.mrf.mxu0  ;;  %v3423_v18 = vpop.f32.mrf.mxu1 }
 0x1a1   :  { %v1146_v19 = vpack.c.bf16 %v1071_v15, %v1070_v14  ;;  %v4723_v20 = vadd.f32 %v3423_v18, %v4712_v3  ;;  %v888_v24 = vadd.f32 %v4534_v50, %v887_v17  ;;  %v1076_v38 = vmax.f32 %v896_v26, 0.0 }
 0x1a2   :  { %v3383_v43 = vpop.f32.mrf.mxu0  ;;  %v1282_v23 = vpop.f32.mrf.mxu1 }
 0x1a3   :  { %v899_v25 = vadd.f32 %v3383_v43, %v4534_v50  ;;  %3520 = vmatprep.mubr.bf16.mxu1 %v1146_v19  ;;  %1788 = vmax.xlane.f32.xlu1 %v4723_v20  ;;  %v4738_v30 = vadd.f32 %v4712_v3, %v1282_v23  ;;  %v1074_v35 = vmax.f32 %v888_v24, 0.0 }
 0x1a4   :  { %1782 = vmax.xlane.f32.xlu0 %v4726_v22  ;;  %v890_v27 = vpop.f32.mrf.mxu0  ;;  %v3426_v28 = vpop.f32.mrf.mxu1  ;;  %3521 = vmatmul.mubr.bf16.gmra.mxu1 %v1147_v21 }
 0x1a5   :  { %v891_v29 = vadd.f32 %v4534_v50, %v890_v27  ;;  %v4735_v37 = vadd.f32 %v3426_v28, %v4712_v3  ;;  %v1077_v31 = vmax.f32 %v899_v25, 0.0 }
 0x1a6   :  { %v3386_v32 = vpop.f32.mrf.mxu0  ;;  %v1295_v33 = vpop.f32.mrf.mxu1 }
 0x1a7   :  { %v1075_v36 = vmax.f32 %v891_v29, 0.0  ;;  %1784 = vmax.xlane.f32.xlu1 %v4738_v30  ;;  %v1149_v45 = vpack.c.bf16 %v1077_v31, %v1076_v38  ;;  %v4746_v46 = vadd.f32 %v4712_v3, %v1295_v33  ;;  %v912_v51 = vadd.f32 %v3386_v32, %v4534_v50 }
 0x1a8   :  { %1794 = vmax.xlane.f32.xlu0 %v4735_v37  ;;  %v903_v39 = vpop.f32.mrf.mxu0  ;;  %v3427_v41 = vpop.f32.mrf.mxu1 }
 0x1a9   :  { %v1148_v42 = vpack.c.bf16 %v1075_v36, %v1074_v35  ;;  %v4743_v44 = vadd.f32 %v3427_v41, %v4712_v3  ;;  %v904_v48 = vadd.f32 %v4534_v50, %v903_v39  ;;  %v1080_v61 = vmax.f32 %v912_v51, 0.0 }
 0x1aa   :  { %v3387_v47 = vpop.f32.mrf.mxu0  ;;  %v1298_v40 = vpop.f32.mrf.mxu1 }
 0x1ab   :  { %v915_v49 = vadd.f32 %v3387_v47, %v4534_v50  ;;  %3524 = vmatprep.mubr.bf16.mxu1 %v1148_v42  ;;  %1796 = vmax.xlane.f32.xlu1 %v4743_v44  ;;  %v4763_v56 = vadd.f32 %v4712_v3, %v1298_v40  ;;  %v1078_v59 = vmax.f32 %v904_v48, 0.0 }
 0x1ac   :  { %1790 = vmax.xlane.f32.xlu0 %v4746_v46  ;;  %v906_v52 = vpop.f32.mrf.mxu0  ;;  %v3430_v53 = vpop.f32.mrf.mxu1  ;;  %3525 = vmatmul.mubr.bf16.gmra.mxu1 %v1149_v45 }
 0x1ad   :  { %v907_v34 = vadd.f32 %v4756_v54, %v906_v52  ;;  %v4760_v55 = vadd.f32 %v3430_v53, %v4712_v3  ;;  %v1081_v57 = vmax.f32 %v915_v49, 0.0 }
 0x1ae   :  { %v3390_v50 = vpop.f32.mrf.mxu0  ;;  %v1311_v58 = vpop.f32.mrf.mxu1 }
 0x1af   :  { %v1079_v60 = vmax.f32 %v907_v34, 0.0  ;;  %1792 = vmax.xlane.f32.xlu1 %v4763_v56  ;;  %v1151_v2 = vpack.c.bf16 %v1081_v57, %v1080_v61  ;;  %v4771_v4 = vadd.f32 %v4712_v3, %v1311_v58  ;;  %v928_v9 = vadd.f32 %v4756_v54, %v3390_v50 }
 0x1b0   :  { %1802 = vmax.xlane.f32.xlu0 %v4760_v55  ;;  %v919_v62 = vpop.f32.mrf.mxu0  ;;  %v3431_v63 = vpop.f32.mrf.mxu1 }
 0x1b1   :  { %v1150_v0 = vpack.c.bf16 %v1079_v60, %v1078_v59  ;;  %v4768_v1 = vadd.f32 %v3431_v63, %v4712_v3  ;;  %v920_v7 = vadd.f32 %v4756_v54, %v919_v62  ;;  %v1084_v43 = vmax.f32 %v928_v9, 0.0 }
 0x1b2   :  { %v3391_v5 = vpop.f32.mrf.mxu0  ;;  %v1314_v6 = vpop.f32.mrf.mxu1 }
 0x1b3   :  { %v931_v8 = vadd.f32 %v4756_v54, %v3391_v5  ;;  %3528 = vmatprep.mubr.bf16.mxu1 %v1150_v0  ;;  %1804 = vmax.xlane.f32.xlu1 %v4768_v1  ;;  %v4783_v15 = vadd.f32 %v4712_v3, %v1314_v6  ;;  %v1082_v19 = vmax.f32 %v920_v7, 0.0 }
 0x1b4   :  { %1798 = vmax.xlane.f32.xlu0 %v4771_v4  ;;  %v922_v11 = vpop.f32.mrf.mxu0  ;;  %v3434_v12 = vpop.f32.mrf.mxu1  ;;  %3529 = vmatmul.mubr.bf16.gmra.mxu1 %v1151_v2 }
 0x1b5   :  { %v923_v13 = vadd.f32 %v4756_v54, %v922_v11  ;;  %v4780_v14 = vadd.f32 %v3434_v12, %v4712_v3  ;;  %v1085_v16 = vmax.f32 %v931_v8, 0.0 }
 0x1b6   :  { %v3394_v17 = vpop.f32.mrf.mxu0  ;;  %v1327_v18 = vpop.f32.mrf.mxu1 }
 0x1b7   :  { %v1083_v21 = vmax.f32 %v923_v13, 0.0  ;;  %1800 = vmax.xlane.f32.xlu1 %v4783_v15  ;;  %v1153_v27 = vpack.c.bf16 %v1085_v16, %v1084_v43  ;;  %v4791_v28 = vadd.f32 %v4712_v3, %v1327_v18  ;;  %v944_v35 = vadd.f32 %v4756_v54, %v3394_v17 }
 0x1b8   :  { %1810 = vmax.xlane.f32.xlu0 %v4780_v14  ;;  %v935_v23 = vpop.f32.mrf.mxu0  ;;  %v3435_v24 = vpop.f32.mrf.mxu1 }
 0x1b9   :  { %v1152_v25 = vpack.c.bf16 %v1083_v21, %v1082_v19  ;;  %v4788_v26 = vadd.f32 %v3435_v24, %v4712_v3  ;;  %v936_v32 = vadd.f32 %v4756_v54, %v935_v23  ;;  %v1088_v51 = vmax.f32 %v944_v35, 0.0 }
 0x1ba   :  { %v3395_v29 = vpop.f32.mrf.mxu0  ;;  %v1330_v31 = vpop.f32.mrf.mxu1 }
 0x1bb   :  { %v947_v33 = vadd.f32 %v4756_v54, %v3395_v29  ;;  %3532 = vmatprep.mubr.bf16.mxu1 %v1152_v25  ;;  %1812 = vmax.xlane.f32.xlu1 %v4788_v26  ;;  %v4799_v39 = vadd.f32 %v4712_v3, %v1330_v31  ;;  %v1086_v48 = vmax.f32 %v936_v32, 0.0 }
 0x1bc   :  { %1806 = vmax.xlane.f32.xlu0 %v4791_v28  ;;  %v938_v36 = vpop.f32.mrf.mxu0  ;;  %v3438_v38 = vpop.f32.mrf.mxu1  ;;  %3533 = vmatmul.mubr.bf16.gmra.mxu1 %v1153_v27 }
 0x1bd   :  { %v939_v41 = vadd.f32 %v4756_v54, %v938_v36  ;;  %v4803_v42 = vadd.f32 %v3438_v38, %v4712_v3  ;;  %v1089_v45 = vmax.f32 %v947_v33, 0.0 }
 0x1be   :  { %v3398_v47 = vpop.f32.mrf.mxu0  ;;  %v1343_v40 = vpop.f32.mrf.mxu1 }
 0x1bf   :  { %v1087_v49 = vmax.f32 %v939_v41, 0.0  ;;  %1808 = vmax.xlane.f32.xlu1 %v4799_v39  ;;  %v1155_v50 = vpack.c.bf16 %v1089_v45, %v1088_v51  ;;  %v4811_v58 = vadd.f32 %v4712_v3, %v1343_v40  ;;  %v960_v63 = vadd.f32 %v4756_v54, %v3398_v47 }
 0x1c0   :  { %1818 = vmax.xlane.f32.xlu0 %v4803_v42  ;;  %v951_v52 = vpop.f32.mrf.mxu0  ;;  %v3439_v53 = vpop.f32.mrf.mxu1 }
 0x1c1   :  { %v1154_v34 = vpack.c.bf16 %v1087_v49, %v1086_v48  ;;  %v4808_v57 = vadd.f32 %v3439_v53, %v4712_v3  ;;  %v952_v61 = vadd.f32 %v4756_v54, %v951_v52  ;;  %v1092_v16 = vmax.f32 %v960_v63, 0.0 }
 0x1c2   :  { %v3399_v59 = vpop.f32.mrf.mxu0  ;;  %v1346_v60 = vpop.f32.mrf.mxu1 }
 0x1c3   :  { %v963_v62 = vadd.f32 %v4756_v54, %v3399_v59  ;;  %3536 = vmatprep.mubr.bf16.mxu1 %v1154_v34  ;;  %1820 = vmax.xlane.f32.xlu1 %v4808_v57  ;;  %v4819_v5 = vadd.f32 %v4712_v3, %v1346_v60  ;;  %v1090_v12 = vmax.f32 %v952_v61, 0.0 }
 0x1c4   :  { %1814 = vmax.xlane.f32.xlu0 %v4811_v58  ;;  %v954_v0 = vpop.f32.mrf.mxu0  ;;  %v3442_v2 = vpop.f32.mrf.mxu1  ;;  %3537 = vmatmul.mubr.bf16.gmra.mxu1 %v1155_v50 }
 0x1c5   :  { %v955_v6 = vadd.f32 %v4756_v54, %v954_v0  ;;  %v4823_v7 = vadd.f32 %v3442_v2, %v4712_v3  ;;  %v1093_v8 = vmax.f32 %v963_v62, 0.0 }
 0x1c6   :  { %v3418_v9 = vpop.f32.mrf.mxu0  ;;  %v1359_v11 = vpop.f32.mrf.mxu1 }
 0x1c7   :  { %v1091_v13 = vmax.f32 %v955_v6, 0.0  ;;  %1816 = vmax.xlane.f32.xlu1 %v4819_v5  ;;  %v4828_v21 = vadd.f32 %v3418_v9, %v4712_v3  ;;  %v1157_v54 = vpack.c.bf16 %v1093_v8, %v1092_v16  ;;  %v4831_v43 = vadd.f32 %v4712_v3, %v1359_v11 }
 0x1c8   :  { %1826 = vmax.xlane.f32.xlu0 %v4823_v7  ;;  %v1263_v17 = vpop.f32.mrf.mxu0  ;;  %v3443_v18 = vpop.f32.mrf.mxu1 }
 0x1c9   :  { %v1156_v19 = vpack.c.bf16 %v1091_v13, %v1090_v12  ;;  %v4836_v27 = vadd.f32 %v3443_v18, %v4712_v3  ;;  %v4839_v29 = vadd.f32 %v4712_v3, %v1263_v17 }
 0x1ca   :  { %v1362_v23 = vpop.f32.mrf.mxu1  ;;  %v3419_v24 = vpop.f32.mrf.mxu0 }
 0x1cb   :  { %3540 = vmatprep.mubr.bf16.mxu1 %v1156_v19  ;;  %1778 = vmax.xlane.f32.xlu1 %v4828_v21  ;;  %v4844_v35 = vadd.f32 %v3419_v24, %v4712_v3  ;;  %v4852_v45 = vadd.f32 %v4712_v3, %v1362_v23 }
 0x1cc   :  { %1822 = vmax.xlane.f32.xlu0 %v4831_v43  ;;  %v3446_v25 = vpop.f32.mrf.mxu1  ;;  %3541 = vmatmul.mubr.bf16.gmra.mxu1 %v1157_v54  ;;  %v1266_v32 = vpop.f32.mrf.mxu0 }
 0x1cd   :  { %v4847_v36 = vadd.f32 %v4712_v3, %v1266_v32  ;;  %v4855_v47 = vadd.f32 %v3446_v25, %v4712_v3 }
 0x1ce   :  { %v1375_v31 = vpop.f32.mrf.mxu1 }
 0x1cf   :  { %1828 = vmax.xlane.f32.xlu1 %v4836_v27  ;;  %v4863_v51 = vadd.f32 %v4712_v3, %v1375_v31 }
 0x1d0   :  { %1774 = vmax.xlane.f32.xlu0 %v4839_v29  ;;  %v3447_v33 = vpop.f32.mrf.mxu1 }
 0x1d1   :  { %v4860_v49 = vadd.f32 %v3447_v33, %v4712_v3 }
 0x1d2   :  { %v1378_v38 = vpop.f32.mrf.mxu1 }
 0x1d3   :  { %1780 = vmax.xlane.f32.xlu1 %v4844_v35  ;;  %v4868_v34 = vadd.f32 %v4712_v3, %v1378_v38 }
 0x1d4   :  { %1776 = vmax.xlane.f32.xlu0 %v4847_v36  ;;  %v3450_v41 = vpop.f32.mrf.mxu1 }
 0x1d5   :  { %v4871_v50 = vadd.f32 %v3450_v41, %v4712_v3 }
 0x1d6   :  { %v1391_v40 = vpop.f32.mrf.mxu1 }
 0x1d7   :  { %1824 = vmax.xlane.f32.xlu1 %v4852_v45  ;;  %v4879_v62 = vadd.f32 %v4712_v3, %v1391_v40 }
 0x1d8   :  { %1834 = vmax.xlane.f32.xlu0 %v4855_v47  ;;  %v3451_v48 = vpop.f32.mrf.mxu1 }
 0x1d9   :  { %v4876_v61 = vadd.f32 %v3451_v48, %v4712_v3 }
 0x1da   :  { %v1394_v52 = vpop.f32.mrf.mxu1 }
 0x1db   :  { %1836 = vmax.xlane.f32.xlu1 %v4860_v49  ;;  %v4884_v2 = vadd.f32 %v4712_v3, %v1394_v52 }
 0x1dc   :  { %1830 = vmax.xlane.f32.xlu0 %v4863_v51  ;;  %v3454_v53 = vpop.f32.mrf.mxu1 }
 0x1dd   :  { %v4887_v6 = vadd.f32 %v3454_v53, %v4712_v3 }
 0x1de   :  { %v1407_v59 = vpop.f32.mrf.mxu1 }
 0x1df   :  { %1832 = vmax.xlane.f32.xlu1 %v4868_v34  ;;  %v4895_v12 = vadd.f32 %v4712_v3, %v1407_v59 }
 0x1e0   :  { %1842 = vmax.xlane.f32.xlu0 %v4871_v50  ;;  %v3455_v60 = vpop.f32.mrf.mxu1 }
 0x1e1   :  { %v4892_v11 = vadd.f32 %v3455_v60, %v4712_v3 }
 0x1e2   :  { %v1410_v63 = vpop.f32.mrf.mxu1 }
 0x1e3   :  { %1844 = vmax.xlane.f32.xlu1 %v4876_v61  ;;  %v4900_v17 = vadd.f32 %v4712_v3, %v1410_v63 }
 0x1e4   :  { %1838 = vmax.xlane.f32.xlu0 %v4879_v62  ;;  %v3458_v0 = vpop.f32.mrf.mxu1 }
 0x1e5   :  { %v4903_v18 = vadd.f32 %v3458_v0, %v4712_v3 }
 0x1e6   :  { %v1423_v8 = vpop.f32.mrf.mxu1 }
 0x1e7   :  { %1840 = vmax.xlane.f32.xlu1 %v4884_v2  ;;  %v4911_v24 = vadd.f32 %v4712_v3, %v1423_v8 }
 0x1e8   :  { %1850 = vmax.xlane.f32.xlu0 %v4887_v6  ;;  %v3459_v9 = vpop.f32.mrf.mxu1 }
 0x1e9   :  { %v4908_v23 = vadd.f32 %v3459_v9, %v4712_v3  ;;  %6770 = vst [vmem:[#allocation2_spill] sm:$0xff] %v4911_v24 }
 0x1ea   :  { %v1426_v13 = vpop.f32.mrf.mxu1 }
 0x1eb   :  { %1852 = vmax.xlane.f32.xlu1 %v4892_v11  ;;  %v4916_v32 = vadd.f32 %v4712_v3, %v1426_v13 }
 0x1ec   :  { %1846 = vmax.xlane.f32.xlu0 %v4895_v12  ;;  %v3462_v16 = vpop.f32.mrf.mxu1 }
 0x1ed   :  { %6771 = vst [vmem:[#allocation3_spill] sm:$0xff] %v4916_v32  ;;  %v4919_v33 = vadd.f32 %v3462_v16, %v4712_v3 }
 0x1ee   :  { %v1439_v19 = vpop.f32.mrf.mxu1 }
 0x1ef   :  { %1848 = vmax.xlane.f32.xlu1 %v4900_v17  ;;  %6772 = vst [vmem:[#allocation4_spill] sm:$0xff] %v4919_v33  ;;  %v4927_v48 = vadd.f32 %v4712_v3, %v1439_v19 }
 0x1f0   :  { %1858 = vmax.xlane.f32.xlu0 %v4903_v18  ;;  %v3463_v54 = vpop.f32.mrf.mxu1 }
 0x1f1   :  { %v4924_v40 = vadd.f32 %v3463_v54, %v4712_v3  ;;  %6774 = vst [vmem:[#allocation6_spill] sm:$0xff] %v4927_v48 }
 0x1f2   :  { %v1442_v25 = vpop.f32.mrf.mxu1 }
 0x1f3   :  { %1860 = vmax.xlane.f32.xlu1 %v4908_v23  ;;  %6773 = vst [vmem:[#allocation5_spill] sm:$0xff] %v4924_v40  ;;  %v4932_v59 = vadd.f32 %v4712_v3, %v1442_v25 }
 0x1f4   :  { %1854 = vmax.xlane.f32.xlu0 %v4911_v24  ;;  %v3466_v31 = vpop.f32.mrf.mxu1 }
 0x1f5   :  { %6775 = vst [vmem:[#allocation7_spill] sm:$0xff] %v4932_v59  ;;  %v4935_v60 = vadd.f32 %v3466_v31, %v4712_v3 }
 0x1f6   :  { %v1455_v38 = vpop.f32.mrf.mxu1 }
 0x1f7   :  { %1856 = vmax.xlane.f32.xlu1 %v4916_v32  ;;  %6776 = vst [vmem:[#allocation8_spill] sm:$0xff] %v4935_v60  ;;  %v4943_v9 = vadd.f32 %v4712_v3, %v1455_v38 }
 0x1f8   :  { %1866 = vmax.xlane.f32.xlu0 %v4919_v33  ;;  %v3467_v41 = vpop.f32.mrf.mxu1 }
 0x1f9   :  { %v4940_v8 = vadd.f32 %v3467_v41, %v4712_v3  ;;  %6778 = vst [vmem:[#allocation10_spill] sm:$0xff] %v4943_v9 }
 0x1fa   :  { %v1458_v52 = vpop.f32.mrf.mxu1 }
 0x1fb   :  { %1868 = vmax.xlane.f32.xlu1 %v4924_v40  ;;  %6777 = vst [vmem:[#allocation9_spill] sm:$0xff] %v4940_v8  ;;  %v4948_v19 = vadd.f32 %v4712_v3, %v1458_v52 }
 0x1fc   :  { %1862 = vmax.xlane.f32.xlu0 %v4927_v48  ;;  %v3470_v53 = vpop.f32.mrf.mxu1 }
 0x1fd   :  { %6779 = vst [vmem:[#allocation11_spill] sm:$0xff] %v4948_v19  ;;  %v4951_v54 = vadd.f32 %v3470_v53, %v4712_v3 }
 0x1fe   :  { %v1471_v63 = vpop.f32.mrf.mxu1 }
 0x1ff   :  { %1864 = vmax.xlane.f32.xlu1 %v4932_v59  ;;  %6780 = vst [vmem:[#allocation12_spill] sm:$0xff] %v4951_v54  ;;  %v4959_v41 = vadd.f32 %v4712_v3, %v1471_v63 }
 0x200   :  { %1874 = vmax.xlane.f32.xlu0 %v4935_v60  ;;  %v3471_v0 = vpop.f32.mrf.mxu1 }
 0x201   :  { %v4956_v38 = vadd.f32 %v3471_v0, %v4712_v3  ;;  %6782 = vst [vmem:[#allocation14_spill] sm:$0xff] %v4959_v41 }
 0x202   :  { %v1474_v13 = vpop.f32.mrf.mxu1 }
 0x203   :  { %1876 = vmax.xlane.f32.xlu1 %v4940_v8  ;;  %6781 = vst [vmem:[#allocation13_spill] sm:$0xff] %v4956_v38  ;;  %v4964_v53 = vadd.f32 %v4712_v3, %v1474_v13 }
 0x204   :  { %1870 = vmax.xlane.f32.xlu0 %v4943_v9  ;;  %v3474_v16 = vpop.f32.mrf.mxu1 }
 0x205   :  { %6783 = vst [vmem:[#allocation15_spill] sm:$0xff] %v4964_v53 }
 0x206   :  { %v1487_v25 = vpop.f32.mrf.mxu1 }
 0x207   :  { %1872 = vmax.xlane.f32.xlu1 %v4948_v19  ;;  %v4967_v19 = vadd.f32 %v3474_v16, %v4712_v3 }
 0x208   :  { %1882 = vmax.xlane.f32.xlu0 %v4951_v54  ;;  %v3475_v31 = vpop.f32.mrf.mxu1 }
 0x209   :  { %6784 = vst [vmem:[#allocation16_spill] sm:$0xff] %v4967_v19  ;;  %v4972_v63 = vadd.f32 %v3475_v31, %v4712_v3 }
 0x20a   :  { %v1490_v9 = vpop.f32.mrf.mxu1 }
 0x20b   :  { %1884 = vmax.xlane.f32.xlu1 %v4956_v38  ;;  %6785 = vst [vmem:[#allocation17_spill] sm:$0xff] %v4972_v63  ;;  %v4975_v38 = vadd.f32 %v4712_v3, %v1487_v25  ;;  %v4980_v16 = vadd.f32 %v4712_v3, %v1490_v9 }
 0x20c   :  { %1878 = vmax.xlane.f32.xlu0 %v4959_v41  ;;  %v3478_v52 = vpop.f32.mrf.mxu1 }
 0x20d   :  { %6786 = vst [vmem:[#allocation18_spill] sm:$0xff] %v4975_v38  ;;  %6787 = vst [vmem:[#allocation19_spill] sm:$0xff] %v4980_v16 }
 0x20e   :  { %v1503_v54 = vpop.f32.mrf.mxu1 }
 0x20f   :  { %1880 = vmax.xlane.f32.xlu1 %v4964_v53  ;;  %v4983_v53 = vadd.f32 %v3478_v52, %v4712_v3 }
 0x210   :  { %1890 = vmax.xlane.f32.xlu0 %v4967_v19  ;;  %v3479_v0 = vpop.f32.mrf.mxu1 }
 0x211   :  { %6788 = vst [vmem:[#allocation20_spill] sm:$0xff] %v4983_v53  ;;  %v4988_v25 = vadd.f32 %v3479_v0, %v4712_v3 }
 0x212   :  { %v1506_v41 = vpop.f32.mrf.mxu1 }
 0x213   :  { %1892 = vmax.xlane.f32.xlu1 %v4972_v63  ;;  %6789 = vst [vmem:[#allocation21_spill] sm:$0xff] %v4988_v25  ;;  %v4991_v63 = vadd.f32 %v4712_v3, %v1503_v54  ;;  %v4996_v52 = vadd.f32 %v4712_v3, %v1506_v41 }
 0x214   :  { %1886 = vmax.xlane.f32.xlu0 %v4975_v38  ;;  %v3482_v13 = vpop.f32.mrf.mxu1 }
 0x215   :  { %6790 = vst [vmem:[#allocation22_spill] sm:$0xff] %v4991_v63  ;;  %6791 = vst [vmem:[#allocation23_spill] sm:$0xff] %v4996_v52 }
 0x216   :  { %v1519_v19 = vpop.f32.mrf.mxu1 }
 0x217   :  { %1888 = vmax.xlane.f32.xlu1 %v4980_v16  ;;  %v4999_v16 = vadd.f32 %v3482_v13, %v4712_v3 }
 0x218   :  { %1898 = vmax.xlane.f32.xlu0 %v4983_v53  ;;  %v3483_v31 = vpop.f32.mrf.mxu1 }
 0x219   :  { %6792 = vst [vmem:[#allocation24_spill] sm:$0xff] %v4999_v16  ;;  %v5004_v54 = vadd.f32 %v3483_v31, %v4712_v3 }
 0x21a   :  { %v1522_v38 = vpop.f32.mrf.mxu1 }
 0x21b   :  { %1900 = vmax.xlane.f32.xlu1 %v4988_v25  ;;  %6793 = vst [vmem:[#allocation25_spill] sm:$0xff] %v5004_v54  ;;  %v5007_v25 = vadd.f32 %v4712_v3, %v1519_v19  ;;  %v5012_v13 = vadd.f32 %v4712_v3, %v1522_v38 }
 0x21c   :  { %1894 = vmax.xlane.f32.xlu0 %v4991_v63  ;;  %v3486_v9 = vpop.f32.mrf.mxu1 }
 0x21d   :  { %6794 = vst [vmem:[#allocation26_spill] sm:$0xff] %v5007_v25  ;;  %6795 = vst [vmem:[#allocation27_spill] sm:$0xff] %v5012_v13 }
 0x21e   :  { %v1535_v53 = vpop.f32.mrf.mxu1 }
 0x21f   :  { %1896 = vmax.xlane.f32.xlu1 %v4996_v52  ;;  %v5015_v52 = vadd.f32 %v3486_v9, %v4712_v3 }
 0x220   :  { %1906 = vmax.xlane.f32.xlu0 %v4999_v16  ;;  %v3487_v0 = vpop.f32.mrf.mxu1 }
 0x221   :  { %6796 = vst [vmem:[#allocation28_spill] sm:$0xff] %v5015_v52  ;;  %v5020_v8 = vadd.f32 %v3487_v0, %v4712_v3 }
 0x222   :  { %v1538_v63 = vpop.f32.mrf.mxu1 }
 0x223   :  { %1908 = vmax.xlane.f32.xlu1 %v5004_v54  ;;  %6797 = vst [vmem:[#allocation29_spill] sm:$0xff] %v5020_v8  ;;  %v5023_v54 = vadd.f32 %v4712_v3, %v1535_v53  ;;  %v5028_v60 = vadd.f32 %v4712_v3, %v1538_v63 }
 0x224   :  { %1902 = vmax.xlane.f32.xlu0 %v5007_v25  ;;  %v3490_v41 = vpop.f32.mrf.mxu1 }
 0x225   :  { %6798 = vst [vmem:[#allocation30_spill] sm:$0xff] %v5023_v54  ;;  %6799 = vst [vmem:[#allocation31_spill] sm:$0xff] %v5028_v60 }
 0x226   :  { %v1551_v16 = vpop.f32.mrf.mxu1 }
 0x227   :  { %1904 = vmax.xlane.f32.xlu1 %v5012_v13  ;;  %v5039_v48 = vadd.f32 %v4712_v3, %v1551_v16 }
 0x228   :  { %1914 = vmax.xlane.f32.xlu0 %v5015_v52  ;;  %v1787_v31 = vpop.xlane.xlu0 %1786  ;;  %v3491_v19 = vpop.f32.mrf.mxu1  ;;  %v5031_v52 = vadd.f32 %v3490_v41, %v4712_v3 }
 0x229   :  { %6802 = vst [vmem:[#allocation34_spill] sm:$0xff] %v5039_v48  ;;  %v2036_v63 = vsub.f32 %v4719_v10, %v1787_v31 }
 0x22a   :  { %v1554_v25 = vpop.f32.mrf.mxu1  ;;  %6800 = vst [vmem:[#allocation32_spill] sm:$0xff] %v5031_v52 }
 0x22b   :  { %1916 = vmax.xlane.f32.xlu1 %v5020_v8  ;;  %v5036_v8 = vadd.f32 %v3491_v19, %v4712_v3  ;;  %v2170_v19 = vmul.f32 1.442695, %v2036_v63 }
 0x22c   :  { %1910 = vmax.xlane.f32.xlu0 %v5023_v54  ;;  %v1789_v38 = vpop.xlane.xlu1 %1788  ;;  %v3494_v9 = vpop.f32.mrf.mxu1 }
 0x22d   :  { %v1783_v13 = vpop.xlane.xlu0 %1782  ;;  %6801 = vst [vmem:[#allocation33_spill] sm:$0xff] %v5036_v8  ;;  %v5049_v32 = vadd.f32 %v3494_v9, %v4712_v3  ;;  %3569 = vpow2.f32 %v2170_v19 }
 0x22e   :  { %v1567_v59 = vpop.f32.mrf.mxu1  ;;  %v2034_v16 = vsub.f32 %v4726_v22, %v1783_v13 }
 0x22f   :  { %1912 = vmax.xlane.f32.xlu1 %v5028_v60  ;;  %v5045_v60 = vadd.f32 %v4712_v3, %v1554_v25  ;;  %6804 = vst [vmem:[#allocation36_spill] sm:$0xff] %v5049_v32  ;;  %v5061_v9 = vadd.f32 %v4712_v3, %v1567_v59 }
 0x230   :  { %1922 = vmax.xlane.f32.xlu0 %v5031_v52  ;;  %v3495_v53 = vpop.f32.mrf.mxu1  ;;  %v1785_v0 = vpop.xlane.xlu1 %1784  ;;  %v2037_v52 = vsub.f32 %v4723_v20, %v1789_v38  ;;  %v2166_v38 = vmul.f32 1.442695, %v2034_v16 }
 0x231   :  { %v1795_v54 = vpop.xlane.xlu0 %1794  ;;  %6803 = vst [vmem:[#allocation35_spill] sm:$0xff] %v5045_v60  ;;  %v2035_v25 = vsub.f32 %v4738_v30, %v1785_v0  ;;  %6806 = vst [vmem:[#allocation38_spill] sm:$0xff] %v5061_v9 }
 0x232   :  { %v1570_v40 = vpop.f32.mrf.mxu1  ;;  %v2172_v31 = vmul.f32 1.442695, %v2037_v52 }
 0x233   :  { %1924 = vmax.xlane.f32.xlu1 %v5036_v8  ;;  %v2168_v52 = vmul.f32 1.442695, %v2035_v25 }
 0x234   :  { %1918 = vmax.xlane.f32.xlu0 %v5039_v48  ;;  %v1797_v41 = vpop.xlane.xlu1 %1796  ;;  %v3498_v24 = vpop.f32.mrf.mxu1  ;;  %v5055_v48 = vadd.f32 %v3495_v53, %v4712_v3  ;;  %3571 = vpow2.f32 %v2172_v31  ;;  %v5068_v53 = vadd.f32 %v4712_v3, %v1570_v40  ;;  %v2040_v40 = vsub.f32 %v4735_v37, %v1795_v54 }
 0x235   :  { %v1791_v33 = vpop.xlane.xlu0 %1790  ;;  %3573 = vpow2.f32 %v2166_v38  ;;  %v5073_v0 = vadd.f32 %v3498_v24, %v4712_v3  ;;  %v2041_v38 = vsub.f32 %v4743_v44, %v1797_v41 }
 0x236   :  { %6805 = vst [vmem:[#allocation37_spill] sm:$0xff] %v5055_v48  ;;  %v1583_v22 = vpop.f32.mrf.mxu1  ;;  %6807 = vst [vmem:[#allocation39_spill] sm:$0xff] %v5068_v53  ;;  %3575 = vpow2.f32 %v2168_v52  ;;  %v2038_v37 = vsub.f32 %v4746_v46, %v1791_v33 }
 0x237   :  { %1920 = vmax.xlane.f32.xlu1 %v5045_v60  ;;  %6808 = vst [vmem:[#allocation40_spill] sm:$0xff] %v5073_v0  ;;  %v5086_v31 = vadd.f32 %v4712_v3, %v1583_v22 }
 0x238   :  { %1930 = vmax.xlane.f32.xlu0 %v5049_v32  ;;  %v1793_v10 = vpop.xlane.xlu1 %1792  ;;  %v3499_v59 = vpop.f32.mrf.mxu1 }
 0x239   :  { %v5058_v20 = vpop.xlane.xlu0 %1802  ;;  %v5080_v19 = vadd.f32 %v3499_v59, %v4712_v3  ;;  %6810 = vst [vmem:[#allocation42_spill] sm:$0xff] %v5086_v31  ;;  %v2039_v44 = vsub.f32 %v4763_v56, %v1793_v10 }
 0x23a   :  { %v1586_v24 = vpop.f32.mrf.mxu1  ;;  %v5099_v22 = vpop.eup %3569 }
 0x23b   :  { %1932 = vmax.xlane.f32.xlu1 %v5055_v48  ;;  %6809 = vst [vmem:[#allocation41_spill] sm:$0xff] %v5080_v19  ;;  %v5094_v52 = vadd.f32 %v4712_v3, %v1586_v24 }
 0x23c   :  { %1926 = vmax.xlane.f32.xlu0 %v5061_v9  ;;  %v5065_v13 = vpop.xlane.xlu1 %1804  ;;  %v3502_v54 = vpop.f32.mrf.mxu1 }
 0x23d   :  { %v5070_v30 = vpop.xlane.xlu0 %1798  ;;  %6811 = vst [vmem:[#allocation43_spill] sm:$0xff] %v5094_v52  ;;  %v5121_v10 = vadd.f32 %v3502_v54, %v4712_v3 }
 0x23f   :  { %1928 = vmax.xlane.f32.xlu1 %v5068_v53  ;;  %v1599_v53 = vpop.f32.mrf.mxu1  ;;  %6812 = vst [vmem:[#allocation44_spill] sm:$0xff] %v5121_v10 }
 0x240   :  { %1938 = vmax.xlane.f32.xlu0 %v5073_v0  ;;  %v5077_v63 = vpop.xlane.xlu1 %1800  ;;  %v2178_v0 = vmul.f32 1.442695, %v2040_v40  ;;  %v2174_v40 = vmul.f32 1.442695, %v2038_v37 }
 0x241   :  { %v5082_v16 = vpop.xlane.xlu0 %1810  ;;  %v5108_v24 = vpop.eup %3571 }
 0x242   :  { %3577 = vpow2.f32 %v2178_v0  ;;  %v5110_v46 = vpop.eup %3573  ;;  %v3503_v0 = vpop.f32.mrf.mxu1 }
 0x243   :  { %1940 = vmax.xlane.f32.xlu1 %v5080_v19  ;;  %v2180_v19 = vmul.f32 1.442695, %v2041_v38  ;;  %v5118_v56 = vpop.eup %3575  ;;  %v5128_v9 = vadd.f32 %v3503_v0, %v4712_v3 }
 0x244   :  { %1934 = vmax.xlane.f32.xlu0 %v5086_v31  ;;  %v5090_v25 = vpop.xlane.xlu1 %1812  ;;  %v1602_v54 = vpop.f32.mrf.mxu1 }
 0x245   :  { %v5096_v59 = vpop.xlane.xlu0 %1806  ;;  %3579 = vpow2.f32 %v2180_v19  ;;  %6813 = vst [vmem:[#allocation45_spill] sm:$0xff] %v5128_v9  ;;  %v5144_v0 = vadd.f32 %v4712_v3, %v1602_v54 }
 0x246   :  { %3581 = vpow2.f32 %v2174_v40  ;;  %v5135_v40 = vadd.f32 %v4712_v3, %v1599_v53 }
 0x247   :  { %1936 = vmax.xlane.f32.xlu1 %v5094_v52  ;;  %v2176_v52 = vmul.f32 1.442695, %v2039_v44  ;;  %v2044_v44 = vsub.f32 %v4760_v55, %v5058_v20  ;;  %6815 = vst [vmem:[#allocation47_spill] sm:$0xff] %v5144_v0  ;;  %v2042_v55 = vsub.f32 %v4771_v4, %v5070_v30  ;;  %v3506_v20 = vpop.f32.mrf.mxu1 }
 0x248   :  { %2426 = vadd.xlane.f32.xlu0 %v5099_v22  ;;  %v5103_v31 = vpop.xlane.xlu1 %1808  ;;  %6814 = vst [vmem:[#allocation46_spill] sm:$0xff] %v5135_v40 }
 0x249   :  { %v5106_v41 = vpop.xlane.xlu0 %1818  ;;  %3583 = vpow2.f32 %v2176_v52  ;;  %v2045_v52 = vsub.f32 %v4768_v1, %v5065_v13  ;;  %v2186_v32 = vmul.f32 1.442695, %v2044_v44  ;;  %v2043_v1 = vsub.f32 %v4783_v15, %v5077_v63  ;;  %v1615_v4 = vpop.f32.mrf.mxu1 }
 0x24a   :  { %v2182_v44 = vmul.f32 1.442695, %v2042_v55  ;;  %v5173_v63 = vadd.f32 %v3506_v20, %v4712_v3 }
 0x24b   :  { %2428 = vadd.xlane.f32.xlu1 %v5108_v24  ;;  %3585 = vpow2.f32 %v2186_v32  ;;  %v3507_v32 = vpop.f32.mrf.mxu1 }
 0x24c   :  { %2422 = vadd.xlane.f32.xlu0 %v5110_v46  ;;  %v5114_v33 = vpop.xlane.xlu1 %1820  ;;  %6819 = vst [vmem:[#allocation51_spill] sm:$0xff] %v5173_v63  ;;  %v5180_v8 = vadd.f32 %v3507_v32, %v4712_v3 }
 0x24d   :  { %v5116_v38 = vpop.xlane.xlu0 %1814  ;;  %v1618_v20 = vpop.f32.mrf.mxu1 }
 0x24e   :  { %6820 = vst [vmem:[#allocation52_spill] sm:$0xff] %v5180_v8  ;;  %v5196_v32 = vadd.f32 %v4712_v3, %v1618_v20 }
 0x24f   :  { %2424 = vadd.xlane.f32.xlu1 %v5118_v56  ;;  %v5150_v53 = vpop.eup %3577 }
 0x250   :  { %1946 = vmax.xlane.f32.xlu0 %v5121_v10  ;;  %v5125_v37 = vpop.xlane.xlu1 %1816  ;;  %6822 = vst [vmem:[#allocation54_spill] sm:$0xff] %v5196_v32 }
 0x251   :  { %v5130_v19 = vpop.xlane.xlu0 %1826 }
 0x252   :  { %v5160_v54 = vpop.eup %3579 }
 0x253   :  { %1948 = vmax.xlane.f32.xlu1 %v5128_v9  ;;  %v2188_v9 = vmul.f32 1.442695, %v2045_v52  ;;  %6816 = vst [vmem:[#allocation48_spill] sm:$0xff] %v5160_v54  ;;  %v5162_v30 = vpop.eup %3581  ;;  %v2184_v52 = vmul.f32 1.442695, %v2043_v1  ;;  %v2048_v1 = vsub.f32 %v4780_v14, %v5082_v16  ;;  %v2046_v14 = vsub.f32 %v4791_v28, %v5096_v59  ;;  %v3510_v16 = vpop.f32.mrf.mxu1 }
 0x254   :  { %1942 = vmax.xlane.f32.xlu0 %v5135_v40  ;;  %v5139_v10 = vpop.xlane.xlu1 %1778  ;;  %6817 = vst [vmem:[#allocation49_spill] sm:$0xff] %v5162_v30 }
 0x255   :  { %v5146_v48 = vpop.xlane.xlu0 %1822  ;;  %3587 = vpow2.f32 %v2188_v9  ;;  %v1631_v28 = vpop.f32.mrf.mxu1 }
 0x256   :  { %v5170_v15 = vpop.eup %3583  ;;  %3589 = vpow2.f32 %v2182_v44  ;;  %v5187_v44 = vadd.f32 %v4712_v3, %v1615_v4 }
 0x257   :  { %1944 = vmax.xlane.f32.xlu1 %v5144_v0  ;;  %6818 = vst [vmem:[#allocation50_spill] sm:$0xff] %v5170_v15  ;;  %3591 = vpow2.f32 %v2184_v52  ;;  %v2049_v52 = vsub.f32 %v4788_v26, %v5090_v25  ;;  %v2047_v26 = vsub.f32 %v4799_v39, %v5103_v31  ;;  %v5225_v31 = vadd.f32 %v3510_v16, %v4712_v3 }
 0x258   :  { %2434 = vadd.xlane.f32.xlu0 %v5150_v53  ;;  %v5154_v40 = vpop.xlane.xlu1 %1828  ;;  %6821 = vst [vmem:[#allocation53_spill] sm:$0xff] %v5187_v44  ;;  %v5202_v4 = vpop.eup %3585 }
 0x259   :  { %v5158_v13 = vpop.xlane.xlu0 %1774  ;;  %6823 = vst [vmem:[#allocation55_spill] sm:$0xff] %v5202_v4  ;;  %6827 = vst [vmem:[#allocation59_spill] sm:$0xff] %v5225_v31 }
 0x25b   :  { %2436 = vadd.xlane.f32.xlu1 %v5160_v54 }
 0x25c   :  { %2430 = vadd.xlane.f32.xlu0 %v5162_v30  ;;  %v5166_v0 = vpop.xlane.xlu1 %1780  ;;  %v2194_v30 = vmul.f32 1.442695, %v2048_v1  ;;  %v2190_v1 = vmul.f32 1.442695, %v2046_v14 }
 0x25d   :  { %v5168_v60 = vpop.xlane.xlu0 %1776 }
 0x25e   :  { %3593 = vpow2.f32 %v2194_v30  ;;  %v3511_v30 = vpop.f32.mrf.mxu1 }
 0x25f   :  { %2432 = vadd.xlane.f32.xlu1 %v5170_v15 }
 0x260   :  { %1954 = vmax.xlane.f32.xlu0 %v5173_v63  ;;  %v5177_v55 = vpop.xlane.xlu1 %1824  ;;  %v1634_v16 = vpop.f32.mrf.mxu1 }
 0x261   :  { %v5182_v9 = vpop.xlane.xlu0 %1834 }
 0x262   :  { %v5212_v20 = vpop.eup %3587 }
 0x263   :  { %1956 = vmax.xlane.f32.xlu1 %v5180_v8  ;;  %v2196_v8 = vmul.f32 1.442695, %v2049_v52  ;;  %6824 = vst [vmem:[#allocation56_spill] sm:$0xff] %v5212_v20  ;;  %v5214_v59 = vpop.eup %3589  ;;  %v2192_v52 = vmul.f32 1.442695, %v2047_v26  ;;  %v2052_v26 = vsub.f32 %v4803_v42, %v5106_v41  ;;  %v2050_v42 = vsub.f32 %v4811_v58, %v5116_v38  ;;  %v3514_v41 = vpop.f32.mrf.mxu1 }
 0x264   :  { %1950 = vmax.xlane.f32.xlu0 %v5187_v44  ;;  %v5191_v63 = vpop.xlane.xlu1 %1836  ;;  %6825 = vst [vmem:[#allocation57_spill] sm:$0xff] %v5214_v59  ;;  %v5222_v39 = vpop.eup %3591 }
 0x265   :  { %v5198_v15 = vpop.xlane.xlu0 %1830  ;;  %3595 = vpow2.f32 %v2196_v8  ;;  %6826 = vst [vmem:[#allocation58_spill] sm:$0xff] %v5222_v39  ;;  %v1647_v58 = vpop.f32.mrf.mxu1 }
 0x266   :  { %3597 = vpow2.f32 %v2190_v1  ;;  %v5239_v1 = vadd.f32 %v4712_v3, %v1631_v28 }
 0x267   :  { %1952 = vmax.xlane.f32.xlu1 %v5196_v32  ;;  %3599 = vpow2.f32 %v2192_v52  ;;  %v2053_v52 = vsub.f32 %v4808_v57, %v5114_v33 }
 0x268   :  { %2442 = vadd.xlane.f32.xlu0 %v5202_v4  ;;  %v5206_v44 = vpop.xlane.xlu1 %1832  ;;  %6829 = vst [vmem:[#allocation61_spill] sm:$0xff] %v5239_v1 }
 0x269   :  { %v5210_v25 = vpop.xlane.xlu0 %1842 }
 0x26b   :  { %2444 = vadd.xlane.f32.xlu1 %v5212_v20  ;;  %v2202_v20 = vmul.f32 1.442695, %v2052_v26  ;;  %v5254_v28 = vpop.eup %3593  ;;  %v2198_v26 = vmul.f32 1.442695, %v2050_v42  ;;  %v3515_v42 = vpop.f32.mrf.mxu1 }
 0x26c   :  { %2438 = vadd.xlane.f32.xlu0 %v5214_v59  ;;  %v5218_v32 = vpop.xlane.xlu1 %1844  ;;  %v5232_v59 = vadd.f32 %v3511_v30, %v4712_v3  ;;  %v5248_v30 = vadd.f32 %v4712_v3, %v1634_v16  ;;  %6831 = vst [vmem:[#allocation63_spill] sm:$0xff] %v5254_v28  ;;  %v2051_v3 = vsub.f32 %v4819_v5, %v5125_v37  ;;  %v5279_v37 = vld [vmem:[%s6624_s4] ss:$0 sm:$0xff] }
 0x26d   :  { %v5220_v4 = vpop.xlane.xlu0 %1838  ;;  %3601 = vpow2.f32 %v2202_v20  ;;  %v5282_v20 = vadd.f32 %v5279_v37, %v3514_v41  ;;  %v1650_v41 = vpop.f32.mrf.mxu1 }
 0x26e   :  { %6828 = vst [vmem:[#allocation60_spill] sm:$0xff] %v5232_v59  ;;  %6830 = vst [vmem:[#allocation62_spill] sm:$0xff] %v5248_v30 }
 0x26f   :  { %2440 = vadd.xlane.f32.xlu1 %v5222_v39  ;;  %6835 = vst [vmem:[#allocation67_spill] sm:$0xff] %v5282_v20 }
 0x270   :  { %1962 = vmax.xlane.f32.xlu0 %v5225_v31  ;;  %v5229_v14 = vpop.xlane.xlu1 %1840 }
 0x271   :  { %v5234_v8 = vpop.xlane.xlu0 %1850 }
 0x272   :  { %v5264_v33 = vpop.eup %3595 }
 0x273   :  { %1964 = vmax.xlane.f32.xlu1 %v5232_v59  ;;  %v2204_v59 = vmul.f32 1.442695, %v2053_v52  ;;  %6832 = vst [vmem:[#allocation64_spill] sm:$0xff] %v5264_v33  ;;  %v5266_v38 = vpop.eup %3597  ;;  %v2200_v52 = vmul.f32 1.442695, %v2051_v3  ;;  %v5289_v3 = vadd.f32 %v5279_v37, %v3515_v42  ;;  %v5305_v42 = vadd.f32 %v5279_v37, %v1650_v41 }
 0x274   :  { %1958 = vmax.xlane.f32.xlu0 %v5239_v1  ;;  %v5243_v31 = vpop.xlane.xlu1 %1852  ;;  %6833 = vst [vmem:[#allocation65_spill] sm:$0xff] %v5266_v38  ;;  %v5274_v5 = vpop.eup %3599 }
 0x275   :  { %v5250_v39 = vpop.xlane.xlu0 %1846  ;;  %3603 = vpow2.f32 %v2204_v59  ;;  %6834 = vst [vmem:[#allocation66_spill] sm:$0xff] %v5274_v5  ;;  %6836 = vst [vmem:[#allocation68_spill] sm:$0xff] %v5289_v3 }
 0x276   :  { %3605 = vpow2.f32 %v2198_v26  ;;  %6838 = vst [vmem:[#allocation70_spill] sm:$0xff] %v5305_v42 }
 0x277   :  { %1960 = vmax.xlane.f32.xlu1 %v5248_v30  ;;  %3607 = vpow2.f32 %v2200_v52  ;;  %v2057_v52 = vsub.f32 %v4836_v27, %v5154_v40  ;;  %v2033_v27 = vsub.f32 %v4844_v35, %v5166_v0  ;;  %v2055_v0 = vsub.f32 %v4852_v45, %v5177_v55 }
 0x278   :  { %2450 = vadd.xlane.f32.xlu0 %v5254_v28  ;;  %v5258_v1 = vpop.xlane.xlu1 %1848 }
 0x279   :  { %v5262_v57 = vpop.xlane.xlu0 %1858  ;;  %v2164_v35 = vmul.f32 1.442695, %v2033_v27  ;;  %v2208_v45 = vmul.f32 1.442695, %v2055_v0  ;;  %v2030_v27 = vsub.f32 %v4839_v29, %v5158_v13 }
 0x27b   :  { %2452 = vadd.xlane.f32.xlu1 %v5264_v33  ;;  %v5296_v33 = vadd.f32 %v5279_v37, %v1647_v58  ;;  %v5311_v58 = vpop.eup %3601  ;;  %v2158_v29 = vmul.f32 1.442695, %v2030_v27 }
 0x27c   :  { %2446 = vadd.xlane.f32.xlu0 %v5266_v38  ;;  %v5270_v16 = vpop.xlane.xlu1 %1860  ;;  %v2056_v38 = vsub.f32 %v4823_v7, %v5130_v19  ;;  %v2032_v7 = vsub.f32 %v4828_v21, %v5139_v10  ;;  %v3518_v19 = vpop.f32.mrf.mxu1  ;;  %v2054_v21 = vsub.f32 %v4831_v43, %v5146_v48 }
 0x27d   :  { %v5272_v30 = vpop.xlane.xlu0 %1854  ;;  %6837 = vst [vmem:[#allocation69_spill] sm:$0xff] %v5296_v33  ;;  %v5338_v48 = vadd.f32 %v5279_v37, %v3518_v19 }
 0x27e   :  { %v2210_v28 = vmul.f32 1.442695, %v2056_v38  ;;  %v2162_v10 = vmul.f32 1.442695, %v2032_v7  ;;  %v1663_v38 = vpop.f32.mrf.mxu1  ;;  %v2206_v43 = vmul.f32 1.442695, %v2054_v21 }
 0x27f   :  { %2448 = vadd.xlane.f32.xlu1 %v5274_v5  ;;  %6840 = vst [vmem:[#allocation72_spill] sm:$0xff] %v5338_v48  ;;  %v5352_v19 = vadd.f32 %v5279_v37, %v1663_v38 }
 0x280   :  { %1970 = vmax.xlane.f32.xlu0 %v5282_v20  ;;  %v5286_v59 = vpop.xlane.xlu1 %1856  ;;  %3609 = vpow2.f32 %v2210_v28  ;;  %v3519_v7 = vpop.f32.mrf.mxu1 }
 0x281   :  { %v5291_v26 = vpop.xlane.xlu0 %1866  ;;  %6842 = vst [vmem:[#allocation74_spill] sm:$0xff] %v5352_v19 }
 0x282   :  { %v5321_v41 = vpop.eup %3603  ;;  %v1666_v21 = vpop.f32.mrf.mxu1 }
 0x283   :  { %1972 = vmax.xlane.f32.xlu1 %v5289_v3  ;;  %v2212_v3 = vmul.f32 1.442695, %v2057_v52  ;;  %v5325_v54 = vpop.eup %3605  ;;  %v5361_v0 = vadd.f32 %v5279_v37, %v1666_v21  ;;  %v2061_v21 = vsub.f32 %v4860_v49, %v5191_v63  ;;  %v2059_v49 = vsub.f32 %v4868_v34, %v5206_v44 }
 0x284   :  { %1966 = vmax.xlane.f32.xlu0 %v5296_v33  ;;  %v5300_v20 = vpop.xlane.xlu1 %1868  ;;  %6839 = vst [vmem:[#allocation71_spill] sm:$0xff] %v5325_v54  ;;  %v5335_v28 = vpop.eup %3607 }
 0x285   :  { %v5307_v5 = vpop.xlane.xlu0 %1862  ;;  %3611 = vpow2.f32 %v2212_v3  ;;  %v5345_v3 = vadd.f32 %v5279_v37, %v3519_v7  ;;  %6843 = vst [vmem:[#allocation75_spill] sm:$0xff] %v5361_v0  ;;  %v2216_v34 = vmul.f32 1.442695, %v2059_v49  ;;  %v2064_v49 = vsub.f32 %v4871_v50, %v5210_v25 }
 0x286   :  { %3613 = vpow2.f32 %v2162_v10  ;;  %v2062_v50 = vsub.f32 %v4879_v62, %v5220_v4 }
 0x287   :  { %1968 = vmax.xlane.f32.xlu1 %v5305_v42  ;;  %3615 = vpow2.f32 %v2164_v35  ;;  %6841 = vst [vmem:[#allocation73_spill] sm:$0xff] %v5345_v3  ;;  %v2031_v35 = vsub.f32 %v4847_v36, %v5168_v60  ;;  %v2060_v36 = vsub.f32 %v4855_v47, %v5182_v9  ;;  %v3522_v60 = vpop.f32.mrf.mxu1  ;;  %v2058_v47 = vsub.f32 %v4863_v51, %v5198_v15 }
 0x288   :  { %2458 = vadd.xlane.f32.xlu0 %v5311_v58  ;;  %v5315_v33 = vpop.xlane.xlu1 %1864  ;;  %3617 = vpow2.f32 %v2206_v43  ;;  %v5404_v51 = vadd.f32 %v5279_v37, %v3522_v60 }
 0x289   :  { %v5319_v40 = vpop.xlane.xlu0 %1874  ;;  %3619 = vpow2.f32 %v2208_v45  ;;  %v2160_v7 = vmul.f32 1.442695, %v2031_v35  ;;  %v1679_v9 = vpop.f32.mrf.mxu1  ;;  %v2214_v15 = vmul.f32 1.442695, %v2058_v47 }
 0x28a   :  { %3621 = vpow2.f32 %v2158_v29  ;;  %v2218_v29 = vmul.f32 1.442695, %v2060_v36  ;;  %6850 = vst [vmem:[#allocation82_spill] sm:$0xff] %v5404_v51 }
 0x28b   :  { %2460 = vadd.xlane.f32.xlu1 %v5321_v41  ;;  %3623 = vpow2.f32 %v2160_v7  ;;  %v2220_v7 = vmul.f32 1.442695, %v2061_v21  ;;  %v3523_v36 = vpop.f32.mrf.mxu1 }
 0x28c   :  { %2454 = vadd.xlane.f32.xlu0 %v5325_v54  ;;  %v5329_v52 = vpop.xlane.xlu1 %1876  ;;  %3625 = vpow2.f32 %v2218_v29  ;;  %v5411_v21 = vadd.f32 %v5279_v37, %v3523_v36 }
 0x28d   :  { %v5333_v42 = vpop.xlane.xlu0 %1870  ;;  %v5365_v13 = vpop.eup %3609  ;;  %3627 = vpow2.f32 %v2220_v7  ;;  %v5426_v7 = vadd.f32 %v5279_v37, %v1679_v9  ;;  %v2226_v9 = vmul.f32 1.442695, %v2064_v49  ;;  %v2222_v49 = vmul.f32 1.442695, %v2062_v50 }
 0x28e   :  { %6844 = vst [vmem:[#allocation76_spill] sm:$0xff] %v5365_v13  ;;  %6851 = vst [vmem:[#allocation83_spill] sm:$0xff] %v5411_v21  ;;  %3629 = vpow2.f32 %v2214_v15  ;;  %v1682_v15 = vpop.f32.mrf.mxu1 }
 0x28f   :  { %2456 = vadd.xlane.f32.xlu1 %v5335_v28  ;;  %3631 = vpow2.f32 %v2216_v34  ;;  %6854 = vst [vmem:[#allocation86_spill] sm:$0xff] %v5426_v7  ;;  %v2065_v34 = vsub.f32 %v4876_v61, %v5218_v32 }
 0x290   :  { %1978 = vmax.xlane.f32.xlu0 %v5338_v48  ;;  %v5342_v54 = vpop.xlane.xlu1 %1872  ;;  %3633 = vpow2.f32 %v2226_v9 }
 0x291   :  { %v5347_v55 = vpop.xlane.xlu0 %1882 }
 0x293   :  { %1980 = vmax.xlane.f32.xlu1 %v5345_v3  ;;  %v5373_v3 = vpop.eup %3611 }
 0x294   :  { %1974 = vmax.xlane.f32.xlu0 %v5352_v19  ;;  %v5356_v10 = vpop.xlane.xlu1 %1884  ;;  %6845 = vst [vmem:[#allocation77_spill] sm:$0xff] %v5373_v3  ;;  %v5377_v45 = vpop.eup %3613 }
 0x295   :  { %v5363_v43 = vpop.xlane.xlu0 %1878  ;;  %6846 = vst [vmem:[#allocation78_spill] sm:$0xff] %v5377_v45 }
 0x297   :  { %1976 = vmax.xlane.f32.xlu1 %v5361_v0  ;;  %v5387_v0 = vpop.eup %3615 }
 0x298   :  { %2466 = vadd.xlane.f32.xlu0 %v5365_v13  ;;  %v5369_v38 = vpop.xlane.xlu1 %1880  ;;  %6847 = vst [vmem:[#allocation79_spill] sm:$0xff] %v5387_v0  ;;  %v5391_v48 = vpop.eup %3617 }
 0x299   :  { %v5371_v19 = vpop.xlane.xlu0 %1890  ;;  %6848 = vst [vmem:[#allocation80_spill] sm:$0xff] %v5391_v48 }
 0x29b   :  { %2468 = vadd.xlane.f32.xlu1 %v5373_v3  ;;  %v5401_v3 = vpop.eup %3619 }
 0x29c   :  { %2418 = vadd.xlane.f32.xlu0 %v5377_v45  ;;  %v5381_v27 = vpop.xlane.xlu1 %1892  ;;  %6849 = vst [vmem:[#allocation81_spill] sm:$0xff] %v5401_v3  ;;  %v5415_v29 = vpop.eup %3621 }
 0x29d   :  { %v5385_v35 = vpop.xlane.xlu0 %1886  ;;  %6852 = vst [vmem:[#allocation84_spill] sm:$0xff] %v5415_v29 }
 0x29f   :  { %2420 = vadd.xlane.f32.xlu1 %v5387_v0 }
 0x2a0   :  { %2462 = vadd.xlane.f32.xlu0 %v5391_v48  ;;  %v5395_v45 = vpop.xlane.xlu1 %1888 }
 0x2a1   :  { %v5399_v63 = vpop.xlane.xlu0 %1898 }
 0x2a3   :  { %2464 = vadd.xlane.f32.xlu1 %v5401_v3  ;;  %v3526_v3 = vpop.f32.mrf.mxu1 }
 0x2a4   :  { %1986 = vmax.xlane.f32.xlu0 %v5404_v51  ;;  %v5408_v48 = vpop.xlane.xlu1 %1900  ;;  %v5423_v51 = vpop.eup %3623 }
 0x2a5   :  { %v5413_v44 = vpop.xlane.xlu0 %1894  ;;  %6853 = vst [vmem:[#allocation85_spill] sm:$0xff] %v5423_v51  ;;  %v5443_v25 = vpop.eup %3625 }
 0x2a6   :  { %6856 = vst [vmem:[#allocation88_spill] sm:$0xff] %v5443_v25  ;;  %v5453_v32 = vpop.eup %3627  ;;  %v1695_v0 = vpop.f32.mrf.mxu1 }
 0x2a7   :  { %1988 = vmax.xlane.f32.xlu1 %v5411_v21  ;;  %v5435_v21 = vadd.f32 %v5279_v37, %v1682_v15  ;;  %v2228_v15 = vmul.f32 1.442695, %v2065_v34  ;;  %6857 = vst [vmem:[#allocation89_spill] sm:$0xff] %v5453_v32  ;;  %v5455_v62 = vpop.eup %3629 }
 0x2a8   :  { %2414 = vadd.xlane.f32.xlu0 %v5415_v29  ;;  %v5419_v60 = vpop.xlane.xlu1 %1896  ;;  %6858 = vst [vmem:[#allocation90_spill] sm:$0xff] %v5455_v62  ;;  %v3527_v9 = vpop.f32.mrf.mxu1 }
 0x2a9   :  { %v5421_v47 = vpop.xlane.xlu0 %1906  ;;  %6855 = vst [vmem:[#allocation87_spill] sm:$0xff] %v5435_v21  ;;  %3635 = vpow2.f32 %v2228_v15  ;;  %v5478_v15 = vadd.f32 %v5279_v37, %v1695_v0 }
 0x2aa   :  { %3637 = vpow2.f32 %v2222_v49  ;;  %v1698_v49 = vpop.f32.mrf.mxu1 }
 0x2ab   :  { %2416 = vadd.xlane.f32.xlu1 %v5423_v51  ;;  %v2063_v51 = vsub.f32 %v4884_v2, %v5229_v14  ;;  %v5463_v2 = vpop.eup %3631  ;;  %v5466_v14 = vadd.f32 %v5279_v37, %v3526_v3  ;;  %6862 = vst [vmem:[#allocation94_spill] sm:$0xff] %v5478_v15  ;;  %v2068_v3 = vsub.f32 %v4887_v6, %v5234_v8 }
 0x2ac   :  { %1982 = vmax.xlane.f32.xlu0 %v5426_v7  ;;  %v5432_v36 = vpop.xlane.xlu1 %1908  ;;  %6859 = vst [vmem:[#allocation91_spill] sm:$0xff] %v5463_v2  ;;  %v2066_v6 = vsub.f32 %v4895_v12, %v5250_v39  ;;  %v5495_v8 = vpop.eup %3633 }
 0x2ad   :  { %v5439_v29 = vpop.xlane.xlu0 %1902  ;;  %v2224_v34 = vmul.f32 1.442695, %v2063_v51  ;;  %6860 = vst [vmem:[#allocation92_spill] sm:$0xff] %v5466_v14  ;;  %v2234_v0 = vmul.f32 1.442695, %v2068_v3  ;;  %6864 = vst [vmem:[#allocation96_spill] sm:$0xff] %v5495_v8 }
 0x2ae   :  { %v2230_v3 = vmul.f32 1.442695, %v2066_v6 }
 0x2af   :  { %1984 = vmax.xlane.f32.xlu1 %v5435_v21  ;;  %3639 = vpow2.f32 %v2224_v34  ;;  %v2069_v34 = vsub.f32 %v4892_v11, %v5243_v31 }
 0x2b0   :  { %2474 = vadd.xlane.f32.xlu0 %v5443_v25  ;;  %v5447_v7 = vpop.xlane.xlu1 %1904  ;;  %3641 = vpow2.f32 %v2234_v0 }
 0x2b1   :  { %v5451_v61 = vpop.xlane.xlu0 %1914 }
 0x2b3   :  { %2476 = vadd.xlane.f32.xlu1 %v5453_v32  ;;  %v3530_v32 = vpop.f32.mrf.mxu1 }
 0x2b4   :  { %2470 = vadd.xlane.f32.xlu0 %v5455_v62  ;;  %v5459_v4 = vpop.xlane.xlu1 %1916  ;;  %v5473_v62 = vadd.f32 %v5279_v37, %v3527_v9 }
 0x2b5   :  { %v5461_v21 = vpop.xlane.xlu0 %1910  ;;  %v1711_v25 = vpop.f32.mrf.mxu1 }
 0x2b6   :  { %6861 = vst [vmem:[#allocation93_spill] sm:$0xff] %v5473_v62  ;;  %v5505_v31 = vpop.eup %3635 }
 0x2b7   :  { %2472 = vadd.xlane.f32.xlu1 %v5463_v2  ;;  %v5487_v2 = vadd.f32 %v5279_v37, %v1698_v49  ;;  %v2236_v49 = vmul.f32 1.442695, %v2069_v34  ;;  %6865 = vst [vmem:[#allocation97_spill] sm:$0xff] %v5505_v31  ;;  %v5507_v12 = vpop.eup %3637  ;;  %v3531_v0 = vpop.f32.mrf.mxu1 }
 0x2b8   :  { %1994 = vmax.xlane.f32.xlu0 %v5466_v14  ;;  %v5470_v50 = vpop.xlane.xlu1 %1912  ;;  %6866 = vst [vmem:[#allocation98_spill] sm:$0xff] %v5507_v12 }
 0x2b9   :  { %v5475_v51 = vpop.xlane.xlu0 %1922  ;;  %6863 = vst [vmem:[#allocation95_spill] sm:$0xff] %v5487_v2  ;;  %3643 = vpow2.f32 %v2236_v49  ;;  %v5530_v49 = vadd.f32 %v5279_v37, %v1711_v25 }
 0x2ba   :  { %3645 = vpow2.f32 %v2230_v3  ;;  %v1714_v3 = vpop.f32.mrf.mxu1 }
 0x2bb   :  { %1996 = vmax.xlane.f32.xlu1 %v5473_v62  ;;  %v2067_v62 = vsub.f32 %v4900_v17, %v5258_v1  ;;  %v5518_v1 = vadd.f32 %v5279_v37, %v3530_v32  ;;  %6870 = vst [vmem:[#allocation102_spill] sm:$0xff] %v5530_v49  ;;  %v2072_v32 = vsub.f32 %v4903_v18, %v5262_v57 }
 0x2bc   :  { %1990 = vmax.xlane.f32.xlu0 %v5478_v15  ;;  %v5484_v14 = vpop.xlane.xlu1 %1924  ;;  %v5515_v17 = vpop.eup %3639 }
 0x2bd   :  { %v5491_v9 = vpop.xlane.xlu0 %1918  ;;  %v2232_v34 = vmul.f32 1.442695, %v2067_v62  ;;  %6867 = vst [vmem:[#allocation99_spill] sm:$0xff] %v5515_v17  ;;  %6868 = vst [vmem:[#allocation100_spill] sm:$0xff] %v5518_v1  ;;  %v3534_v18 = vpop.f32.mrf.mxu1 }
 0x2be   :  { %v5547_v57 = vpop.eup %3641 }
 0x2bf   :  { %1992 = vmax.xlane.f32.xlu1 %v5487_v2  ;;  %3647 = vpow2.f32 %v2232_v34  ;;  %v5541_v34 = vadd.f32 %v5279_v37, %v1714_v3 }
 0x2c0   :  { %2482 = vadd.xlane.f32.xlu0 %v5495_v8  ;;  %v5499_v15 = vpop.xlane.xlu1 %1920  ;;  %v2242_v8 = vmul.f32 1.442695, %v2072_v32 }
 0x2c1   :  { %v5503_v11 = vpop.xlane.xlu0 %1930  ;;  %6872 = vst [vmem:[#allocation104_spill] sm:$0xff] %v5541_v34 }
 0x2c2   :  { %3649 = vpow2.f32 %v2242_v8 }
 0x2c3   :  { %2484 = vadd.xlane.f32.xlu1 %v5505_v31 }
 0x2c4   :  { %2478 = vadd.xlane.f32.xlu0 %v5507_v12  ;;  %v5511_v39 = vpop.xlane.xlu1 %1932  ;;  %v5525_v12 = vadd.f32 %v5279_v37, %v3531_v0  ;;  %v6873_v0 = vld [vmem:[#allocation2_spill] sm:$0xff] }
 0x2c5   :  { %v5513_v2 = vpop.xlane.xlu0 %1926  ;;  %v2070_v25 = vsub.f32 %v6873_v0, %v5272_v30  ;;  %6874 = vst [vmem:[#allocation2_spill] sm:$0xff] %v5547_v57  ;;  %v1727_v30 = vpop.f32.mrf.mxu1 }
 0x2c6   :  { %6869 = vst [vmem:[#allocation101_spill] sm:$0xff] %v5525_v12 }
 0x2c7   :  { %2480 = vadd.xlane.f32.xlu1 %v5515_v17  ;;  %v2238_v3 = vmul.f32 1.442695, %v2070_v25  ;;  %v5564_v25 = vadd.f32 %v5279_v37, %v3534_v18  ;;  %v6882_v18 = vld [vmem:[#allocation4_spill] sm:$0xff] }
 0x2c8   :  { %2002 = vmax.xlane.f32.xlu0 %v5518_v1  ;;  %v5522_v6 = vpop.xlane.xlu1 %1928  ;;  %v2073_v1 = vsub.f32 %v4908_v23, %v5270_v16  ;;  %v6875_v23 = vld [vmem:[#allocation3_spill] sm:$0xff] }
 0x2c9   :  { %v5527_v62 = vpop.xlane.xlu0 %1938  ;;  %v2071_v16 = vsub.f32 %v6875_v23, %v5286_v59  ;;  %6879 = vst [vmem:[#allocation107_spill] sm:$0xff] %v5564_v25 }
 0x2cb   :  { %2004 = vmax.xlane.f32.xlu1 %v5525_v12  ;;  %v2244_v12 = vmul.f32 1.442695, %v2073_v1  ;;  %v2240_v1 = vmul.f32 1.442695, %v2071_v16  ;;  %v5574_v16 = vadd.f32 %v5279_v37, %v1727_v30 }
 0x2cc   :  { %1998 = vmax.xlane.f32.xlu0 %v5530_v49  ;;  %v5538_v17 = vpop.xlane.xlu1 %1940 }
 0x2cd   :  { %6871 = vst [vmem:[#allocation103_spill] sm:$0xff] %v5538_v17  ;;  %v5545_v31 = vpop.xlane.xlu0 %1934  ;;  %v5555_v17 = vpop.eup %3643  ;;  %6881 = vst [vmem:[#allocation109_spill] sm:$0xff] %v5574_v16 }
 0x2ce   :  { %6876 = vst [vmem:[#allocation3_spill] sm:$0xff] %v5555_v17  ;;  %v5557_v32 = vpop.eup %3645 }
 0x2cf   :  { %2000 = vmax.xlane.f32.xlu1 %v5541_v34  ;;  %6877 = vst [vmem:[#allocation105_spill] sm:$0xff] %v5557_v32  ;;  %v5561_v23 = vpop.eup %3647  ;;  %v3535_v34 = vpop.f32.mrf.mxu1 }
 0x2d0   :  { %2490 = vadd.xlane.f32.xlu0 %v5547_v57  ;;  %v5553_v49 = vpop.xlane.xlu1 %1936  ;;  %6878 = vst [vmem:[#allocation106_spill] sm:$0xff] %v5561_v23  ;;  %v5569_v8 = vadd.f32 %v5279_v37, %v3535_v34 }
 0x2d1   :  { %v2427_v13 = vpop.xlane.xlu0 %2426 }
 0x2d2   :  { %3651 = vrcp.f32 %v2427_v13  ;;  %6880 = vst [vmem:[#allocation108_spill] sm:$0xff] %v5569_v8 }
 0x2d3   :  { %2492 = vadd.xlane.f32.xlu1 %v5555_v17  ;;  %3653 = vpow2.f32 %v2244_v12 }
 0x2d4   :  { %2486 = vadd.xlane.f32.xlu0 %v5557_v32  ;;  %v2429_v59 = vpop.xlane.xlu1 %2428  ;;  %3655 = vpow2.f32 %v2238_v3  ;;  %v2076_v3 = vsub.f32 %v6882_v18, %v5291_v26  ;;  %v5591_v18 = vpop.eup %3649 }
 0x2d5   :  { %v2423_v0 = vpop.xlane.xlu0 %2422  ;;  %3657 = vrcp.f32 %v2429_v59  ;;  %v1730_v59 = vpop.f32.mrf.mxu1 }
 0x2d6   :  { %3659 = vrcp.f32 %v2423_v0  ;;  %v5585_v34 = vadd.f32 %v5279_v37, %v1730_v59  ;;  %v2250_v32 = vmul.f32 1.442695, %v2076_v3 }
 0x2d7   :  { %2488 = vadd.xlane.f32.xlu1 %v5561_v23  ;;  %3661 = vpow2.f32 %v2240_v1  ;;  %v6883_v1 = vld [vmem:[#allocation5_spill] sm:$0xff]  ;;  %v3538_v26 = vpop.f32.mrf.mxu1 }
 0x2d8   :  { %2010 = vmax.xlane.f32.xlu0 %v5564_v25  ;;  %v2425_v13 = vpop.xlane.xlu1 %2424  ;;  %v2077_v0 = vsub.f32 %v6883_v1, %v5300_v20  ;;  %6884 = vst [vmem:[#allocation4_spill] sm:$0xff] %v5585_v34  ;;  %v6888_v1 = vld [vmem:[#allocation7_spill] sm:$0xff] }
 0x2d9   :  { %3663 = vrcp.f32 %v2425_v13  ;;  %v5571_v12 = vpop.xlane.xlu0 %1946  ;;  %v6885_v13 = vld [vmem:[#allocation6_spill] sm:$0xff] }
 0x2da   :  { %v2074_v30 = vsub.f32 %v6885_v13, %v5307_v5  ;;  %6887 = vst [vmem:[#allocation6_spill] sm:$0xff] %v5591_v18  ;;  %v2252_v20 = vmul.f32 1.442695, %v2077_v0  ;;  %3665 = vpow2.f32 %v2250_v32 }
 0x2db   :  { %2012 = vmax.xlane.f32.xlu1 %v5569_v8 }
 0x2dc   :  { %2006 = vmax.xlane.f32.xlu0 %v5574_v16  ;;  %v5582_v25 = vpop.xlane.xlu1 %1948  ;;  %v2075_v16 = vsub.f32 %v6888_v1, %v5315_v33  ;;  %v2246_v5 = vmul.f32 1.442695, %v2074_v30 }
 0x2dd   :  { %v5589_v23 = vpop.xlane.xlu0 %1942 }
 0x2de   :  { %6886 = vst [vmem:[#allocation5_spill] sm:$0xff] %v5589_v23  ;;  %v1743_v23 = vpop.f32.mrf.mxu1  ;;  %v2248_v0 = vmul.f32 1.442695, %v2075_v16 }
 0x2df   :  { %2008 = vmax.xlane.f32.xlu1 %v5585_v34  ;;  %v3652_v8 = vpop.eup %3651 }
 0x2e0   :  { %2498 = vadd.xlane.f32.xlu0 %v5591_v18  ;;  %v5597_v59 = vpop.xlane.xlu1 %1944  ;;  %v5599_v17 = vpop.eup %3653  ;;  %v2683_v13 = vmul.f32 %v3652_v8, %v5099_v22 }
 0x2e1   :  { %v2435_v3 = vpop.xlane.xlu0 %2434  ;;  %v5602_v57 = vpop.eup %3655 }
 0x2e2   :  { %6889 = vst [vmem:[#allocation7_spill] sm:$0xff] %v5602_v57  ;;  %v3658_v34 = vpop.eup %3657  ;;  %2932 = vst [vmem:[%s6625_s5 + $0x30] sm:$0xff] %v2683_v13  ;;  %3667 = vrcp.f32 %v2435_v3  ;;  %v5614_v13 = vadd.f32 %v5279_v37, %v3538_v26  ;;  %v3539_v3 = vpop.f32.mrf.mxu1  ;;  %v5634_v26 = vadd.f32 %v5279_v37, %v1743_v23 }
 0x2e3   :  { %2500 = vadd.xlane.f32.xlu1 %v5599_v17  ;;  %v3660_v33 = vpop.eup %3659  ;;  %3669 = vpow2.f32 %v2252_v20  ;;  %v2685_v30 = vmul.f32 %v3658_v34, %v5108_v24  ;;  %v5626_v16 = vadd.f32 %v5279_v37, %v3539_v3 }
 0x2e4   :  { %2494 = vadd.xlane.f32.xlu0 %v5602_v57  ;;  %v2437_v22 = vpop.xlane.xlu1 %2436  ;;  %v5610_v8 = vpop.eup %3661  ;;  %3671 = vpow2.f32 %v2246_v5  ;;  %v2679_v32 = vmul.f32 %v3660_v33, %v5110_v46  ;;  %6892 = vst [vmem:[#allocation112_spill] sm:$0xff] %v5634_v26  ;;  %v6894_v5 = vld [vmem:[#allocation9_spill] sm:$0xff] }
 0x2e5   :  { %6890 = vst [vmem:[#allocation110_spill] sm:$0xff] %v5610_v8  ;;  %v2431_v1 = vpop.xlane.xlu0 %2430  ;;  %2933 = vst [vmem:[%s6625_s5 + $0x38] sm:$0xff] %v2685_v30  ;;  %3673 = vrcp.f32 %v2437_v22  ;;  %v1746_v20 = vpop.f32.mrf.mxu1  ;;  %v2081_v33 = vsub.f32 %v6894_v5, %v5329_v52  ;;  %v6896_v22 = vld [vmem:[#allocation10_spill] sm:$0xff] }
 0x2e6   :  { %v3664_v18 = vpop.eup %3663  ;;  %2930 = vst [vmem:[%s6625_s5 + $0x20] sm:$0xff] %v2679_v32  ;;  %3675 = vrcp.f32 %v2431_v1  ;;  %6891 = vst [vmem:[#allocation111_spill] sm:$0xff] %v5626_v16  ;;  %v5645_v30 = vadd.f32 %v5279_v37, %v1746_v20  ;;  %v2078_v23 = vsub.f32 %v6896_v22, %v5333_v42 }
 0x2e7   :  { %v2681_v24 = vmul.f32 %v3664_v18, %v5118_v56  ;;  %2496 = vadd.xlane.f32.xlu1 %v5610_v8  ;;  %3677 = vpow2.f32 %v2248_v0  ;;  %v6893_v56 = vld [vmem:[#allocation8_spill] sm:$0xff]  ;;  %v5651_v3 = vpop.eup %3665  ;;  %v2260_v52 = vmul.f32 1.442695, %v2081_v33 }
 0x2e8   :  { %2018 = vmax.xlane.f32.xlu0 %v5614_v13  ;;  %v2433_v46 = vpop.xlane.xlu1 %2432  ;;  %v2080_v18 = vsub.f32 %v6893_v56, %v5319_v40  ;;  %6895 = vst [vmem:[#allocation8_spill] sm:$0xff] %v5645_v30  ;;  %v3542_v40 = vpop.f32.mrf.mxu1  ;;  %6897 = vst [vmem:[#allocation9_spill] sm:$0xff] %v5651_v3  ;;  %v2254_v42 = vmul.f32 1.442695, %v2078_v23 }
 0x2e9   :  { %2931 = vst [vmem:[%s6625_s5 + $0x28] sm:$0xff] %v2681_v24  ;;  %3679 = vrcp.f32 %v2433_v46  ;;  %v5631_v34 = vpop.xlane.xlu0 %1954  ;;  %v6898_v46 = vld [vmem:[#allocation11_spill] sm:$0xff] }
 0x2ea   :  { %v2258_v1 = vmul.f32 1.442695, %v2080_v18  ;;  %v2079_v56 = vsub.f32 %v6898_v46, %v5342_v54 }
 0x2eb   :  { %2020 = vmax.xlane.f32.xlu1 %v5626_v16 }
 0x2ec   :  { %2014 = vmax.xlane.f32.xlu0 %v5634_v26  ;;  %v5642_v0 = vpop.xlane.xlu1 %1956  ;;  %3681 = vpow2.f32 %v2258_v1  ;;  %v1759_v26 = vpop.f32.mrf.mxu1  ;;  %v2256_v23 = vmul.f32 1.442695, %v2079_v56 }
 0x2ed   :  { %v5649_v32 = vpop.xlane.xlu0 %1950 }
 0x2ef   :  { %2016 = vmax.xlane.f32.xlu1 %v5645_v30  ;;  %v3668_v24 = vpop.eup %3667  ;;  %v6900_v30 = vld [vmem:[#allocation12_spill] sm:$0xff] }
 0x2f0   :  { %2506 = vadd.xlane.f32.xlu0 %v5651_v3  ;;  %v5657_v20 = vpop.xlane.xlu1 %1952  ;;  %v5659_v5 = vpop.eup %3669  ;;  %v2691_v22 = vmul.f32 %v3668_v24, %v5150_v53  ;;  %v2084_v33 = vsub.f32 %v6900_v30, %v5347_v55  ;;  %v6901_v53 = vld [vmem:[#allocation48_spill] sm:$0xff]  ;;  %v6902_v55 = vld [vmem:[#allocation13_spill] sm:$0xff] }
 0x2f1   :  { %6899 = vst [vmem:[#allocation10_spill] sm:$0xff] %v5659_v5  ;;  %v2443_v18 = vpop.xlane.xlu0 %2442  ;;  %v5662_v8 = vpop.eup %3671  ;;  %v2085_v30 = vsub.f32 %v6902_v55, %v5356_v10  ;;  %v6903_v3 = vld [vmem:[#allocation49_spill] sm:$0xff]  ;;  %v6905_v10 = vld [vmem:[#allocation50_spill] sm:$0xff]  ;;  %v6907_v55 = vld [vmem:[#allocation16_spill] sm:$0xff] }
 0x2f2   :  { %v3674_v16 = vpop.eup %3673  ;;  %2936 = vst [vmem:[%s6625_s5 + $0x50] sm:$0xff] %v2691_v22  ;;  %3683 = vrcp.f32 %v2443_v18  ;;  %v2266_v56 = vmul.f32 1.442695, %v2084_v33  ;;  %v6906_v33 = vld [vmem:[#allocation15_spill] sm:$0xff] }
 0x2f3   :  { %2508 = vadd.xlane.f32.xlu1 %v5659_v5  ;;  %v3676_v54 = vpop.eup %3675  ;;  %3685 = vpow2.f32 %v2260_v52  ;;  %v2693_v24 = vmul.f32 %v3674_v16, %v6901_v53  ;;  %v5678_v5 = vadd.f32 %v5279_v37, %v3542_v40  ;;  %v3543_v52 = vpop.f32.mrf.mxu1  ;;  %v6904_v16 = vld [vmem:[#allocation14_spill] sm:$0xff] }
 0x2f4   :  { %2502 = vadd.xlane.f32.xlu0 %v5662_v8  ;;  %v2445_v1 = vpop.xlane.xlu1 %2444  ;;  %v5672_v46 = vpop.eup %3677  ;;  %3687 = vpow2.f32 %v2254_v42  ;;  %v2687_v57 = vmul.f32 %v3676_v54, %v6903_v3  ;;  %v2082_v53 = vsub.f32 %v6904_v16, %v5363_v43  ;;  %v5692_v43 = vadd.f32 %v5279_v37, %v3543_v52 }
 0x2f5   :  { %v2439_v22 = vpop.xlane.xlu0 %2438  ;;  %2937 = vst [vmem:[%s6625_s5 + $0x58] sm:$0xff] %v2693_v24  ;;  %3689 = vrcp.f32 %v2445_v1  ;;  %v2268_v42 = vmul.f32 1.442695, %v2085_v30  ;;  %v2083_v54 = vsub.f32 %v6906_v33, %v5369_v38  ;;  %v5702_v24 = vadd.f32 %v5279_v37, %v1759_v26  ;;  %v6908_v38 = vld [vmem:[#allocation17_spill] sm:$0xff] }
 0x2f6   :  { %v3680_v18 = vpop.eup %3679  ;;  %2934 = vst [vmem:[%s6625_s5 + $0x40] sm:$0xff] %v2687_v57  ;;  %3691 = vrcp.f32 %v2439_v22  ;;  %v2262_v1 = vmul.f32 1.442695, %v2082_v53  ;;  %v2088_v22 = vsub.f32 %v6907_v55, %v5371_v19  ;;  %v2089_v30 = vsub.f32 %v6908_v38, %v5381_v27 }
 0x2f7   :  { %v2689_v3 = vmul.f32 %v3680_v18, %v6905_v10  ;;  %2504 = vadd.xlane.f32.xlu1 %v5672_v46  ;;  %3693 = vpow2.f32 %v2256_v23  ;;  %v1762_v23 = vpop.f32.mrf.mxu1  ;;  %v2264_v26 = vmul.f32 1.442695, %v2083_v54  ;;  %v6913_v54 = vld [vmem:[#allocation55_spill] sm:$0xff] }
 0x2f8   :  { %2026 = vmax.xlane.f32.xlu0 %v5678_v5  ;;  %v2441_v40 = vpop.xlane.xlu1 %2440  ;;  %v5713_v52 = vadd.f32 %v5279_v37, %v1762_v23  ;;  %v2274_v19 = vmul.f32 1.442695, %v2088_v22  ;;  %v6914_v22 = vld [vmem:[#allocation20_spill] sm:$0xff] }
 0x2f9   :  { %2935 = vst [vmem:[%s6625_s5 + $0x48] sm:$0xff] %v2689_v3  ;;  %3695 = vrcp.f32 %v2441_v40  ;;  %v5699_v57 = vpop.xlane.xlu0 %1962  ;;  %v5719_v10 = vpop.eup %3681  ;;  %v2276_v3 = vmul.f32 1.442695, %v2089_v30  ;;  %v6911_v40 = vld [vmem:[#allocation19_spill] sm:$0xff]  ;;  %v2092_v38 = vsub.f32 %v6914_v22, %v5399_v63  ;;  %v6916_v63 = vld [vmem:[#allocation21_spill] sm:$0xff] }
 0x2fa   :  { %3697 = vpow2.f32 %v2266_v56  ;;  %v6909_v56 = vld [vmem:[#allocation18_spill] sm:$0xff]  ;;  %6910 = vst [vmem:[#allocation11_spill] sm:$0xff] %v5719_v10  ;;  %v2087_v33 = vsub.f32 %v6911_v40, %v5395_v45  ;;  %v2093_v40 = vsub.f32 %v6916_v63, %v5408_v48 }
 0x2fb   :  { %2028 = vmax.xlane.f32.xlu1 %v5692_v43  ;;  %3699 = vpow2.f32 %v2268_v42  ;;  %v2086_v16 = vsub.f32 %v6909_v56, %v5385_v35  ;;  %v6915_v56 = vld [vmem:[#allocation56_spill] sm:$0xff]  ;;  %v6919_v48 = vld [vmem:[#allocation58_spill] sm:$0xff] }
 0x2fc   :  { %2022 = vmax.xlane.f32.xlu0 %v5702_v24  ;;  %v5710_v18 = vpop.xlane.xlu1 %1964  ;;  %3701 = vpow2.f32 %v2262_v1 }
 0x2fd   :  { %v5717_v53 = vpop.xlane.xlu0 %1958  ;;  %3703 = vpow2.f32 %v2264_v26  ;;  %v2270_v35 = vmul.f32 1.442695, %v2086_v16  ;;  %v2272_v26 = vmul.f32 1.442695, %v2087_v33 }
 0x2fe   :  { %3705 = vpow2.f32 %v2274_v19 }
 0x2ff   :  { %2024 = vmax.xlane.f32.xlu1 %v5713_v52  ;;  %v3684_v27 = vpop.eup %3683 }
 0x300   :  { %2514 = vadd.xlane.f32.xlu0 %v5719_v10  ;;  %v5725_v37 = vpop.xlane.xlu1 %1960  ;;  %v5727_v42 = vpop.eup %3685  ;;  %v2699_v23 = vmul.f32 %v3684_v27, %v6913_v54  ;;  %v6917_v54 = vld [vmem:[#allocation57_spill] sm:$0xff]  ;;  %v2282_v10 = vmul.f32 1.442695, %v2092_v38  ;;  %v6920_v38 = vld [vmem:[#allocation23_spill] sm:$0xff] }
 0x301   :  { %6912 = vst [vmem:[#allocation12_spill] sm:$0xff] %v5727_v42  ;;  %v2451_v1 = vpop.xlane.xlu0 %2450  ;;  %v5730_v55 = vpop.eup %3687 }
 0x302   :  { %v3690_v30 = vpop.eup %3689  ;;  %2940 = vst [vmem:[%s6625_s5 + $0x70] sm:$0xff] %v2699_v23  ;;  %3707 = vrcp.f32 %v2451_v1 }
 0x303   :  { %2516 = vadd.xlane.f32.xlu1 %v5727_v42  ;;  %v3692_v45 = vpop.eup %3691  ;;  %3709 = vpow2.f32 %v2276_v3  ;;  %v2701_v16 = vmul.f32 %v3690_v30, %v6915_v56  ;;  %v6918_v42 = vld [vmem:[#allocation22_spill] sm:$0xff]  ;;  %v2091_v30 = vsub.f32 %v6920_v38, %v5419_v60  ;;  %v6923_v60 = vld [vmem:[#allocation25_spill] sm:$0xff] }
 0x304   :  { %2510 = vadd.xlane.f32.xlu0 %v5730_v55  ;;  %v2453_v27 = vpop.xlane.xlu1 %2452  ;;  %v5740_v19 = vpop.eup %3693  ;;  %3711 = vpow2.f32 %v2270_v35  ;;  %v2695_v22 = vmul.f32 %v3692_v45, %v6917_v54  ;;  %v2090_v3 = vsub.f32 %v6918_v42, %v5413_v44  ;;  %v2284_v42 = vmul.f32 1.442695, %v2093_v40 }
 0x305   :  { %v2447_v23 = vpop.xlane.xlu0 %2446  ;;  %2941 = vst [vmem:[%s6625_s5 + $0x78] sm:$0xff] %v2701_v16  ;;  %3713 = vrcp.f32 %v2453_v27  ;;  %v2097_v40 = vsub.f32 %v6923_v60, %v5432_v36 }
 0x306   :  { %v3696_v1 = vpop.eup %3695  ;;  %2938 = vst [vmem:[%s6625_s5 + $0x60] sm:$0xff] %v2695_v22  ;;  %3715 = vrcp.f32 %v2447_v23  ;;  %v2278_v16 = vmul.f32 1.442695, %v2090_v3  ;;  %v2280_v22 = vmul.f32 1.442695, %v2091_v30  ;;  %v6924_v23 = vld [vmem:[#allocation26_spill] sm:$0xff] }
 0x307   :  { %v5750_v33 = vpop.eup %3697  ;;  %v2697_v35 = vmul.f32 %v3696_v1, %v6919_v48  ;;  %2512 = vadd.xlane.f32.xlu1 %v5740_v19  ;;  %3717 = vpow2.f32 %v2272_v26  ;;  %v6921_v26 = vld [vmem:[#allocation24_spill] sm:$0xff] }
 0x308   :  { %2522 = vadd.xlane.f32.xlu0 %v5750_v33  ;;  %v2449_v44 = vpop.xlane.xlu1 %2448  ;;  %v5765_v56 = vpop.eup %3699  ;;  %v2096_v27 = vsub.f32 %v6921_v26, %v5421_v47  ;;  %v6929_v26 = vld [vmem:[#allocation63_spill] sm:$0xff] }
 0x309   :  { %2939 = vst [vmem:[%s6625_s5 + $0x68] sm:$0xff] %v2697_v35  ;;  %3719 = vrcp.f32 %v2449_v44  ;;  %v5763_v45 = vpop.xlane.xlu0 %1970  ;;  %v5769_v63 = vpop.eup %3701  ;;  %v2292_v35 = vmul.f32 1.442695, %v2097_v40  ;;  %v6927_v44 = vld [vmem:[#allocation27_spill] sm:$0xff] }
 0x30a   :  { %3721 = vpow2.f32 %v2282_v10  ;;  %6922 = vst [vmem:[#allocation48_spill] sm:$0xff] %v5769_v63  ;;  %v2094_v10 = vsub.f32 %v6924_v23, %v5439_v29  ;;  %v5781_v3 = vpop.eup %3703  ;;  %v2290_v47 = vmul.f32 1.442695, %v2096_v27  ;;  %v2095_v38 = vsub.f32 %v6927_v44, %v5447_v7  ;;  %v6930_v23 = vld [vmem:[#allocation28_spill] sm:$0xff] }
 0x30b   :  { %2524 = vadd.xlane.f32.xlu1 %v5765_v56  ;;  %3723 = vpow2.f32 %v2284_v42  ;;  %6925 = vst [vmem:[#allocation13_spill] sm:$0xff] %v5781_v3  ;;  %v5783_v48 = vpop.eup %3705  ;;  %v2100_v40 = vsub.f32 %v6930_v23, %v5451_v61  ;;  %v6932_v61 = vld [vmem:[#allocation29_spill] sm:$0xff] }
 0x30c   :  { %2518 = vadd.xlane.f32.xlu0 %v5769_v63  ;;  %v5775_v54 = vpop.xlane.xlu1 %1972  ;;  %3725 = vpow2.f32 %v2278_v16  ;;  %6926 = vst [vmem:[#allocation49_spill] sm:$0xff] %v5783_v48  ;;  %v2286_v30 = vmul.f32 1.442695, %v2094_v10  ;;  %v6931_v10 = vld [vmem:[#allocation64_spill] sm:$0xff]  ;;  %v6933_v23 = vld [vmem:[#allocation65_spill] sm:$0xff] }
 0x30d   :  { %v5779_v1 = vpop.xlane.xlu0 %1966  ;;  %3727 = vpow2.f32 %v2280_v22  ;;  %v2288_v22 = vmul.f32 1.442695, %v2095_v38  ;;  %v2298_v63 = vmul.f32 1.442695, %v2100_v40 }
 0x30e   :  { %3729 = vpow2.f32 %v2290_v47 }
 0x30f   :  { %2520 = vadd.xlane.f32.xlu1 %v5781_v3  ;;  %v3708_v36 = vpop.eup %3707 }
 0x310   :  { %2530 = vadd.xlane.f32.xlu0 %v5783_v48  ;;  %v5789_v42 = vpop.xlane.xlu1 %1968  ;;  %v5791_v29 = vpop.eup %3709  ;;  %v2707_v16 = vmul.f32 %v3708_v36, %v6929_v26  ;;  %v2101_v26 = vsub.f32 %v6932_v61, %v5459_v4  ;;  %v6935_v4 = vld [vmem:[#allocation66_spill] sm:$0xff] }
 0x311   :  { %6928 = vst [vmem:[#allocation14_spill] sm:$0xff] %v5791_v29  ;;  %v2459_v27 = vpop.xlane.xlu0 %2458  ;;  %v5794_v60 = vpop.eup %3711 }
 0x312   :  { %v3714_v3 = vpop.eup %3713  ;;  %2944 = vst [vmem:[%s6625_s5 + $0x90] sm:$0xff] %v2707_v16  ;;  %3731 = vrcp.f32 %v2459_v27  ;;  %v2300_v40 = vmul.f32 1.442695, %v2101_v26 }
 0x313   :  { %2532 = vadd.xlane.f32.xlu1 %v5791_v29  ;;  %v3716_v7 = vpop.eup %3715  ;;  %3733 = vpow2.f32 %v2292_v35  ;;  %v2709_v36 = vmul.f32 %v3714_v3, %v6931_v10  ;;  %v6934_v29 = vld [vmem:[#allocation30_spill] sm:$0xff] }
 0x314   :  { %2526 = vadd.xlane.f32.xlu0 %v5794_v60  ;;  %v2461_v44 = vpop.xlane.xlu1 %2460  ;;  %v5804_v47 = vpop.eup %3717  ;;  %3735 = vpow2.f32 %v2286_v30  ;;  %v2703_v48 = vmul.f32 %v3716_v7, %v6933_v23  ;;  %v2098_v35 = vsub.f32 %v6934_v29, %v5461_v21  ;;  %v6936_v30 = vld [vmem:[#allocation31_spill] sm:$0xff]  ;;  %v6937_v7 = vld [vmem:[#allocation32_spill] sm:$0xff] }
 0x315   :  { %v2455_v16 = vpop.xlane.xlu0 %2454  ;;  %2945 = vst [vmem:[%s6625_s5 + $0x98] sm:$0xff] %v2709_v36  ;;  %3737 = vrcp.f32 %v2461_v44  ;;  %v2099_v21 = vsub.f32 %v6936_v30, %v5470_v50  ;;  %v2104_v10 = vsub.f32 %v6937_v7, %v5475_v51  ;;  %v6938_v50 = vld [vmem:[#allocation33_spill] sm:$0xff]  ;;  %v6939_v51 = vld [vmem:[#allocation34_spill] sm:$0xff] }
 0x316   :  { %v3720_v27 = vpop.eup %3719  ;;  %2942 = vst [vmem:[%s6625_s5 + $0x80] sm:$0xff] %v2703_v48  ;;  %3739 = vrcp.f32 %v2455_v16  ;;  %v2105_v44 = vsub.f32 %v6938_v50, %v5484_v14  ;;  %v2102_v23 = vsub.f32 %v6939_v51, %v5491_v9 }
 0x317   :  { %v5814_v3 = vpop.eup %3721  ;;  %v2705_v38 = vmul.f32 %v3720_v27, %v6935_v4  ;;  %2528 = vadd.xlane.f32.xlu1 %v5804_v47  ;;  %3741 = vpow2.f32 %v2288_v22  ;;  %v2294_v22 = vmul.f32 1.442695, %v2098_v35  ;;  %v2296_v26 = vmul.f32 1.442695, %v2099_v21 }
 0x318   :  { %2538 = vadd.xlane.f32.xlu0 %v5814_v3  ;;  %v2457_v29 = vpop.xlane.xlu1 %2456  ;;  %v5831_v36 = vpop.eup %3723  ;;  %v2306_v27 = vmul.f32 1.442695, %v2104_v10  ;;  %v2302_v21 = vmul.f32 1.442695, %v2102_v23  ;;  %v6943_v23 = vld [vmem:[#allocation37_spill] sm:$0xff] }
 0x319   :  { %2943 = vst [vmem:[%s6625_s5 + $0x88] sm:$0xff] %v2705_v38  ;;  %3743 = vrcp.f32 %v2457_v29  ;;  %v5829_v48 = vpop.xlane.xlu0 %1978  ;;  %v5835_v61 = vpop.eup %3725  ;;  %v2308_v38 = vmul.f32 1.442695, %v2105_v44  ;;  %v6941_v29 = vld [vmem:[#allocation36_spill] sm:$0xff] }
 0x31a   :  { %3745 = vpow2.f32 %v2298_v63  ;;  %v6940_v63 = vld [vmem:[#allocation35_spill] sm:$0xff]  ;;  %v5847_v14 = vpop.eup %3727 }
 0x31b   :  { %2540 = vadd.xlane.f32.xlu1 %v5831_v36  ;;  %3747 = vpow2.f32 %v2300_v40  ;;  %v2103_v35 = vsub.f32 %v6940_v63, %v5499_v15  ;;  %v5849_v30 = vpop.eup %3729  ;;  %v2108_v40 = vsub.f32 %v6941_v29, %v5503_v11 }
 0x31c   :  { %2534 = vadd.xlane.f32.xlu0 %v5835_v61  ;;  %v5841_v16 = vpop.xlane.xlu1 %1980  ;;  %3749 = vpow2.f32 %v2294_v22 }
 0x31d   :  { %v5845_v4 = vpop.xlane.xlu0 %1974  ;;  %3751 = vpow2.f32 %v2296_v26  ;;  %v2304_v10 = vmul.f32 1.442695, %v2103_v35  ;;  %v2314_v26 = vmul.f32 1.442695, %v2108_v40  ;;  %v6946_v40 = vld [vmem:[#allocation39_spill] sm:$0xff] }
 0x31e   :  { %3753 = vpow2.f32 %v2306_v27  ;;  %v2109_v27 = vsub.f32 %v6943_v23, %v5511_v39  ;;  %v6948_v23 = vld [vmem:[#allocation40_spill] sm:$0xff] }
 0x31f   :  { %2536 = vadd.xlane.f32.xlu1 %v5847_v14  ;;  %v3732_v9 = vpop.eup %3731  ;;  %3755 = vpow2.f32 %v2308_v38  ;;  %v6944_v38 = vld [vmem:[#allocation71_spill] sm:$0xff] }
 0x320   :  { %2546 = vadd.xlane.f32.xlu0 %v5849_v30  ;;  %v5855_v7 = vpop.xlane.xlu1 %1976  ;;  %v5857_v15 = vpop.eup %3733  ;;  %v2715_v22 = vmul.f32 %v3732_v9, %v5311_v58 }
 0x321   :  { %6942 = vst [vmem:[#allocation50_spill] sm:$0xff] %v5857_v15  ;;  %v2467_v50 = vpop.xlane.xlu0 %2466  ;;  %v5860_v44 = vpop.eup %3735 }
 0x322   :  { %v3738_v51 = vpop.eup %3737  ;;  %2948 = vst [vmem:[%s6625_s5 + $0xb0] sm:$0xff] %v2715_v22  ;;  %3757 = vrcp.f32 %v2467_v50  ;;  %v6945_v50 = vld [vmem:[#allocation38_spill] sm:$0xff] }
 0x323   :  { %2548 = vadd.xlane.f32.xlu1 %v5857_v15  ;;  %v3740_v11 = vpop.eup %3739  ;;  %3759 = vpow2.f32 %v2302_v21  ;;  %v2717_v58 = vmul.f32 %v3738_v51, %v5321_v41  ;;  %v2106_v15 = vsub.f32 %v6945_v50, %v5513_v2  ;;  %v2316_v21 = vmul.f32 1.442695, %v2109_v27  ;;  %v6950_v27 = vld [vmem:[#allocation103_spill] sm:$0xff] }
 0x324   :  { %2542 = vadd.xlane.f32.xlu0 %v5860_v44  ;;  %v2469_v63 = vpop.xlane.xlu1 %2468  ;;  %v5870_v35 = vpop.eup %3741  ;;  %3761 = vpow2.f32 %v2304_v10  ;;  %v2711_v9 = vmul.f32 %v3740_v11, %v6944_v38  ;;  %v2107_v10 = vsub.f32 %v6946_v40, %v5522_v6  ;;  %v6951_v6 = vld [vmem:[#allocation41_spill] sm:$0xff] }
 0x325   :  { %v2419_v29 = vpop.xlane.xlu0 %2418  ;;  %2949 = vst [vmem:[%s6625_s5 + $0xb8] sm:$0xff] %v2717_v58  ;;  %3763 = vrcp.f32 %v2469_v63  ;;  %v2112_v58 = vsub.f32 %v6948_v23, %v5527_v62  ;;  %v2113_v63 = vsub.f32 %v6951_v6, %v6950_v27  ;;  %v6956_v23 = vld [vmem:[#allocation43_spill] sm:$0xff]  ;;  %v6957_v6 = vld [vmem:[#allocation76_spill] sm:$0xff] }
 0x326   :  { %v3744_v22 = vpop.eup %3743  ;;  %2946 = vst [vmem:[%s6625_s5 + $0xa0] sm:$0xff] %v2711_v9  ;;  %3765 = vrcp.f32 %v2419_v29  ;;  %v2312_v29 = vmul.f32 1.442695, %v2107_v10  ;;  %v2111_v27 = vsub.f32 %v6956_v23, %v5553_v49  ;;  %v6959_v49 = vld [vmem:[#allocation45_spill] sm:$0xff] }
 0x327   :  { %v5878_v39 = vpop.eup %3745  ;;  %v2713_v41 = vmul.f32 %v3744_v22, %v5335_v28  ;;  %2544 = vadd.xlane.f32.xlu1 %v5870_v35  ;;  %3767 = vpow2.f32 %v2314_v26  ;;  %v2310_v28 = vmul.f32 1.442695, %v2106_v15  ;;  %v6953_v15 = vld [vmem:[#allocation42_spill] sm:$0xff]  ;;  %v2324_v40 = vmul.f32 1.442695, %v2113_v63 }
 0x328   :  { %2554 = vadd.xlane.f32.xlu0 %v5878_v39  ;;  %v2421_v2 = vpop.xlane.xlu1 %2420  ;;  %v5891_v11 = vpop.eup %3747  ;;  %v2110_v22 = vsub.f32 %v6953_v15, %v5545_v31  ;;  %v6958_v15 = vld [vmem:[#allocation44_spill] sm:$0xff] }
 0x329   :  { %2947 = vst [vmem:[%s6625_s5 + $0xa8] sm:$0xff] %v2713_v41  ;;  %3769 = vrcp.f32 %v2421_v2  ;;  %v2463_v51 = vpop.xlane.xlu0 %2462  ;;  %6947 = vst [vmem:[#allocation15_spill] sm:$0xff] %v5891_v11  ;;  %v5895_v26 = vpop.eup %3749  ;;  %v2322_v41 = vmul.f32 1.442695, %v2112_v58  ;;  %v2116_v63 = vsub.f32 %v6958_v15, %v5571_v12  ;;  %v2320_v12 = vmul.f32 1.442695, %v2111_v27 }
 0x32a   :  { %3771 = vrcp.f32 %v2463_v51  ;;  %6949 = vst [vmem:[#allocation16_spill] sm:$0xff] %v5895_v26  ;;  %v5901_v9 = vpop.eup %3751  ;;  %v2318_v31 = vmul.f32 1.442695, %v2110_v22  ;;  %v2117_v22 = vsub.f32 %v6959_v49, %v5582_v25  ;;  %v6961_v15 = vld [vmem:[#allocation5_spill] sm:$0xff]  ;;  %v6965_v27 = vld [vmem:[#allocation47_spill] sm:$0xff]  ;;  %v6966_v49 = vld [vmem:[#allocation80_spill] sm:$0xff] }
 0x32b   :  { %2556 = vadd.xlane.f32.xlu1 %v5891_v11  ;;  %3773 = vpow2.f32 %v2316_v21  ;;  %6952 = vst [vmem:[#allocation17_spill] sm:$0xff] %v5901_v9  ;;  %v5907_v50 = vpop.eup %3753  ;;  %v2330_v11 = vmul.f32 1.442695, %v2116_v63 }
 0x32c   :  { %2550 = vadd.xlane.f32.xlu0 %v5895_v26  ;;  %v2465_v38 = vpop.xlane.xlu1 %2464  ;;  %6954 = vst [vmem:[#allocation18_spill] sm:$0xff] %v5907_v50  ;;  %v5909_v21 = vpop.eup %3755 }
 0x32d   :  { %3775 = vrcp.f32 %v2465_v38  ;;  %v5905_v62 = vpop.xlane.xlu0 %1986  ;;  %6955 = vst [vmem:[#allocation19_spill] sm:$0xff] %v5909_v21 }
 0x32e   :  { %3777 = vpow2.f32 %v2310_v28 }
 0x32f   :  { %2552 = vadd.xlane.f32.xlu1 %v5901_v9  ;;  %v3758_v2 = vpop.eup %3757  ;;  %3779 = vpow2.f32 %v2312_v29 }
 0x330   :  { %2562 = vadd.xlane.f32.xlu0 %v5907_v50  ;;  %v5913_v51 = vpop.xlane.xlu1 %1988  ;;  %v5915_v10 = vpop.eup %3759  ;;  %v2723_v28 = vmul.f32 %v3758_v2, %v6957_v6  ;;  %3781 = vpow2.f32 %v2322_v41  ;;  %v6960_v2 = vld [vmem:[#allocation77_spill] sm:$0xff]  ;;  %v6962_v50 = vld [vmem:[#allocation46_spill] sm:$0xff] }
 0x331   :  { %v2415_v58 = vpop.xlane.xlu0 %2414  ;;  %v5920_v38 = vpop.eup %3761 }
 0x332   :  { %v3764_v9 = vpop.eup %3763  ;;  %2952 = vst [vmem:[%s6625_s5 + $0xd0] sm:$0xff] %v2723_v28  ;;  %3783 = vrcp.f32 %v2415_v58  ;;  %v2114_v28 = vsub.f32 %v6962_v50, %v6961_v15  ;;  %v6963_v58 = vld [vmem:[#allocation78_spill] sm:$0xff]  ;;  %v2332_v50 = vmul.f32 1.442695, %v2117_v22  ;;  %v6967_v22 = vld [vmem:[#allocation51_spill] sm:$0xff] }
 0x333   :  { %2564 = vadd.xlane.f32.xlu1 %v5909_v21  ;;  %v3766_v29 = vpop.eup %3765  ;;  %3785 = vpow2.f32 %v2324_v40  ;;  %v2725_v23 = vmul.f32 %v3764_v9, %v6960_v2  ;;  %v6964_v9 = vld [vmem:[#allocation79_spill] sm:$0xff] }
 0x334   :  { %2558 = vadd.xlane.f32.xlu0 %v5915_v10  ;;  %v2417_v41 = vpop.xlane.xlu1 %2416  ;;  %v5932_v6 = vpop.eup %3767  ;;  %3787 = vpow2.f32 %v2318_v31  ;;  %v2675_v26 = vmul.f32 %v3766_v29, %v6963_v58  ;;  %v2115_v29 = vsub.f32 %v6965_v27, %v5597_v59  ;;  %v2120_v59 = vsub.f32 %v6967_v22, %v5631_v34 }
 0x335   :  { %v5937_v21 = vpop.xlane.xlu0 %1982  ;;  %2953 = vst [vmem:[%s6625_s5 + $0xd8] sm:$0xff] %v2725_v23  ;;  %3789 = vrcp.f32 %v2417_v41  ;;  %v2326_v41 = vmul.f32 1.442695, %v2114_v28 }
 0x336   :  { %v3770_v40 = vpop.eup %3769  ;;  %2928 = vst [vmem:[%s6625_s5 + $0x10] sm:$0xff] %v2675_v26  ;;  %3791 = vpow2.f32 %v2320_v12  ;;  %v2328_v12 = vmul.f32 1.442695, %v2115_v29  ;;  %v2338_v27 = vmul.f32 1.442695, %v2120_v59  ;;  %v6973_v59 = vld [vmem:[#allocation84_spill] sm:$0xff] }
 0x337   :  { %v3772_v25 = vpop.eup %3771  ;;  %v2677_v31 = vmul.f32 %v3770_v40, %v6964_v9  ;;  %2560 = vadd.xlane.f32.xlu1 %v5920_v38  ;;  %3793 = vpow2.f32 %v2330_v11  ;;  %v6968_v40 = vld [vmem:[#allocation81_spill] sm:$0xff]  ;;  %v6969_v11 = vld [vmem:[#allocation52_spill] sm:$0xff] }
 0x338   :  { %v2719_v63 = vmul.f32 %v3772_v25, %v6966_v49  ;;  %2570 = vadd.xlane.f32.xlu0 %v5932_v6  ;;  %v5951_v2 = vpop.xlane.xlu1 %1984  ;;  %v5953_v23 = vpop.eup %3773  ;;  %v2121_v34 = vsub.f32 %v6969_v11, %v5642_v0  ;;  %v6970_v49 = vld [vmem:[#allocation53_spill] sm:$0xff] }
 0x339   :  { %2929 = vst [vmem:[%s6625_s5 + $0x18] sm:$0xff] %v2677_v31  ;;  %v2475_v26 = vpop.xlane.xlu0 %2474 }
 0x33a   :  { %v3776_v15 = vpop.eup %3775  ;;  %2950 = vst [vmem:[%s6625_s5 + $0xc0] sm:$0xff] %v2719_v63  ;;  %3795 = vrcp.f32 %v2475_v26  ;;  %v2118_v63 = vsub.f32 %v6970_v49, %v5649_v32  ;;  %v2340_v26 = vmul.f32 1.442695, %v2121_v34  ;;  %v6977_v49 = vld [vmem:[#allocation85_spill] sm:$0xff] }
 0x33b   :  { %v5963_v58 = vpop.eup %3777  ;;  %v2721_v25 = vmul.f32 %v3776_v15, %v6968_v40  ;;  %2572 = vadd.xlane.f32.xlu1 %v5953_v23  ;;  %3797 = vpow2.f32 %v2332_v50  ;;  %v6972_v15 = vld [vmem:[#allocation54_spill] sm:$0xff] }
 0x33c   :  { %2566 = vadd.xlane.f32.xlu0 %v5963_v58  ;;  %v2477_v28 = vpop.xlane.xlu1 %2476  ;;  %3799 = vpow2.f32 %v2326_v41  ;;  %v5973_v31 = vpop.eup %3779  ;;  %v2119_v22 = vsub.f32 %v6972_v15, %v5657_v20  ;;  %v6976_v20 = vld [vmem:[#allocation60_spill] sm:$0xff] }
 0x33d   :  { %2951 = vst [vmem:[%s6625_s5 + $0xc8] sm:$0xff] %v2721_v25  ;;  %v2471_v9 = vpop.xlane.xlu0 %2470  ;;  %3801 = vrcp.f32 %v2477_v28  ;;  %v5977_v50 = vpop.eup %3781  ;;  %v2334_v28 = vmul.f32 1.442695, %v2118_v63  ;;  %v2125_v34 = vsub.f32 %v6976_v20, %v5710_v18 }
 0x33e   :  { %3803 = vrcp.f32 %v2471_v9 }
 0x33f   :  { %2568 = vadd.xlane.f32.xlu1 %v5973_v31  ;;  %v3784_v29 = vpop.eup %3783  ;;  %3805 = vpow2.f32 %v2328_v12  ;;  %v6975_v12 = vld [vmem:[#allocation59_spill] sm:$0xff] }
 0x340   :  { %2578 = vadd.xlane.f32.xlu0 %v5977_v50  ;;  %v2473_v0 = vpop.xlane.xlu1 %2472  ;;  %v5981_v41 = vpop.eup %3785  ;;  %v2671_v40 = vmul.f32 %v3784_v29, %v6973_v59  ;;  %v2124_v11 = vsub.f32 %v6975_v12, %v5699_v57  ;;  %v6978_v57 = vld [vmem:[#allocation61_spill] sm:$0xff] }
 0x341   :  { %6971 = vst [vmem:[#allocation55_spill] sm:$0xff] %v5981_v41  ;;  %3807 = vrcp.f32 %v2473_v0  ;;  %v5986_v32 = vpop.xlane.xlu0 %1994  ;;  %v5988_v25 = vpop.eup %3787  ;;  %v2122_v63 = vsub.f32 %v6978_v57, %v5717_v53 }
 0x342   :  { %6974 = vst [vmem:[#allocation20_spill] sm:$0xff] %v5988_v25  ;;  %3809 = vpow2.f32 %v2338_v27  ;;  %v3790_v9 = vpop.eup %3789  ;;  %2926 = vst [vmem:[%s6625_s5] sm:$0xff] %v2671_v40  ;;  %v2336_v27 = vmul.f32 1.442695, %v2119_v22  ;;  %v2346_v40 = vmul.f32 1.442695, %v2124_v11  ;;  %v6981_v22 = vld [vmem:[#allocation62_spill] sm:$0xff] }
 0x343   :  { %2580 = vadd.xlane.f32.xlu1 %v5981_v41  ;;  %v2673_v29 = vmul.f32 %v3790_v9, %v6977_v49  ;;  %3811 = vpow2.f32 %v2340_v26  ;;  %v6006_v59 = vpop.eup %3791  ;;  %v2348_v26 = vmul.f32 1.442695, %v2125_v34  ;;  %v2123_v9 = vsub.f32 %v6981_v22, %v5725_v37  ;;  %v6983_v11 = vld [vmem:[#allocation88_spill] sm:$0xff] }
 0x344   :  { %2574 = vadd.xlane.f32.xlu0 %v5988_v25  ;;  %v6000_v0 = vpop.xlane.xlu1 %1996  ;;  %6979 = vst [vmem:[#allocation56_spill] sm:$0xff] %v6006_v59  ;;  %3813 = vpow2.f32 %v2334_v28  ;;  %v6011_v18 = vpop.eup %3793  ;;  %v2342_v28 = vmul.f32 1.442695, %v2122_v63  ;;  %v6985_v63 = vld [vmem:[#allocation89_spill] sm:$0xff] }
 0x345   :  { %v6004_v15 = vpop.xlane.xlu0 %1990  ;;  %2927 = vst [vmem:[%s6625_s5 + $0x8] sm:$0xff] %v2673_v29  ;;  %6980 = vst [vmem:[#allocation21_spill] sm:$0xff] %v6011_v18  ;;  %3815 = vpow2.f32 %v2336_v27  ;;  %v2344_v27 = vmul.f32 1.442695, %v2123_v9 }
 0x346   :  { %3817 = vpow2.f32 %v2346_v40 }
 0x347   :  { %2576 = vadd.xlane.f32.xlu1 %v6006_v59  ;;  %v3796_v12 = vpop.eup %3795  ;;  %v6984_v59 = vld [vmem:[#allocation67_spill] sm:$0xff] }
 0x348   :  { %2586 = vadd.xlane.f32.xlu0 %v6011_v18  ;;  %v6017_v53 = vpop.xlane.xlu1 %1992  ;;  %v6019_v20 = vpop.eup %3797  ;;  %v2731_v49 = vmul.f32 %v3796_v12, %v6983_v11  ;;  %v2128_v34 = vsub.f32 %v6984_v59, %v5763_v45  ;;  %v6986_v45 = vld [vmem:[#allocation68_spill] sm:$0xff]  ;;  %v6987_v11 = vld [vmem:[#allocation90_spill] sm:$0xff] }
 0x349   :  { %6982 = vst [vmem:[#allocation57_spill] sm:$0xff] %v6019_v20  ;;  %v2483_v29 = vpop.xlane.xlu0 %2482  ;;  %v6022_v57 = vpop.eup %3799  ;;  %v2129_v59 = vsub.f32 %v6986_v45, %v5775_v54  ;;  %v6989_v54 = vld [vmem:[#allocation91_spill] sm:$0xff] }
 0x34a   :  { %v3802_v25 = vpop.eup %3801  ;;  %2956 = vst [vmem:[%s6625_s5 + $0xf0] sm:$0xff] %v2731_v49  ;;  %3819 = vrcp.f32 %v2483_v29  ;;  %v2354_v41 = vmul.f32 1.442695, %v2128_v34 }
 0x34b   :  { %2588 = vadd.xlane.f32.xlu1 %v6019_v20  ;;  %v3804_v37 = vpop.eup %3803  ;;  %3821 = vpow2.f32 %v2348_v26  ;;  %v2733_v12 = vmul.f32 %v3802_v25, %v6985_v63  ;;  %v6988_v20 = vld [vmem:[#allocation69_spill] sm:$0xff] }
 0x34c   :  { %2582 = vadd.xlane.f32.xlu0 %v6022_v57  ;;  %v2485_v22 = vpop.xlane.xlu1 %2484  ;;  %v6032_v40 = vpop.eup %3805  ;;  %3823 = vpow2.f32 %v2342_v28  ;;  %v2727_v18 = vmul.f32 %v3804_v37, %v6987_v11  ;;  %v2126_v26 = vsub.f32 %v6988_v20, %v5779_v1  ;;  %v2356_v20 = vmul.f32 1.442695, %v2129_v59  ;;  %v6990_v28 = vld [vmem:[#allocation70_spill] sm:$0xff] }
 0x34d   :  { %v2479_v49 = vpop.xlane.xlu0 %2478  ;;  %2957 = vst [vmem:[%s6625_s5 + $0xf8] sm:$0xff] %v2733_v12  ;;  %3825 = vrcp.f32 %v2485_v22  ;;  %v2127_v34 = vsub.f32 %v6990_v28, %v5789_v42  ;;  %v6993_v42 = vld [vmem:[#allocation73_spill] sm:$0xff] }
 0x34e   :  { %v3808_v29 = vpop.eup %3807  ;;  %2954 = vst [vmem:[%s6625_s5 + $0xe0] sm:$0xff] %v2727_v18  ;;  %3827 = vrcp.f32 %v2479_v49  ;;  %v2350_v63 = vmul.f32 1.442695, %v2126_v26  ;;  %v2133_v45 = vsub.f32 %v6993_v42, %v5841_v16  ;;  %v6994_v49 = vld [vmem:[#allocation74_spill] sm:$0xff] }
 0x34f   :  { %v6042_v25 = vpop.eup %3809  ;;  %v2729_v9 = vmul.f32 %v3808_v29, %v6989_v54  ;;  %2584 = vadd.xlane.f32.xlu1 %v6032_v40  ;;  %3829 = vpow2.f32 %v2344_v27  ;;  %v6991_v27 = vld [vmem:[#allocation72_spill] sm:$0xff]  ;;  %v2352_v11 = vmul.f32 1.442695, %v2127_v34 }
 0x350   :  { %2594 = vadd.xlane.f32.xlu0 %v6042_v25  ;;  %v2481_v1 = vpop.xlane.xlu1 %2480  ;;  %v6057_v18 = vpop.eup %3811  ;;  %v2132_v12 = vsub.f32 %v6991_v27, %v5829_v48  ;;  %v6999_v27 = vld [vmem:[#allocation96_spill] sm:$0xff] }
 0x351   :  { %2955 = vst [vmem:[%s6625_s5 + $0xe8] sm:$0xff] %v2729_v9  ;;  %3831 = vrcp.f32 %v2481_v1  ;;  %v6055_v37 = vpop.xlane.xlu0 %2002  ;;  %v6061_v22 = vpop.eup %3813  ;;  %v2364_v9 = vmul.f32 1.442695, %v2133_v45  ;;  %v6997_v1 = vld [vmem:[#allocation75_spill] sm:$0xff] }
 0x352   :  { %3833 = vpow2.f32 %v2354_v41  ;;  %6992 = vst [vmem:[#allocation22_spill] sm:$0xff] %v6061_v22  ;;  %v2130_v41 = vsub.f32 %v6994_v49, %v5845_v4  ;;  %v6073_v26 = vpop.eup %3815  ;;  %v2362_v48 = vmul.f32 1.442695, %v2132_v12  ;;  %v2131_v28 = vsub.f32 %v6997_v1, %v5855_v7  ;;  %v7000_v49 = vld [vmem:[#allocation82_spill] sm:$0xff] }
 0x353   :  { %2596 = vadd.xlane.f32.xlu1 %v6057_v18  ;;  %3835 = vpow2.f32 %v2356_v20  ;;  %6995 = vst [vmem:[#allocation58_spill] sm:$0xff] %v6073_v26  ;;  %v6075_v54 = vpop.eup %3817  ;;  %v2136_v45 = vsub.f32 %v7000_v49, %v5905_v62  ;;  %v7002_v62 = vld [vmem:[#allocation83_spill] sm:$0xff]  ;;  %v7003_v49 = vld [vmem:[#allocation98_spill] sm:$0xff] }
 0x354   :  { %2590 = vadd.xlane.f32.xlu0 %v6061_v22  ;;  %v6067_v59 = vpop.xlane.xlu1 %2004  ;;  %3837 = vpow2.f32 %v2350_v63  ;;  %6996 = vst [vmem:[#allocation23_spill] sm:$0xff] %v6075_v54  ;;  %v2358_v34 = vmul.f32 1.442695, %v2130_v41  ;;  %v7001_v41 = vld [vmem:[#allocation97_spill] sm:$0xff] }
 0x355   :  { %v6071_v29 = vpop.xlane.xlu0 %1998  ;;  %3839 = vpow2.f32 %v2352_v11  ;;  %v2360_v11 = vmul.f32 1.442695, %v2131_v28  ;;  %v2370_v22 = vmul.f32 1.442695, %v2136_v45 }
 0x356   :  { %3841 = vpow2.f32 %v2362_v48 }
 0x357   :  { %2592 = vadd.xlane.f32.xlu1 %v6073_v26  ;;  %v3820_v16 = vpop.eup %3819 }
 0x358   :  { %2602 = vadd.xlane.f32.xlu0 %v6075_v54  ;;  %v6081_v20 = vpop.xlane.xlu1 %2000  ;;  %v6083_v4 = vpop.eup %3821  ;;  %v2739_v63 = vmul.f32 %v3820_v16, %v6999_v27  ;;  %v2137_v27 = vsub.f32 %v7002_v62, %v5913_v51  ;;  %v7005_v51 = vld [vmem:[#allocation99_spill] sm:$0xff] }
 0x359   :  { %6998 = vst [vmem:[#allocation24_spill] sm:$0xff] %v6083_v4  ;;  %v2491_v12 = vpop.xlane.xlu0 %2490  ;;  %v6086_v42 = vpop.eup %3823 }
 0x35a   :  { %v3826_v26 = vpop.eup %3825  ;;  %2960 = vst [vmem:[%s6625_s5 + $0x110] sm:$0xff] %v2739_v63  ;;  %3843 = vrcp.f32 %v2491_v12 }
 0x35b   :  { %2604 = vadd.xlane.f32.xlu1 %v6083_v4  ;;  %v3828_v7 = vpop.eup %3827  ;;  %3845 = vpow2.f32 %v2364_v9  ;;  %v2741_v16 = vmul.f32 %v3826_v26, %v7001_v41  ;;  %v7004_v4 = vld [vmem:[#allocation86_spill] sm:$0xff] }
 0x35c   :  { %2598 = vadd.xlane.f32.xlu0 %v6086_v42  ;;  %v2493_v1 = vpop.xlane.xlu1 %2492  ;;  %v6096_v48 = vpop.eup %3829  ;;  %3847 = vpow2.f32 %v2358_v34  ;;  %v2735_v54 = vmul.f32 %v3828_v7, %v7003_v49  ;;  %v2134_v9 = vsub.f32 %v7004_v4, %v5937_v21  ;;  %v2372_v4 = vmul.f32 1.442695, %v2137_v27  ;;  %v7006_v34 = vld [vmem:[#allocation87_spill] sm:$0xff] }
 0x35d   :  { %v2487_v63 = vpop.xlane.xlu0 %2486  ;;  %2961 = vst [vmem:[%s6625_s5 + $0x118] sm:$0xff] %v2741_v16  ;;  %3849 = vrcp.f32 %v2493_v1  ;;  %v2135_v45 = vsub.f32 %v7006_v34, %v5951_v2  ;;  %v7009_v2 = vld [vmem:[#allocation93_spill] sm:$0xff] }
 0x35e   :  { %v3832_v12 = vpop.eup %3831  ;;  %2958 = vst [vmem:[%s6625_s5 + $0x100] sm:$0xff] %v2735_v54  ;;  %3851 = vrcp.f32 %v2487_v63  ;;  %v2366_v41 = vmul.f32 1.442695, %v2134_v9  ;;  %v2141_v62 = vsub.f32 %v7009_v2, %v6000_v0  ;;  %v7010_v63 = vld [vmem:[#allocation94_spill] sm:$0xff] }
 0x35f   :  { %v6106_v26 = vpop.eup %3833  ;;  %v2737_v28 = vmul.f32 %v3832_v12, %v7005_v51  ;;  %2600 = vadd.xlane.f32.xlu1 %v6096_v48  ;;  %3853 = vpow2.f32 %v2360_v11  ;;  %v7007_v11 = vld [vmem:[#allocation92_spill] sm:$0xff]  ;;  %v2368_v49 = vmul.f32 1.442695, %v2135_v45 }
 0x360   :  { %2610 = vadd.xlane.f32.xlu0 %v6106_v26  ;;  %v2489_v21 = vpop.xlane.xlu1 %2488  ;;  %v6121_v54 = vpop.eup %3835  ;;  %v2140_v16 = vsub.f32 %v7007_v11, %v5986_v32  ;;  %v7015_v11 = vld [vmem:[#allocation2_spill] sm:$0xff] }
 0x361   :  { %2959 = vst [vmem:[%s6625_s5 + $0x108] sm:$0xff] %v2737_v28  ;;  %3855 = vrcp.f32 %v2489_v21  ;;  %v6119_v7 = vpop.xlane.xlu0 %2010  ;;  %v6125_v1 = vpop.eup %3837  ;;  %v2380_v28 = vmul.f32 1.442695, %v2141_v62  ;;  %v7013_v21 = vld [vmem:[#allocation95_spill] sm:$0xff] }
 0x362   :  { %3857 = vpow2.f32 %v2370_v22  ;;  %7008 = vst [vmem:[#allocation25_spill] sm:$0xff] %v6125_v1  ;;  %v2138_v22 = vsub.f32 %v7010_v63, %v6004_v15  ;;  %v6137_v9 = vpop.eup %3839  ;;  %v2378_v32 = vmul.f32 1.442695, %v2140_v16  ;;  %v2139_v34 = vsub.f32 %v7013_v21, %v6017_v53  ;;  %v7016_v63 = vld [vmem:[#allocation100_spill] sm:$0xff] }
 0x363   :  { %2612 = vadd.xlane.f32.xlu1 %v6121_v54  ;;  %3859 = vpow2.f32 %v2372_v4  ;;  %7011 = vst [vmem:[#allocation26_spill] sm:$0xff] %v6137_v9  ;;  %v6139_v51 = vpop.eup %3841  ;;  %v2144_v62 = vsub.f32 %v7016_v63, %v6055_v37  ;;  %v7018_v37 = vld [vmem:[#allocation101_spill] sm:$0xff] }
 0x364   :  { %2606 = vadd.xlane.f32.xlu0 %v6125_v1  ;;  %v6131_v27 = vpop.xlane.xlu1 %2012  ;;  %3861 = vpow2.f32 %v2366_v41  ;;  %7012 = vst [vmem:[#allocation27_spill] sm:$0xff] %v6139_v51  ;;  %v2374_v45 = vmul.f32 1.442695, %v2138_v22  ;;  %v7017_v22 = vld [vmem:[#allocation3_spill] sm:$0xff]  ;;  %v7019_v63 = vld [vmem:[#allocation105_spill] sm:$0xff] }
 0x365   :  { %v6135_v12 = vpop.xlane.xlu0 %2006  ;;  %3863 = vpow2.f32 %v2368_v49  ;;  %v2376_v49 = vmul.f32 1.442695, %v2139_v34  ;;  %v2386_v1 = vmul.f32 1.442695, %v2144_v62 }
 0x366   :  { %3865 = vpow2.f32 %v2378_v32 }
 0x367   :  { %2608 = vadd.xlane.f32.xlu1 %v6137_v9  ;;  %v3844_v0 = vpop.eup %3843 }
 0x368   :  { %2618 = vadd.xlane.f32.xlu0 %v6139_v51  ;;  %v6145_v4 = vpop.xlane.xlu1 %2008  ;;  %v6147_v15 = vpop.eup %3845  ;;  %v2747_v41 = vmul.f32 %v3844_v0, %v7015_v11  ;;  %v2145_v11 = vsub.f32 %v7018_v37, %v6067_v59  ;;  %v7021_v59 = vld [vmem:[#allocation106_spill] sm:$0xff]  ;;  %v7024_v37 = vld [vmem:[#allocation108_spill] sm:$0xff] }
 0x369   :  { %7014 = vst [vmem:[#allocation63_spill] sm:$0xff] %v6147_v15  ;;  %v2499_v16 = vpop.xlane.xlu0 %2498  ;;  %v6150_v2 = vpop.eup %3847 }
 0x36a   :  { %v3850_v9 = vpop.eup %3849  ;;  %2964 = vst [vmem:[%s6625_s5 + $0x130] sm:$0xff] %v2747_v41  ;;  %3867 = vrcp.f32 %v2499_v16 }
 0x36b   :  { %2620 = vadd.xlane.f32.xlu1 %v6147_v15  ;;  %v3852_v53 = vpop.eup %3851  ;;  %3869 = vpow2.f32 %v2380_v28  ;;  %v2749_v0 = vmul.f32 %v3850_v9, %v7017_v22  ;;  %v7020_v15 = vld [vmem:[#allocation102_spill] sm:$0xff] }
 0x36c   :  { %2614 = vadd.xlane.f32.xlu0 %v6150_v2  ;;  %v2501_v21 = vpop.xlane.xlu1 %2500  ;;  %v6160_v32 = vpop.eup %3853  ;;  %3871 = vpow2.f32 %v2374_v45  ;;  %v2743_v51 = vmul.f32 %v3852_v53, %v7019_v63  ;;  %v2142_v28 = vsub.f32 %v7020_v15, %v6071_v29  ;;  %v2388_v15 = vmul.f32 1.442695, %v2145_v11  ;;  %v7022_v45 = vld [vmem:[#allocation104_spill] sm:$0xff] }
 0x36d   :  { %v2495_v41 = vpop.xlane.xlu0 %2494  ;;  %2965 = vst [vmem:[%s6625_s5 + $0x138] sm:$0xff] %v2749_v0  ;;  %3873 = vrcp.f32 %v2501_v21  ;;  %v2143_v62 = vsub.f32 %v7022_v45, %v6081_v20  ;;  %v7023_v0 = vld [vmem:[#allocation107_spill] sm:$0xff]  ;;  %v2149_v20 = vsub.f32 %v7024_v37, %v6131_v27  ;;  %v7027_v27 = vld [vmem:[#allocation4_spill] sm:$0xff] }
 0x36e   :  { %v3856_v16 = vpop.eup %3855  ;;  %2962 = vst [vmem:[%s6625_s5 + $0x120] sm:$0xff] %v2743_v51  ;;  %3875 = vrcp.f32 %v2495_v41  ;;  %v2382_v22 = vmul.f32 1.442695, %v2142_v28  ;;  %v7025_v41 = vld [vmem:[#allocation109_spill] sm:$0xff]  ;;  %v2147_v45 = vsub.f32 %v7027_v27, %v6145_v4 }
 0x36f   :  { %v6170_v9 = vpop.eup %3857  ;;  %v2745_v34 = vmul.f32 %v3856_v16, %v7021_v59  ;;  %2616 = vadd.xlane.f32.xlu1 %v6160_v32  ;;  %3877 = vpow2.f32 %v2376_v49  ;;  %v2148_v49 = vsub.f32 %v7023_v0, %v6119_v7  ;;  %v2384_v63 = vmul.f32 1.442695, %v2143_v62  ;;  %v7028_v0 = vld [vmem:[#allocation6_spill] sm:$0xff] }
 0x370   :  { %2626 = vadd.xlane.f32.xlu0 %v6170_v9  ;;  %v2497_v29 = vpop.xlane.xlu1 %2496  ;;  %v6183_v51 = vpop.eup %3859  ;;  %v2146_v16 = vsub.f32 %v7025_v41, %v6135_v12 }
 0x371   :  { %2963 = vst [vmem:[%s6625_s5 + $0x128] sm:$0xff] %v2745_v34  ;;  %3879 = vrcp.f32 %v2497_v29  ;;  %v2019_v53 = vpop.xlane.xlu0 %2018  ;;  %v6187_v21 = vpop.eup %3861  ;;  %v2394_v7 = vmul.f32 1.442695, %v2148_v49  ;;  %v2396_v29 = vmul.f32 1.442695, %v2149_v20 }
 0x372   :  { %3881 = vpow2.f32 %v2386_v1  ;;  %v6195_v28 = vpop.eup %3863  ;;  %v2390_v12 = vmul.f32 1.442695, %v2146_v16  ;;  %v2152_v41 = vsub.f32 %v5614_v13, %v2019_v53  ;;  %v2392_v20 = vmul.f32 1.442695, %v2147_v45  ;;  %v7029_v13 = vld [vmem:[#allocation7_spill] sm:$0xff]  ;;  %v7031_v45 = vld [vmem:[#allocation112_spill] sm:$0xff] }
 0x373   :  { %2628 = vadd.xlane.f32.xlu1 %v6183_v51  ;;  %3883 = vpow2.f32 %v2388_v15  ;;  %7026 = vst [vmem:[#allocation28_spill] sm:$0xff] %v6195_v28  ;;  %v6197_v59 = vpop.eup %3865 }
 0x374   :  { %2622 = vadd.xlane.f32.xlu0 %v6187_v21  ;;  %v2021_v11 = vpop.xlane.xlu1 %2020  ;;  %3885 = vpow2.f32 %v2382_v22 }
 0x375   :  { %v2015_v1 = vpop.xlane.xlu0 %2014  ;;  %3887 = vpow2.f32 %v2384_v63 }
 0x376   :  { %3889 = vpow2.f32 %v2394_v7  ;;  %v7030_v7 = vld [vmem:[#allocation111_spill] sm:$0xff] }
 0x377   :  { %2624 = vadd.xlane.f32.xlu1 %v6195_v28  ;;  %v3868_v34 = vpop.eup %3867  ;;  %v2153_v27 = vsub.f32 %v7030_v7, %v2021_v11 }
 0x378   :  { %2634 = vadd.xlane.f32.xlu0 %v6197_v59  ;;  %v2017_v15 = vpop.xlane.xlu1 %2016  ;;  %v6203_v62 = vpop.eup %3869  ;;  %v2755_v37 = vmul.f32 %v3868_v34, %v7028_v0 }
 0x379   :  { %v2507_v22 = vpop.xlane.xlu0 %2506  ;;  %v6206_v49 = vpop.eup %3871 }
 0x37a   :  { %v3874_v28 = vpop.eup %3873  ;;  %2968 = vst [vmem:[%s6625_s5 + $0x150] sm:$0xff] %v2755_v37  ;;  %3891 = vrcp.f32 %v2507_v22  ;;  %v2150_v22 = vsub.f32 %v7031_v45, %v2015_v1  ;;  %v2404_v1 = vmul.f32 1.442695, %v2153_v27 }
 0x37b   :  { %2636 = vadd.xlane.f32.xlu1 %v6203_v62  ;;  %v3876_v4 = vpop.eup %3875  ;;  %3893 = vpow2.f32 %v2396_v29  ;;  %v2757_v63 = vmul.f32 %v3874_v28, %v5599_v17  ;;  %v2402_v29 = vmul.f32 1.442695, %v2152_v41  ;;  %v7032_v28 = vld [vmem:[#allocation110_spill] sm:$0xff]  ;;  %v7033_v41 = vld [vmem:[#allocation8_spill] sm:$0xff] }
 0x37c   :  { %2630 = vadd.xlane.f32.xlu0 %v6206_v49  ;;  %v2509_v16 = vpop.xlane.xlu1 %2508  ;;  %v6215_v34 = vpop.eup %3877  ;;  %3895 = vpow2.f32 %v2390_v12  ;;  %v2751_v53 = vmul.f32 %v3876_v4, %v7029_v13  ;;  %v2151_v4 = vsub.f32 %v7033_v41, %v2017_v15  ;;  %v2398_v13 = vmul.f32 1.442695, %v2150_v22 }
 0x37d   :  { %v2503_v0 = vpop.xlane.xlu0 %2502  ;;  %2969 = vst [vmem:[%s6625_s5 + $0x158] sm:$0xff] %v2757_v63  ;;  %3897 = vrcp.f32 %v2509_v16 }
 0x37e   :  { %v3880_v37 = vpop.eup %3879  ;;  %2966 = vst [vmem:[%s6625_s5 + $0x140] sm:$0xff] %v2751_v53  ;;  %3899 = vrcp.f32 %v2503_v0  ;;  %v2400_v0 = vmul.f32 1.442695, %v2151_v4 }
 0x37f   :  { %v6223_v17 = vpop.eup %3881  ;;  %v2753_v12 = vmul.f32 %v3880_v37, %v7032_v28  ;;  %2632 = vadd.xlane.f32.xlu1 %v6215_v34  ;;  %3901 = vpow2.f32 %v2392_v20 }
 0x380   :  { %2642 = vadd.xlane.f32.xlu0 %v6223_v17  ;;  %v2505_v11 = vpop.xlane.xlu1 %2504  ;;  %v6235_v16 = vpop.eup %3883 }
 0x381   :  { %2967 = vst [vmem:[%s6625_s5 + $0x148] sm:$0xff] %v2753_v12  ;;  %3903 = vrcp.f32 %v2505_v11  ;;  %v2027_v63 = vpop.xlane.xlu0 %2026  ;;  %v6237_v53 = vpop.eup %3885 }
 0x382   :  { %3905 = vpow2.f32 %v2402_v29  ;;  %v2156_v20 = vsub.f32 %v5678_v5, %v2027_v63  ;;  %v6242_v37 = vpop.eup %3887 }
 0x383   :  { %2644 = vadd.xlane.f32.xlu1 %v6235_v16  ;;  %3907 = vpow2.f32 %v2404_v1  ;;  %v6245_v45 = vpop.eup %3889  ;;  %v7034_v1 = vld [vmem:[#allocation9_spill] sm:$0xff] }
 0x384   :  { %2638 = vadd.xlane.f32.xlu0 %v6237_v53  ;;  %v2029_v7 = vpop.xlane.xlu1 %2028  ;;  %3909 = vpow2.f32 %v2398_v13  ;;  %v2410_v22 = vmul.f32 1.442695, %v2156_v20 }
 0x385   :  { %v2023_v27 = vpop.xlane.xlu0 %2022  ;;  %v2157_v28 = vsub.f32 %v5692_v43, %v2029_v7  ;;  %3911 = vpow2.f32 %v2400_v0  ;;  %v7035_v7 = vld [vmem:[#allocation10_spill] sm:$0xff] }
 0x386   :  { %v2154_v15 = vsub.f32 %v5702_v24, %v2023_v27 }
 0x387   :  { %2640 = vadd.xlane.f32.xlu1 %v6242_v37  ;;  %v3892_v29 = vpop.eup %3891  ;;  %v2412_v27 = vmul.f32 1.442695, %v2157_v28 }
 0x388   :  { %v2406_v5 = vmul.f32 1.442695, %v2154_v15  ;;  %2650 = vadd.xlane.f32.xlu0 %v6245_v45  ;;  %v2025_v12 = vpop.xlane.xlu1 %2024  ;;  %v6250_v11 = vpop.eup %3893  ;;  %v2763_v41 = vmul.f32 %v3892_v29, %v7034_v1 }
 0x389   :  { %v2155_v4 = vsub.f32 %v5713_v52, %v2025_v12  ;;  %v2515_v24 = vpop.xlane.xlu0 %2514  ;;  %v6254_v63 = vpop.eup %3895 }
 0x38a   :  { %3913 = vpow2.f32 %v2406_v5  ;;  %v3898_v13 = vpop.eup %3897  ;;  %2972 = vst [vmem:[%s6625_s5 + $0x170] sm:$0xff] %v2763_v41 }
 0x38b   :  { %v2408_v43 = vmul.f32 1.442695, %v2155_v4  ;;  %3915 = vrcp.f32 %v2515_v24  ;;  %2652 = vadd.xlane.f32.xlu1 %v6250_v11  ;;  %v3900_v20 = vpop.eup %3899  ;;  %v2765_v0 = vmul.f32 %v3898_v13, %v7035_v7 }
 0x38c   :  { %3917 = vpow2.f32 %v2410_v22  ;;  %2646 = vadd.xlane.f32.xlu0 %v6254_v63  ;;  %v2517_v52 = vpop.xlane.xlu1 %2516  ;;  %v6262_v15 = vpop.eup %3901  ;;  %v2759_v29 = vmul.f32 %v3900_v20, %v5662_v8 }
 0x38d   :  { %3919 = vpow2.f32 %v2408_v43  ;;  %v2511_v5 = vpop.xlane.xlu0 %2510  ;;  %2973 = vst [vmem:[%s6625_s5 + $0x178] sm:$0xff] %v2765_v0 }
 0x38e   :  { %v3904_v12 = vpop.eup %3903  ;;  %3921 = vrcp.f32 %v2517_v52  ;;  %2970 = vst [vmem:[%s6625_s5 + $0x160] sm:$0xff] %v2759_v29 }
 0x38f   :  { %v6268_v1 = vpop.eup %3905  ;;  %v2761_v22 = vmul.f32 %v3904_v12, %v5672_v46  ;;  %3923 = vrcp.f32 %v2511_v5  ;;  %2648 = vadd.xlane.f32.xlu1 %v6262_v15 }
 0x390   :  { %3925 = vpow2.f32 %v2412_v27  ;;  %2658 = vadd.xlane.f32.xlu0 %v6268_v1  ;;  %v2513_v8 = vpop.xlane.xlu1 %2512  ;;  %v6279_v41 = vpop.eup %3907  ;;  %v7036_v27 = vld [vmem:[#allocation11_spill] sm:$0xff] }
 0x391   :  { %2971 = vst [vmem:[%s6625_s5 + $0x168] sm:$0xff] %v2761_v22  ;;  %3927 = vrcp.f32 %v2513_v8  ;;  %v2523_v28 = vpop.xlane.xlu0 %2522  ;;  %v6281_v4 = vpop.eup %3909  ;;  %v7037_v8 = vld [vmem:[#allocation12_spill] sm:$0xff] }
 0x392   :  { %3929 = vrcp.f32 %v2523_v28  ;;  %v6285_v13 = vpop.eup %3911 }
 0x393   :  { %2660 = vadd.xlane.f32.xlu1 %v6279_v41 }
 0x394   :  { %2654 = vadd.xlane.f32.xlu0 %v6281_v4  ;;  %v2525_v46 = vpop.xlane.xlu1 %2524 }
 0x395   :  { %3931 = vrcp.f32 %v2525_v46  ;;  %v2519_v24 = vpop.xlane.xlu0 %2518 }
 0x396   :  { %3933 = vrcp.f32 %v2519_v24 }
 0x397   :  { %v6287_v43 = vpop.eup %3913  ;;  %2656 = vadd.xlane.f32.xlu1 %v6285_v13 }
 0x398   :  { %v3916_v20 = vpop.eup %3915  ;;  %2662 = vadd.xlane.f32.xlu0 %v6287_v43  ;;  %v2521_v7 = vpop.xlane.xlu1 %2520 }
 0x399   :  { %v6291_v0 = vpop.eup %3917  ;;  %v2771_v52 = vmul.f32 %v3916_v20, %v7036_v27  ;;  %3935 = vrcp.f32 %v2521_v7  ;;  %v2531_v29 = vpop.xlane.xlu0 %2530 }
 0x39a   :  { %v6294_v5 = vpop.eup %3919  ;;  %3937 = vrcp.f32 %v2531_v29 }
 0x39b   :  { %v3922_v12 = vpop.eup %3921  ;;  %2976 = vst [vmem:[%s6625_s5 + $0x190] sm:$0xff] %v2771_v52  ;;  %2664 = vadd.xlane.f32.xlu1 %v6294_v5 }
 0x39c   :  { %v3924_v22 = vpop.eup %3923  ;;  %v2773_v28 = vmul.f32 %v3922_v12, %v7037_v8  ;;  %2666 = vadd.xlane.f32.xlu0 %v6291_v0  ;;  %v2533_v46 = vpop.xlane.xlu1 %2532 }
 0x39d   :  { %v6302_v24 = vpop.eup %3925  ;;  %v2767_v20 = vmul.f32 %v3924_v22, %v5730_v55  ;;  %3939 = vrcp.f32 %v2533_v46  ;;  %v2527_v7 = vpop.xlane.xlu0 %2526  ;;  %v7038_v46 = vld [vmem:[#allocation48_spill] sm:$0xff] }
 0x39e   :  { %v3928_v27 = vpop.eup %3927  ;;  %2977 = vst [vmem:[%s6625_s5 + $0x198] sm:$0xff] %v2773_v28  ;;  %3941 = vrcp.f32 %v2527_v7 }
 0x39f   :  { %v3930_v52 = vpop.eup %3929  ;;  %2974 = vst [vmem:[%s6625_s5 + $0x180] sm:$0xff] %v2767_v20  ;;  %v2769_v29 = vmul.f32 %v3928_v27, %v5740_v19  ;;  %2668 = vadd.xlane.f32.xlu1 %v6302_v24 }
 0x3a0   :  { %v2779_v12 = vmul.f32 %v3930_v52, %v5750_v33  ;;  %v2529_v55 = vpop.xlane.xlu1 %2528 }
 0x3a1   :  { %2975 = vst [vmem:[%s6625_s5 + $0x188] sm:$0xff] %v2769_v29  ;;  %3943 = vrcp.f32 %v2529_v55  ;;  %v2539_v22 = vpop.xlane.xlu0 %2538  ;;  %v7039_v29 = vld [vmem:[#allocation13_spill] sm:$0xff] }
 0x3a2   :  { %v3932_v8 = vpop.eup %3931  ;;  %2980 = vst [vmem:[%s6625_s5 + $0x1b0] sm:$0xff] %v2779_v12  ;;  %3945 = vrcp.f32 %v2539_v22  ;;  %v7040_v55 = vld [vmem:[#allocation49_spill] sm:$0xff] }
 0x3a3   :  { %v3934_v28 = vpop.eup %3933  ;;  %v2781_v19 = vmul.f32 %v3932_v8, %v5765_v56 }
 0x3a4   :  { %v2775_v20 = vmul.f32 %v3934_v28, %v7038_v46  ;;  %v2541_v7 = vpop.xlane.xlu1 %2540  ;;  %v7041_v46 = vld [vmem:[#allocation14_spill] sm:$0xff] }
 0x3a5   :  { %2981 = vst [vmem:[%s6625_s5 + $0x1b8] sm:$0xff] %v2781_v19  ;;  %3947 = vrcp.f32 %v2541_v7  ;;  %v2535_v33 = vpop.xlane.xlu0 %2534 }
 0x3a6   :  { %v3936_v27 = vpop.eup %3935  ;;  %2978 = vst [vmem:[%s6625_s5 + $0x1a0] sm:$0xff] %v2775_v20  ;;  %3949 = vrcp.f32 %v2535_v33 }
 0x3a7   :  { %v3938_v52 = vpop.eup %3937  ;;  %v2777_v12 = vmul.f32 %v3936_v27, %v7039_v29 }
 0x3a8   :  { %v2787_v56 = vmul.f32 %v3938_v52, %v7040_v55  ;;  %v2537_v22 = vpop.xlane.xlu1 %2536 }
 0x3a9   :  { %2979 = vst [vmem:[%s6625_s5 + $0x1a8] sm:$0xff] %v2777_v12  ;;  %3951 = vrcp.f32 %v2537_v22  ;;  %v2547_v8 = vpop.xlane.xlu0 %2546 }
 0x3aa   :  { %v3940_v28 = vpop.eup %3939  ;;  %2984 = vst [vmem:[%s6625_s5 + $0x1d0] sm:$0xff] %v2787_v56  ;;  %3953 = vrcp.f32 %v2547_v8 }
 0x3ab   :  { %v3942_v19 = vpop.eup %3941  ;;  %v2789_v20 = vmul.f32 %v3940_v28, %v7041_v46 }
 0x3ac   :  { %v2783_v7 = vmul.f32 %v3942_v19, %v5794_v60  ;;  %v2549_v33 = vpop.xlane.xlu1 %2548 }
 0x3ad   :  { %2985 = vst [vmem:[%s6625_s5 + $0x1d8] sm:$0xff] %v2789_v20  ;;  %3955 = vrcp.f32 %v2549_v33  ;;  %v2543_v27 = vpop.xlane.xlu0 %2542 }
 0x3ae   :  { %v3944_v52 = vpop.eup %3943  ;;  %2982 = vst [vmem:[%s6625_s5 + $0x1c0] sm:$0xff] %v2783_v7  ;;  %3957 = vrcp.f32 %v2543_v27 }
 0x3af   :  { %v3946_v29 = vpop.eup %3945  ;;  %v2785_v12 = vmul.f32 %v3944_v52, %v5804_v47 }
 0x3b0   :  { %v2795_v55 = vmul.f32 %v3946_v29, %v5814_v3  ;;  %v2545_v56 = vpop.xlane.xlu1 %2544  ;;  %v7042_v29 = vld [vmem:[#allocation50_spill] sm:$0xff] }
 0x3b1   :  { %2983 = vst [vmem:[%s6625_s5 + $0x1c8] sm:$0xff] %v2785_v12  ;;  %3959 = vrcp.f32 %v2545_v56  ;;  %v2555_v60 = vpop.xlane.xlu0 %2554 }
 0x3b2   :  { %v3948_v22 = vpop.eup %3947  ;;  %2988 = vst [vmem:[%s6625_s5 + $0x1f0] sm:$0xff] %v2795_v55  ;;  %3961 = vrcp.f32 %v2555_v60 }
 0x3b3   :  { %v3950_v8 = vpop.eup %3949  ;;  %v2797_v28 = vmul.f32 %v3948_v22, %v5831_v36 }
 0x3b4   :  { %v2791_v47 = vmul.f32 %v3950_v8, %v5835_v61  ;;  %v2557_v19 = vpop.xlane.xlu1 %2556 }
 0x3b5   :  { %2989 = vst [vmem:[%s6625_s5 + $0x1f8] sm:$0xff] %v2797_v28  ;;  %3963 = vrcp.f32 %v2557_v19  ;;  %v2551_v3 = vpop.xlane.xlu0 %2550 }
 0x3b6   :  { %v3952_v46 = vpop.eup %3951  ;;  %2986 = vst [vmem:[%s6625_s5 + $0x1e0] sm:$0xff] %v2791_v47  ;;  %3965 = vrcp.f32 %v2551_v3  ;;  %v7043_v3 = vld [vmem:[#allocation15_spill] sm:$0xff] }
 0x3b7   :  { %v3954_v20 = vpop.eup %3953  ;;  %v2793_v7 = vmul.f32 %v3952_v46, %v5847_v14 }
 0x3b8   :  { %v2803_v36 = vmul.f32 %v3954_v20, %v5849_v30  ;;  %v2553_v33 = vpop.xlane.xlu1 %2552  ;;  %v7044_v20 = vld [vmem:[#allocation16_spill] sm:$0xff] }
 0x3b9   :  { %2987 = vst [vmem:[%s6625_s5 + $0x1e8] sm:$0xff] %v2793_v7  ;;  %3967 = vrcp.f32 %v2553_v33  ;;  %v2563_v61 = vpop.xlane.xlu0 %2562 }
 0x3ba   :  { %v3956_v27 = vpop.eup %3955  ;;  %2992 = vst [vmem:[%s6625_s5 + $0x210] sm:$0xff] %v2803_v36  ;;  %3969 = vrcp.f32 %v2563_v61  ;;  %v7045_v61 = vld [vmem:[#allocation17_spill] sm:$0xff] }
 0x3bb   :  { %v3958_v52 = vpop.eup %3957  ;;  %v2805_v12 = vmul.f32 %v3956_v27, %v7042_v29 }
 0x3bc   :  { %v2799_v14 = vmul.f32 %v3958_v52, %v5860_v44  ;;  %v2565_v55 = vpop.xlane.xlu1 %2564  ;;  %v7046_v52 = vld [vmem:[#allocation18_spill] sm:$0xff] }
 0x3bd   :  { %2993 = vst [vmem:[%s6625_s5 + $0x218] sm:$0xff] %v2805_v12  ;;  %3971 = vrcp.f32 %v2565_v55  ;;  %v2559_v30 = vpop.xlane.xlu0 %2558 }
 0x3be   :  { %v3960_v56 = vpop.eup %3959  ;;  %2990 = vst [vmem:[%s6625_s5 + $0x200] sm:$0xff] %v2799_v14  ;;  %3973 = vrcp.f32 %v2559_v30 }
 0x3bf   :  { %v3962_v60 = vpop.eup %3961  ;;  %v2801_v22 = vmul.f32 %v3960_v56, %v5870_v35  ;;  %v7047_v56 = vld [vmem:[#allocation19_spill] sm:$0xff] }
 0x3c0   :  { %v2811_v8 = vmul.f32 %v3962_v60, %v5878_v39  ;;  %v2561_v28 = vpop.xlane.xlu1 %2560 }
 0x3c1   :  { %2991 = vst [vmem:[%s6625_s5 + $0x208] sm:$0xff] %v2801_v22  ;;  %3975 = vrcp.f32 %v2561_v28  ;;  %v2571_v44 = vpop.xlane.xlu0 %2570 }
 0x3c2   :  { %v3964_v47 = vpop.eup %3963  ;;  %2996 = vst [vmem:[%s6625_s5 + $0x230] sm:$0xff] %v2811_v8  ;;  %3977 = vrcp.f32 %v2571_v44 }
 0x3c3   :  { %v3966_v19 = vpop.eup %3965  ;;  %v2813_v46 = vmul.f32 %v3964_v47, %v7043_v3 }
 0x3c4   :  { %v2807_v35 = vmul.f32 %v3966_v19, %v7044_v20  ;;  %v2573_v7 = vpop.xlane.xlu1 %2572 }
 0x3c5   :  { %2997 = vst [vmem:[%s6625_s5 + $0x238] sm:$0xff] %v2813_v46  ;;  %3979 = vrcp.f32 %v2573_v7  ;;  %v2567_v39 = vpop.xlane.xlu0 %2566 }
 0x3c6   :  { %v3968_v36 = vpop.eup %3967  ;;  %2994 = vst [vmem:[%s6625_s5 + $0x220] sm:$0xff] %v2807_v35  ;;  %3981 = vrcp.f32 %v2567_v39 }
 0x3c7   :  { %v3970_v33 = vpop.eup %3969  ;;  %v2809_v27 = vmul.f32 %v3968_v36, %v7045_v61 }
 0x3c8   :  { %v2819_v29 = vmul.f32 %v3970_v33, %v7046_v52  ;;  %v2569_v12 = vpop.xlane.xlu1 %2568 }
 0x3c9   :  { %2995 = vst [vmem:[%s6625_s5 + $0x228] sm:$0xff] %v2809_v27  ;;  %3983 = vrcp.f32 %v2569_v12  ;;  %v2579_v14 = vpop.xlane.xlu0 %2578  ;;  %v7048_v12 = vld [vmem:[#allocation55_spill] sm:$0xff] }
 0x3ca   :  { %v3972_v55 = vpop.eup %3971  ;;  %3000 = vst [vmem:[%s6625_s5 + $0x250] sm:$0xff] %v2819_v29  ;;  %3985 = vrcp.f32 %v2579_v14 }
 0x3cb   :  { %v3974_v30 = vpop.eup %3973  ;;  %v2821_v60 = vmul.f32 %v3972_v55, %v7047_v56  ;;  %v7049_v55 = vld [vmem:[#allocation20_spill] sm:$0xff] }
 0x3cc   :  { %v2815_v22 = vmul.f32 %v3974_v30, %v5915_v10  ;;  %v2581_v8 = vpop.xlane.xlu1 %2580 }
 0x3cd   :  { %3001 = vst [vmem:[%s6625_s5 + $0x258] sm:$0xff] %v2821_v60  ;;  %3987 = vrcp.f32 %v2581_v8  ;;  %v2575_v28 = vpop.xlane.xlu0 %2574 }
 0x3ce   :  { %v3976_v44 = vpop.eup %3975  ;;  %2998 = vst [vmem:[%s6625_s5 + $0x240] sm:$0xff] %v2815_v22  ;;  %3989 = vrcp.f32 %v2575_v28  ;;  %v7050_v22 = vld [vmem:[#allocation56_spill] sm:$0xff]  ;;  %v7051_v28 = vld [vmem:[#allocation21_spill] sm:$0xff] }
 0x3cf   :  { %v3978_v47 = vpop.eup %3977  ;;  %v2817_v19 = vmul.f32 %v3976_v44, %v5920_v38 }
 0x3d0   :  { %v2827_v3 = vmul.f32 %v3978_v47, %v5932_v6  ;;  %v2577_v46 = vpop.xlane.xlu1 %2576 }
 0x3d1   :  { %2999 = vst [vmem:[%s6625_s5 + $0x248] sm:$0xff] %v2817_v19  ;;  %3991 = vrcp.f32 %v2577_v46  ;;  %v2587_v10 = vpop.xlane.xlu0 %2586 }
 0x3d2   :  { %v3980_v20 = vpop.eup %3979  ;;  %3004 = vst [vmem:[%s6625_s5 + $0x270] sm:$0xff] %v2827_v3  ;;  %3993 = vrcp.f32 %v2587_v10  ;;  %v7052_v10 = vld [vmem:[#allocation57_spill] sm:$0xff] }
 0x3d3   :  { %v3982_v35 = vpop.eup %3981  ;;  %v2829_v7 = vmul.f32 %v3980_v20, %v5953_v23 }
 0x3d4   :  { %v2823_v38 = vmul.f32 %v3982_v35, %v5963_v58  ;;  %v2589_v39 = vpop.xlane.xlu1 %2588 }
 0x3d5   :  { %3005 = vst [vmem:[%s6625_s5 + $0x278] sm:$0xff] %v2829_v7  ;;  %3995 = vrcp.f32 %v2589_v39  ;;  %v2583_v6 = vpop.xlane.xlu0 %2582 }
 0x3d6   :  { %v3984_v36 = vpop.eup %3983  ;;  %3002 = vst [vmem:[%s6625_s5 + $0x260] sm:$0xff] %v2823_v38  ;;  %3997 = vrcp.f32 %v2583_v6 }
 0x3d7   :  { %v3986_v33 = vpop.eup %3985  ;;  %v2825_v61 = vmul.f32 %v3984_v36, %v5973_v31 }
 0x3d8   :  { %v2835_v23 = vmul.f32 %v3986_v33, %v5977_v50  ;;  %v2585_v27 = vpop.xlane.xlu1 %2584 }
 0x3d9   :  { %3003 = vst [vmem:[%s6625_s5 + $0x268] sm:$0xff] %v2825_v61  ;;  %3999 = vrcp.f32 %v2585_v27  ;;  %v2595_v58 = vpop.xlane.xlu0 %2594 }
 0x3da   :  { %v3988_v52 = vpop.eup %3987  ;;  %3008 = vst [vmem:[%s6625_s5 + $0x290] sm:$0xff] %v2835_v23  ;;  %4001 = vrcp.f32 %v2595_v58 }
 0x3db   :  { %v3990_v29 = vpop.eup %3989  ;;  %v2837_v14 = vmul.f32 %v3988_v52, %v7048_v12  ;;  %v7053_v52 = vld [vmem:[#allocation22_spill] sm:$0xff] }
 0x3dc   :  { %v2831_v31 = vmul.f32 %v3990_v29, %v7049_v55  ;;  %v2597_v30 = vpop.xlane.xlu1 %2596  ;;  %v7054_v55 = vld [vmem:[#allocation58_spill] sm:$0xff] }
 0x3dd   :  { %3009 = vst [vmem:[%s6625_s5 + $0x298] sm:$0xff] %v2837_v14  ;;  %4003 = vrcp.f32 %v2597_v30  ;;  %v2591_v50 = vpop.xlane.xlu0 %2590  ;;  %v7055_v30 = vld [vmem:[#allocation23_spill] sm:$0xff] }
 0x3de   :  { %v3992_v56 = vpop.eup %3991  ;;  %3006 = vst [vmem:[%s6625_s5 + $0x280] sm:$0xff] %v2831_v31  ;;  %4005 = vrcp.f32 %v2591_v50 }
 0x3df   :  { %v3994_v60 = vpop.eup %3993  ;;  %v2833_v8 = vmul.f32 %v3992_v56, %v7050_v22 }
 0x3e0   :  { %v2843_v44 = vmul.f32 %v3994_v60, %v7051_v28  ;;  %v2593_v47 = vpop.xlane.xlu1 %2592 }
 0x3e1   :  { %3007 = vst [vmem:[%s6625_s5 + $0x288] sm:$0xff] %v2833_v8  ;;  %4007 = vrcp.f32 %v2593_v47  ;;  %v2603_v19 = vpop.xlane.xlu0 %2602  ;;  %v7056_v8 = vld [vmem:[#allocation24_spill] sm:$0xff] }
 0x3e2   :  { %v3996_v3 = vpop.eup %3995  ;;  %3012 = vst [vmem:[%s6625_s5 + $0x2b0] sm:$0xff] %v2843_v44  ;;  %4009 = vrcp.f32 %v2603_v19 }
 0x3e3   :  { %v3998_v46 = vpop.eup %3997  ;;  %v2845_v20 = vmul.f32 %v3996_v3, %v7052_v10 }
 0x3e4   :  { %v2839_v35 = vmul.f32 %v3998_v46, %v6022_v57  ;;  %v2605_v7 = vpop.xlane.xlu1 %2604 }
 0x3e5   :  { %3013 = vst [vmem:[%s6625_s5 + $0x2b8] sm:$0xff] %v2845_v20  ;;  %4011 = vrcp.f32 %v2605_v7  ;;  %v2599_v38 = vpop.xlane.xlu0 %2598 }
 0x3e6   :  { %v4000_v39 = vpop.eup %3999  ;;  %3010 = vst [vmem:[%s6625_s5 + $0x2a0] sm:$0xff] %v2839_v35  ;;  %4013 = vrcp.f32 %v2599_v38 }
 0x3e7   :  { %v4002_v6 = vpop.eup %4001  ;;  %v2841_v36 = vmul.f32 %v4000_v39, %v6032_v40 }
 0x3e8   :  { %v2851_v33 = vmul.f32 %v4002_v6, %v6042_v25  ;;  %v2601_v61 = vpop.xlane.xlu1 %2600  ;;  %v7057_v6 = vld [vmem:[#allocation25_spill] sm:$0xff] }
 0x3e9   :  { %3011 = vst [vmem:[%s6625_s5 + $0x2a8] sm:$0xff] %v2841_v36  ;;  %4015 = vrcp.f32 %v2601_v61  ;;  %v2611_v57 = vpop.xlane.xlu0 %2610 }
 0x3ea   :  { %v4004_v23 = vpop.eup %4003  ;;  %3016 = vst [vmem:[%s6625_s5 + $0x2d0] sm:$0xff] %v2851_v33  ;;  %4017 = vrcp.f32 %v2611_v57  ;;  %v7058_v57 = vld [vmem:[#allocation26_spill] sm:$0xff] }
 0x3eb   :  { %v4006_v27 = vpop.eup %4005  ;;  %v2853_v58 = vmul.f32 %v4004_v23, %v6057_v18 }
 0x3ec   :  { %v2847_v40 = vmul.f32 %v4006_v27, %v7053_v52  ;;  %v2613_v29 = vpop.xlane.xlu1 %2612  ;;  %v7059_v27 = vld [vmem:[#allocation27_spill] sm:$0xff] }
 0x3ed   :  { %3017 = vst [vmem:[%s6625_s5 + $0x2d8] sm:$0xff] %v2853_v58  ;;  %4019 = vrcp.f32 %v2613_v29  ;;  %v2607_v25 = vpop.xlane.xlu0 %2606 }
 0x3ee   :  { %v4008_v12 = vpop.eup %4007  ;;  %3014 = vst [vmem:[%s6625_s5 + $0x2c0] sm:$0xff] %v2847_v40  ;;  %4021 = vrcp.f32 %v2607_v25  ;;  %v7060_v25 = vld [vmem:[#allocation63_spill] sm:$0xff] }
 0x3ef   :  { %v4010_v14 = vpop.eup %4009  ;;  %v2849_v31 = vmul.f32 %v4008_v12, %v7054_v55 }
 0x3f0   :  { %v2859_v18 = vmul.f32 %v4010_v14, %v7055_v30  ;;  %v2609_v50 = vpop.xlane.xlu1 %2608 }
 0x3f1   :  { %3015 = vst [vmem:[%s6625_s5 + $0x2c8] sm:$0xff] %v2849_v31  ;;  %4023 = vrcp.f32 %v2609_v50  ;;  %v2619_v56 = vpop.xlane.xlu0 %2618 }
 0x3f2   :  { %v4012_v60 = vpop.eup %4011  ;;  %3020 = vst [vmem:[%s6625_s5 + $0x2f0] sm:$0xff] %v2859_v18  ;;  %4025 = vrcp.f32 %v2619_v56 }
 0x3f3   :  { %v4014_v22 = vpop.eup %4013  ;;  %v2861_v28 = vmul.f32 %v4012_v60, %v7056_v8 }
 0x3f4   :  { %v2855_v44 = vmul.f32 %v4014_v22, %v6086_v42  ;;  %v2621_v47 = vpop.xlane.xlu1 %2620 }
 0x3f5   :  { %3021 = vst [vmem:[%s6625_s5 + $0x2f8] sm:$0xff] %v2861_v28  ;;  %4027 = vrcp.f32 %v2621_v47  ;;  %v2615_v19 = vpop.xlane.xlu0 %2614 }
 0x3f6   :  { %v4016_v3 = vpop.eup %4015  ;;  %3018 = vst [vmem:[%s6625_s5 + $0x2e0] sm:$0xff] %v2855_v44  ;;  %4029 = vrcp.f32 %v2615_v19 }
 0x3f7   :  { %v4018_v46 = vpop.eup %4017  ;;  %v2857_v10 = vmul.f32 %v4016_v3, %v6096_v48  ;;  %v7061_v3 = vld [vmem:[#allocation28_spill] sm:$0xff] }
 0x3f8   :  { %v2867_v20 = vmul.f32 %v4018_v46, %v6106_v26  ;;  %v2617_v35 = vpop.xlane.xlu1 %2616 }
 0x3f9   :  { %3019 = vst [vmem:[%s6625_s5 + $0x2e8] sm:$0xff] %v2857_v10  ;;  %4031 = vrcp.f32 %v2617_v35  ;;  %v2627_v42 = vpop.xlane.xlu0 %2626 }
 0x3fa   :  { %v4020_v7 = vpop.eup %4019  ;;  %3024 = vst [vmem:[%s6625_s5 + $0x310] sm:$0xff] %v2867_v20  ;;  %4033 = vrcp.f32 %v2627_v42 }
 0x3fb   :  { %v4022_v38 = vpop.eup %4021  ;;  %v2869_v39 = vmul.f32 %v4020_v7, %v6121_v54 }
 0x3fc   :  { %v2863_v48 = vmul.f32 %v4022_v38, %v7057_v6  ;;  %v2629_v36 = vpop.xlane.xlu1 %2628 }
 0x3fd   :  { %3025 = vst [vmem:[%s6625_s5 + $0x318] sm:$0xff] %v2869_v39  ;;  %4035 = vrcp.f32 %v2629_v36  ;;  %v2623_v26 = vpop.xlane.xlu0 %2622 }
 0x3fe   :  { %v4024_v33 = vpop.eup %4023  ;;  %3022 = vst [vmem:[%s6625_s5 + $0x300] sm:$0xff] %v2863_v48  ;;  %4037 = vrcp.f32 %v2623_v26 }
 0x3ff   :  { %v4026_v61 = vpop.eup %4025  ;;  %v2865_v23 = vmul.f32 %v4024_v33, %v7058_v57 }
 0x400   :  { %v2875_v54 = vmul.f32 %v4026_v61, %v7059_v27  ;;  %v2625_v58 = vpop.xlane.xlu1 %2624 }
 0x401   :  { %3023 = vst [vmem:[%s6625_s5 + $0x308] sm:$0xff] %v2865_v23  ;;  %4039 = vrcp.f32 %v2625_v58  ;;  %v2635_v52 = vpop.xlane.xlu0 %2634 }
 0x402   :  { %v4028_v40 = vpop.eup %4027  ;;  %3028 = vst [vmem:[%s6625_s5 + $0x330] sm:$0xff] %v2875_v54  ;;  %4041 = vrcp.f32 %v2635_v52 }
 0x403   :  { %v4030_v29 = vpop.eup %4029  ;;  %v2877_v12 = vmul.f32 %v4028_v40, %v7060_v25 }
 0x404   :  { %v2871_v14 = vmul.f32 %v4030_v29, %v6150_v2  ;;  %v2637_v55 = vpop.xlane.xlu1 %2636 }
 0x405   :  { %3029 = vst [vmem:[%s6625_s5 + $0x338] sm:$0xff] %v2877_v12  ;;  %4043 = vrcp.f32 %v2637_v55  ;;  %v2631_v31 = vpop.xlane.xlu0 %2630 }
 0x406   :  { %v4032_v30 = vpop.eup %4031  ;;  %3026 = vst [vmem:[%s6625_s5 + $0x320] sm:$0xff] %v2871_v14  ;;  %4045 = vrcp.f32 %v2631_v31 }
 0x407   :  { %v4034_v18 = vpop.eup %4033  ;;  %v2873_v50 = vmul.f32 %v4032_v30, %v6160_v32 }
 0x408   :  { %v2883_v56 = vmul.f32 %v4034_v18, %v6170_v9  ;;  %v2633_v60 = vpop.xlane.xlu1 %2632 }
 0x409   :  { %3027 = vst [vmem:[%s6625_s5 + $0x328] sm:$0xff] %v2873_v50  ;;  %4047 = vrcp.f32 %v2633_v60  ;;  %v2643_v2 = vpop.xlane.xlu0 %2642 }
 0x40a   :  { %v4036_v22 = vpop.eup %4035  ;;  %3032 = vst [vmem:[%s6625_s5 + $0x350] sm:$0xff] %v2883_v56  ;;  %4049 = vrcp.f32 %v2643_v2 }
 0x40b   :  { %v4038_v8 = vpop.eup %4037  ;;  %v2885_v28 = vmul.f32 %v4036_v22, %v6183_v51 }
 0x40c   :  { %v2879_v32 = vmul.f32 %v4038_v8, %v6187_v21  ;;  %v2645_v44 = vpop.xlane.xlu1 %2644 }
 0x40d   :  { %3033 = vst [vmem:[%s6625_s5 + $0x358] sm:$0xff] %v2885_v28  ;;  %4051 = vrcp.f32 %v2645_v44  ;;  %v2639_v9 = vpop.xlane.xlu0 %2638 }
 0x40e   :  { %v4040_v47 = vpop.eup %4039  ;;  %3030 = vst [vmem:[%s6625_s5 + $0x340] sm:$0xff] %v2879_v32  ;;  %4053 = vrcp.f32 %v2639_v9 }
 0x40f   :  { %v4042_v19 = vpop.eup %4041  ;;  %v2881_v46 = vmul.f32 %v4040_v47, %v7061_v3 }
 0x410   :  { %v2891_v51 = vmul.f32 %v4042_v19, %v6197_v59  ;;  %v2641_v10 = vpop.xlane.xlu1 %2640 }
 0x411   :  { %3031 = vst [vmem:[%s6625_s5 + $0x348] sm:$0xff] %v2881_v46  ;;  %4055 = vrcp.f32 %v2641_v10  ;;  %v2651_v21 = vpop.xlane.xlu0 %2650 }
 0x412   :  { %v4044_v20 = vpop.eup %4043  ;;  %3036 = vst [vmem:[%s6625_s5 + $0x370] sm:$0xff] %v2891_v51  ;;  %4057 = vrcp.f32 %v2651_v21 }
 0x413   :  { %v4046_v35 = vpop.eup %4045  ;;  %v2893_v42 = vmul.f32 %v4044_v20, %v6203_v62 }
 0x414   :  { %v2887_v7 = vmul.f32 %v4046_v35, %v6206_v49  ;;  %v2653_v38 = vpop.xlane.xlu1 %2652 }
 0x415   :  { %3037 = vst [vmem:[%s6625_s5 + $0x378] sm:$0xff] %v2893_v42  ;;  %4059 = vrcp.f32 %v2653_v38  ;;  %v2647_v59 = vpop.xlane.xlu0 %2646 }
 0x416   :  { %v4048_v39 = vpop.eup %4047  ;;  %3034 = vst [vmem:[%s6625_s5 + $0x360] sm:$0xff] %v2887_v7  ;;  %4061 = vrcp.f32 %v2647_v59 }
 0x417   :  { %v4050_v6 = vpop.eup %4049  ;;  %v2889_v48 = vmul.f32 %v4048_v39, %v6215_v34 }
 0x418   :  { %v2899_v62 = vmul.f32 %v4050_v6, %v6223_v17  ;;  %v2649_v36 = vpop.xlane.xlu1 %2648 }
 0x419   :  { %3035 = vst [vmem:[%s6625_s5 + $0x368] sm:$0xff] %v2889_v48  ;;  %4063 = vrcp.f32 %v2649_v36  ;;  %v2659_v49 = vpop.xlane.xlu0 %2658 }
 0x41a   :  { %v4052_v26 = vpop.eup %4051  ;;  %3040 = vst [vmem:[%s6625_s5 + $0x390] sm:$0xff] %v2899_v62  ;;  %4065 = vrcp.f32 %v2659_v49 }
 0x41b   :  { %v4054_v33 = vpop.eup %4053  ;;  %v2901_v61 = vmul.f32 %v4052_v26, %v6235_v16 }
 0x41c   :  { %v2895_v34 = vmul.f32 %v4054_v33, %v6237_v53  ;;  %v2661_v57 = vpop.xlane.xlu1 %2660 }
 0x41d   :  { %3041 = vst [vmem:[%s6625_s5 + $0x398] sm:$0xff] %v2901_v61  ;;  %4067 = vrcp.f32 %v2661_v57  ;;  %v2655_v17 = vpop.xlane.xlu0 %2654 }
 0x41e   :  { %v4056_v23 = vpop.eup %4055  ;;  %3038 = vst [vmem:[%s6625_s5 + $0x380] sm:$0xff] %v2895_v34  ;;  %4069 = vrcp.f32 %v2655_v17 }
 0x41f   :  { %v4058_v27 = vpop.eup %4057  ;;  %v2897_v54 = vmul.f32 %v4056_v23, %v6242_v37 }
 0x420   :  { %v2907_v16 = vmul.f32 %v4058_v27, %v6245_v45  ;;  %v2657_v58 = vpop.xlane.xlu1 %2656 }
 0x421   :  { %3039 = vst [vmem:[%s6625_s5 + $0x388] sm:$0xff] %v2897_v54  ;;  %4071 = vrcp.f32 %v2657_v58  ;;  %v2663_v53 = vpop.xlane.xlu0 %2662 }
 0x422   :  { %v4060_v52 = vpop.eup %4059  ;;  %3044 = vst [vmem:[%s6625_s5 + $0x3b0] sm:$0xff] %v2907_v16  ;;  %4073 = vrcp.f32 %v2663_v53 }
 0x423   :  { %v4062_v40 = vpop.eup %4061  ;;  %v2909_v29 = vmul.f32 %v4060_v52, %v6250_v11 }
 0x424   :  { %v2903_v37 = vmul.f32 %v4062_v40, %v6254_v63  ;;  %v2665_v25 = vpop.xlane.xlu1 %2664 }
 0x425   :  { %3045 = vst [vmem:[%s6625_s5 + $0x3b8] sm:$0xff] %v2909_v29  ;;  %4075 = vrcp.f32 %v2665_v25  ;;  %v2667_v45 = vpop.xlane.xlu0 %2666 }
 0x426   :  { %v4064_v12 = vpop.eup %4063  ;;  %3042 = vst [vmem:[%s6625_s5 + $0x3a0] sm:$0xff] %v2903_v37  ;;  %4077 = vrcp.f32 %v2667_v45 }
 0x427   :  { %v4066_v14 = vpop.eup %4065  ;;  %v2905_v55 = vmul.f32 %v4064_v12, %v6262_v15 }
 0x428   :  { %v2915_v11 = vmul.f32 %v4066_v14, %v6268_v1  ;;  %v2669_v31 = vpop.xlane.xlu1 %2668 }
 0x429   :  { %3043 = vst [vmem:[%s6625_s5 + $0x3a8] sm:$0xff] %v2905_v55  ;;  %4079 = vrcp.f32 %v2669_v31 }
 0x42a   :  { %v4068_v63 = vpop.eup %4067  ;;  %3048 = vst [vmem:[%s6625_s5 + $0x3d0] sm:$0xff] %v2915_v11 }
 0x42b   :  { %v4070_v30 = vpop.eup %4069  ;;  %v2917_v18 = vmul.f32 %v4068_v63, %v6279_v41 }
 0x42c   :  { %v2911_v50 = vmul.f32 %v4070_v30, %v6281_v4 }
 0x42d   :  { %3049 = vst [vmem:[%s6625_s5 + $0x3d8] sm:$0xff] %v2917_v18 }
 0x42e   :  { %v4072_v15 = vpop.eup %4071  ;;  %3046 = vst [vmem:[%s6625_s5 + $0x3c0] sm:$0xff] %v2911_v50 }
 0x42f   :  { %v4074_v1 = vpop.eup %4073  ;;  %v2913_v56 = vmul.f32 %v4072_v15, %v6285_v13 }
 0x430   :  { %v2919_v60 = vmul.f32 %v4074_v1, %v6287_v43 }
 0x431   :  { %3047 = vst [vmem:[%s6625_s5 + $0x3c8] sm:$0xff] %v2913_v56 }
 0x432   :  { %v4076_v41 = vpop.eup %4075  ;;  %3050 = vst [vmem:[%s6625_s5 + $0x3e0] sm:$0xff] %v2919_v60 }
 0x433   :  { %v4078_v4 = vpop.eup %4077  ;;  %v2921_v2 = vmul.f32 %v4076_v41, %v6294_v5 }
 0x434   :  { %v2923_v22 = vmul.f32 %v4078_v4, %v6291_v0 }
 0x435   :  { %3051 = vst [vmem:[%s6625_s5 + $0x3e8] sm:$0xff] %v2921_v2 }
 0x436   :  { %v4080_v13 = vpop.eup %4079  ;;  %3052 = vst [vmem:[%s6625_s5 + $0x3f0] sm:$0xff] %v2923_v22 }
 0x437   :  { %v2925_v43 = vmul.f32 %v4080_v13, %v6302_v24 }
 0x439   :  { %3053 = vst [vmem:[%s6625_s5 + $0x3f8] sm:$0xff] %v2925_v43 }

</bundles_post_ra>
